<compile_context>
chip_gen: v7x
topology: tpu7x:2x2x1
jax: 0.10.0
libtpu: 0.0.40
codegen_flags: <defaults>
</compile_context>

<pallas_src>
import functools
import math

import jax
import jax.numpy as jnp
from jax import lax
from jax.experimental import pallas as pl
from jax.experimental.pallas import tpu as pltpu

EPS = 1e-5                      # nn.BatchNorm2d default
VMEM_LIMIT = 64 * 1024 * 1024   # explicit scoped-VMEM limit (v5e default is 16 MiB)


def _pick_tile_m(m, max_tile=512):
    """Largest divisor of m <= max_tile, preferring multiples of 8.

    Never returns m itself unless m <= max_tile (avoids whole-array blocks)."""
    best, best8 = 1, None
    t = 1
    while t <= min(m, max_tile):
        if m % t == 0:
            best = t
            if t % 8 == 0:
                best8 = t
        t += 1
    return best8 if best8 is not None else best


def _pick_tile_h(h_img, w_img, c_in, c_out, budget_bytes=2 << 20):
    """Largest divisor of H whose per-block working set fits a small VMEM budget."""
    per_row = w_img * (8 * c_in + 4 * c_out)   # conservative (f32 scratch + in/out)
    best = 1
    for t in range(1, h_img + 1):
        if h_img % t == 0 and t * per_row <= budget_bytes:
            best = t
    return best


# --------------------------- stage 1: conv1x1 + stats ----------------------- #
def _conv1x1_stats_kernel(x_ref, w_ref, y_ref, sum_ref, sq_ref):
    @pl.when(pl.program_id(1) == 0)
    def _():
        sum_ref[...] = jnp.zeros_like(sum_ref)
        sq_ref[...] = jnp.zeros_like(sq_ref)

    y = jnp.dot(x_ref[...].astype(w_ref.dtype), w_ref[...],
                preferred_element_type=jnp.float32)
    y_ref[...] = y.astype(y_ref.dtype)
    sum_ref[...] += jnp.sum(y, axis=0, keepdims=True)
    sq_ref[...] += jnp.sum(y * y, axis=0, keepdims=True)


def conv1x1_stats(x2d, w, *, tile_m, out_dtype):
    m, k = x2d.shape
    c = w.shape[1]
    assert m % tile_m == 0
    num_tiles = m // tile_m
    p = 2 if (num_tiles >= 2 and num_tiles % 2 == 0) else 1   # megacore chunks
    tpc = num_tiles // p
    return pl.pallas_call(
        _conv1x1_stats_kernel,
        grid=(p, tpc),
        in_specs=[
            pl.BlockSpec((tile_m, k), lambda i, t: (i * tpc + t, 0)),
            pl.BlockSpec((k, c), lambda i, t: (0, 0)),
        ],
        out_specs=[
            pl.BlockSpec((tile_m, c), lambda i, t: (i * tpc + t, 0)),
            pl.BlockSpec((None, 1, c), lambda i, t: (i, 0, 0)),   # per-chunk partials
            pl.BlockSpec((None, 1, c), lambda i, t: (i, 0, 0)),
        ],
        out_shape=[
            jax.ShapeDtypeStruct((m, c), out_dtype),
            jax.ShapeDtypeStruct((p, 1, c), jnp.float32),
            jax.ShapeDtypeStruct((p, 1, c), jnp.float32),
        ],
        compiler_params=pltpu.CompilerParams(
            dimension_semantics=("parallel", "arbitrary"),
            vmem_limit_bytes=VMEM_LIMIT),
    )(x2d, w)


# ------------- stage 2: fused BN1+ReLU -> 3x3 conv (row-tiled, haloed) ------- #
def _conv3x3_bn_stats_kernel(tile_h, w_img, c_in, c_out, pad,
                             yc_ref, yt_ref, yb_ref, scale_ref, bias_ref, w_ref,
                             y_ref, sum_ref, sq_ref, buf_ref):
    th = pl.program_id(1)
    n_th = pl.num_programs(1)
    hw_blk = tile_h * w_img

    @pl.when(th == 0)
    def _():
        sum_ref[...] = jnp.zeros_like(sum_ref)
        sq_ref[...] = jnp.zeros_like(sq_ref)

    def bn_relu(v):
        return jnp.maximum(v.astype(jnp.float32) * scale_ref[...] + bias_ref[...], 0.0)

    # BN1 + ReLU fused here; halo rows come from neighbouring blocks, zeroed at
    # the true image top/bottom.  The whole used buffer region is rewritten every
    # step (no cross-step state).
    top = bn_relu(yt_ref[...]) * (th > 0).astype(jnp.float32)
    bot = bn_relu(yb_ref[...]) * (th < n_th - 1).astype(jnp.float32)
    buf_ref[pl.ds(pad - w_img, w_img), :] = top
    buf_ref[pl.ds(pad, hw_blk), :] = bn_relu(yc_ref[...])
    buf_ref[pl.ds(pad + hw_blk, w_img), :] = bot

    # (rows, 1) horizontal-boundary masks (broadcast over channels)
    col = lax.broadcasted_iota(jnp.int32, (hw_blk, 1), 0) % w_img
    not_left = col >= 1
    not_right = col <= w_img - 2

    acc = jnp.zeros((hw_blk, c_out), jnp.float32)
    for dh in range(3):
        base = pad + (dh - 1) * w_img          # 8-aligned (W % 8 == 0, pad % 8 == 0)
        for dw in range(3):
            win = buf_ref[pl.ds(base + dw - 1, hw_blk), :]
            if dw == 0:
                win = jnp.where(not_left, win, jnp.zeros_like(win))
            elif dw == 2:
                win = jnp.where(not_right, win, jnp.zeros_like(win))
            acc += jnp.dot(win.astype(w_ref.dtype), w_ref[dh * 3 + dw],
                           preferred_element_type=jnp.float32)

    y_ref[...] = acc.astype(y_ref.dtype)
    sum_ref[...] += jnp.sum(acc, axis=0, keepdims=True)
    sq_ref[...] += jnp.sum(acc * acc, axis=0, keepdims=True)


def conv3x3_bn_stats(y_in_3d, scale, bias, w9, h_img, w_img, *, tile_h, out_dtype):
    n, hw, c_in = y_in_3d.shape
    assert hw == h_img * w_img
    c_out = w9.shape[-1]
    # TODO(synk): support image widths that are not a multiple of 8 (halo row
    # BlockSpec needs (8,128)-compatible second-to-last dim).
    assert w_img % 8 == 0, "row-tiled 3x3 path requires W % 8 == 0"
    assert h_img % tile_h == 0
    n_th = h_img // tile_h
    hw_blk = tile_h * w_img
    pad = ((w_img + 1 + 7) // 8) * 8               # >= W+1, 8-aligned center start
    buf_len = pad + hw_blk + w_img + 8

    kernel = functools.partial(_conv3x3_bn_stats_kernel,
                               tile_h, w_img, c_in, c_out, pad)
    return pl.pallas_call(
        kernel,
        grid=(n, n_th),
        in_specs=[
            pl.BlockSpec((None, hw_blk, c_in), lambda b, t: (b, t, 0)),
            # one-row top / bottom halos (same input array, row-granular blocks)
            pl.BlockSpec((None, w_img, c_in),
                         lambda b, t: (b, jnp.maximum(t * tile_h - 1, 0), 0)),
            pl.BlockSpec((None, w_img, c_in),
                         lambda b, t: (b, jnp.minimum((t + 1) * tile_h, h_img - 1), 0)),
            pl.BlockSpec((1, c_in), lambda b, t: (0, 0)),
            pl.BlockSpec((1, c_in), lambda b, t: (0, 0)),
            pl.BlockSpec((9, c_in, c_out), lambda b, t: (0, 0, 0)),
        ],
        out_specs=[
            pl.BlockSpec((None, hw_blk, c_out), lambda b, t: (b, t, 0)),
            pl.BlockSpec((None, 1, c_out), lambda b, t: (b, 0, 0)),
            pl.BlockSpec((None, 1, c_out), lambda b, t: (b, 0, 0)),
        ],
        out_shape=[
            jax.ShapeDtypeStruct((n, hw, c_out), out_dtype),
            jax.ShapeDtypeStruct((n, 1, c_out), jnp.float32),
            jax.ShapeDtypeStruct((n, 1, c_out), jnp.float32),
        ],
        scratch_shapes=[pltpu.VMEM((buf_len, c_in), jnp.float32)],
        compiler_params=pltpu.CompilerParams(
            dimension_semantics=("parallel", "arbitrary"),
            vmem_limit_bytes=VMEM_LIMIT),
    )(y_in_3d, y_in_3d, y_in_3d, scale, bias, w9)


# ------------- stage 3: fused BN2+ReLU -> conv1x1 + stats -------------------- #
def _bn_relu_conv1x1_stats_kernel(y_in_ref, scale_ref, bias_ref, w_ref,
                                  y_ref, sum_ref, sq_ref):
    @pl.when(pl.program_id(1) == 0)
    def _():
        sum_ref[...] = jnp.zeros_like(sum_ref)
        sq_ref[...] = jnp.zeros_like(sq_ref)

    h = jnp.maximum(y_in_ref[...].astype(jnp.float32) * scale_ref[...] + bias_ref[...], 0.0)
    y = jnp.dot(h.astype(w_ref.dtype), w_ref[...], preferred_element_type=jnp.float32)
    y_ref[...] = y.astype(y_ref.dtype)
    sum_ref[...] += jnp.sum(y, axis=0, keepdims=True)
    sq_ref[...] += jnp.sum(y * y, axis=0, keepdims=True)


def bn_relu_conv1x1_stats(y_in, scale, bias, w, *, tile_m, out_dtype):
    m, k = y_in.shape
    c = w.shape[1]
    assert m % tile_m == 0
    num_tiles = m // tile_m
    p = 2 if (num_tiles >= 2 and num_tiles % 2 == 0) else 1
    tpc = num_tiles // p
    return pl.pallas_call(
        _bn_relu_conv1x1_stats_kernel,
        grid=(p, tpc),
        in_specs=[
            pl.BlockSpec((tile_m, k), lambda i, t: (i * tpc + t, 0)),
            pl.BlockSpec((1, k), lambda i, t: (0, 0)),
            pl.BlockSpec((1, k), lambda i, t: (0, 0)),
            pl.BlockSpec((k, c), lambda i, t: (0, 0)),
        ],
        out_specs=[
            pl.BlockSpec((tile_m, c), lambda i, t: (i * tpc + t, 0)),
            pl.BlockSpec((None, 1, c), lambda i, t: (i, 0, 0)),
            pl.BlockSpec((None, 1, c), lambda i, t: (i, 0, 0)),
        ],
        out_shape=[
            jax.ShapeDtypeStruct((m, c), out_dtype),
            jax.ShapeDtypeStruct((p, 1, c), jnp.float32),
            jax.ShapeDtypeStruct((p, 1, c), jnp.float32),
        ],
        compiler_params=pltpu.CompilerParams(
            dimension_semantics=("parallel", "arbitrary"),
            vmem_limit_bytes=VMEM_LIMIT),
    )(y_in, scale, bias, w)


# ------------- stage 4: BN3 + in-kernel tiled residual + ReLU ---------------- #
def _bn_residual_relu_kernel(expansion, y_ref, scale_ref, bias_ref, x_ref, o_ref):
    out = y_ref[...].astype(jnp.float32) * scale_ref[...] + bias_ref[...]
    # einops.repeat 'b c h w -> b (tile c) h w' == channel-tiling: a pure
    # lane-dim concat of the residual (no expansion matmul).
    res = x_ref[...].astype(jnp.float32)
    out = out + jnp.concatenate([res] * expansion, axis=1)
    o_ref[...] = jnp.maximum(out, 0.0)


def _bn_relu_kernel(y_ref, scale_ref, bias_ref, o_ref):
    o_ref[...] = jnp.maximum(
        y_ref[...].astype(jnp.float32) * scale_ref[...] + bias_ref[...], 0.0)


def bn_residual_relu(y3, scale, bias, x_res, *, tile_m):
    m, c_out = y3.shape
    assert m % tile_m == 0
    grid = (m // tile_m,)
    cparams = pltpu.CompilerParams(dimension_semantics=("parallel",),
                                   vmem_limit_bytes=VMEM_LIMIT)
    y_spec = pl.BlockSpec((tile_m, c_out), lambda i: (i, 0))
    vec_spec = pl.BlockSpec((1, c_out), lambda i: (0, 0))
    out_shape = jax.ShapeDtypeStruct((m, c_out), jnp.float32)
    if x_res is None:
        return pl.pallas_call(
            _bn_relu_kernel, grid=grid,
            in_specs=[y_spec, vec_spec, vec_spec],
            out_specs=y_spec, out_shape=out_shape, compiler_params=cparams,
        )(y3, scale, bias)
    c_in = x_res.shape[1]
    kernel = functools.partial(_bn_residual_relu_kernel, c_out // c_in)
    return pl.pallas_call(
        kernel, grid=grid,
        in_specs=[y_spec, vec_spec, vec_spec,
                  pl.BlockSpec((tile_m, c_in), lambda i: (i, 0))],
        out_specs=y_spec, out_shape=out_shape, compiler_params=cparams,
    )(y3, scale, bias, x_res)


# ------------------------------- JAX glue ----------------------------------- #
def _bn_scale_bias(s, q, gamma, beta, count):
    # reduce per-chunk partial stats, then finalize (tiny (1,C) math)
    s = jnp.sum(s, axis=0)      # (chunks,1,C) -> (1,C)
    q = jnp.sum(q, axis=0)
    mean = s / count
    var = jnp.maximum(q / count - mean * mean, 0.0)
    scale = gamma * lax.rsqrt(var + EPS)
    bias = beta - mean * scale
    return scale, bias


def bottleneck_expand_forward_nhwc(x_nhwc, params, *, compute_dtype=jnp.bfloat16,
                                   tile_m=None, tile_h=None):
    n, h_img, w_img, c_in = x_nhwc.shape
    m = n * h_img * w_img
    hw = h_img * w_img
    c_hid = params["w1"].shape[-1]
    c_out = params["w3"].shape[-1]
    is_res = (c_out % c_in) == 0

    tm = tile_m or _pick_tile_m(m)
    th_ = tile_h or _pick_tile_h(h_img, w_img, c_hid, c_hid)

    x2d = x_nhwc.reshape(m, c_in)
    w1 = params["w1"].reshape(c_in, c_hid).astype(compute_dtype)
    w2 = params["w2"].reshape(9, c_hid, c_hid).astype(compute_dtype)   # (dh*3+dw, Cin, Cout)
    w3 = params["w3"].reshape(c_hid, c_out).astype(compute_dtype)

    # stage 1: raw 1x1 conv (+ f32 batch stats); BN1 applied lazily inside stage 2
    y1, s1, q1 = conv1x1_stats(x2d, w1, tile_m=tm, out_dtype=compute_dtype)
    sc1, bi1 = _bn_scale_bias(s1, q1, params["g1"], params["b1"], m)

    # stage 2: fused BN1+ReLU -> row-tiled haloed 3x3 conv (+ stats)
    y2, s2, q2 = conv3x3_bn_stats(y1.reshape(n, hw, c_hid), sc1, bi1, w2,
                                  h_img, w_img, tile_h=th_, out_dtype=compute_dtype)
    sc2, bi2 = _bn_scale_bias(s2, q2, params["g2"], params["b2"], m)

    # stage 3: fused BN2+ReLU -> 1x1 conv (+ stats)
    y3, s3, q3 = bn_relu_conv1x1_stats(y2.reshape(m, c_hid), sc2, bi2, w3,
                                       tile_m=tm, out_dtype=compute_dtype)
    sc3, bi3 = _bn_scale_bias(s3, q3, params["g3"], params["b3"], m)

    # stage 4: BN3 + channel-tiled residual + ReLU (f32 output)
    out = bn_residual_relu(y3, sc3, bi3, x2d if is_res else None, tile_m=tm)
    return out.reshape(n, h_img, w_img, c_out)


def bottleneck_expand_forward(x_nchw, params, *, compute_dtype=jnp.bfloat16,
                              tile_m=None, tile_h=None):
    # PyTorch NCHW interface; layout change stays outside the kernels.
    x = jnp.transpose(x_nchw, (0, 2, 3, 1))
    out = bottleneck_expand_forward_nhwc(x, params, compute_dtype=compute_dtype,
                                         tile_m=tile_m, tile_h=tile_h)
    return jnp.transpose(out, (0, 3, 1, 2))


# ------------------------- deterministic parameters ------------------------- #
def init_params(key, in_channels, hidden_channels, out_channels):
    k1, k2, k3 = jax.random.split(key, 3)
    # conv1: reset_parameters overrides with normal(std = 1/sqrt(out_ch_of_conv1))
    std1 = 1.0 / math.sqrt(hidden_channels)
    w1 = std1 * jax.random.normal(k1, (1, 1, in_channels, hidden_channels), jnp.float32)
    # conv2 / conv3: variance_scaling_ (fan_in, truncated normal) — approximated with
    # a plain normal of the same std; exact distribution is irrelevant for the kernel.
    std2 = math.sqrt(1.0 / (hidden_channels * 9)) / 0.8796256610342398
    w2 = std2 * jax.random.normal(k2, (3, 3, hidden_channels, hidden_channels), jnp.float32)
    std3 = math.sqrt(1.0 / hidden_channels) / 0.8796256610342398
    w3 = std3 * jax.random.normal(k3, (1, 1, hidden_channels, out_channels), jnp.float32)
    return dict(
        w1=w1, w2=w2, w3=w3,
        g1=jnp.ones((1, hidden_channels), jnp.float32),
        b1=jnp.zeros((1, hidden_channels), jnp.float32),
        g2=jnp.ones((1, hidden_channels), jnp.float32),
        b2=jnp.zeros((1, hidden_channels), jnp.float32),
        g3=jnp.ones((1, out_channels), jnp.float32),
        b3=jnp.zeros((1, out_channels), jnp.float32),
    )


# ------------------------------ JAX reference -------------------------------- #
def _ref_forward(x_nchw, params):
    x = jnp.transpose(x_nchw, (0, 2, 3, 1))
    dn = ("NHWC", "HWIO", "NHWC")

    def bn(y, g, b):
        mean = y.mean(axis=(0, 1, 2), keepdims=True)
        var = ((y - mean) ** 2).mean(axis=(0, 1, 2), keepdims=True)
        return (y - mean) / jnp.sqrt(var + EPS) * g.reshape(1, 1, 1, -1) + b.reshape(1, 1, 1, -1)

    def bn_relu(y, g, b):
        return jnp.maximum(bn(y, g, b), 0.0)

    h = bn_relu(lax.conv_general_dilated(x, params["w1"], (1, 1), "VALID",
                                         dimension_numbers=dn), params["g1"], params["b1"])
    h = bn_relu(lax.conv_general_dilated(h, params["w2"], (1, 1), "SAME",
                                         dimension_numbers=dn), params["g2"], params["b2"])
    h = bn(lax.conv_general_dilated(h, params["w3"], (1, 1), "VALID",
                                    dimension_numbers=dn), params["g3"], params["b3"])
    cin = x.shape[-1]
    cout = h.shape[-1]
    if cout % cin == 0:
        h = h + jnp.tile(x, (1, 1, 1, cout // cin))
    h = jnp.maximum(h, 0.0)
    return jnp.transpose(h, (0, 3, 1, 2))


# ---------------------------------- main -------------------------------------- #
if __name__ == "__main__":
    # small shapes consistent with the module (in=4, hidden=8, out=8 => expansion=2)
    N, Cin, H, W = 2, 4, 16, 16
    Chid, Cout = 8, 8

    key = jax.random.PRNGKey(0)
    kx, kp = jax.random.split(key)
    x = jax.random.normal(kx, (N, Cin, H, W), jnp.float32)   # NCHW like PyTorch
    params = init_params(kp, Cin, Chid, Cout)

    ref = jax.block_until_ready(_ref_forward(x, params))

    # 1) f32 compute path with small explicit tiles: exercises multi-tile streaming,
    #    per-chunk parallel stats, and the row-tiled halo logic; tight tolerance.
    f32_fwd = jax.jit(lambda xx: bottleneck_expand_forward(
        xx, params, compute_dtype=jnp.float32, tile_m=128, tile_h=4))
    out_f32 = jax.block_until_ready(f32_fwd(x))
    assert out_f32.shape == (N, Cout, H, W), out_f32.shape
    err32 = float(jnp.abs(out_f32 - ref).max())
    assert jnp.allclose(out_f32, ref, atol=2e-3, rtol=2e-3), err32

    # 2) default perf config: bf16 MXU + bf16 intermediates, auto tiles;
    #    bf16-level tolerance (stats stay f32).
    bf16_fwd = jax.jit(lambda xx: bottleneck_expand_forward(xx, params))
    out_bf16 = jax.block_until_ready(bf16_fwd(x))
    assert out_bf16.shape == (N, Cout, H, W), out_bf16.shape
    err16 = float(jnp.abs(out_bf16 - ref).max())
    assert jnp.allclose(out_bf16, ref, atol=8e-2, rtol=8e-2), err16

    print("KERNEL_OK")
</pallas_src>

<mosaic_0001>
module attributes {stable_mosaic.version = 11 : i64} {
  func.func @_conv1x1_stats_kernel(%arg0: i32, %arg1: i32, %arg2: memref<128x4xf32, #tpu.memory_space<vmem>>, %arg3: memref<4x8xf32, #tpu.memory_space<vmem>>, %arg4: memref<128x8xf32, #tpu.memory_space<vmem>>, %arg5: memref<1x1x8xf32, #tpu.memory_space<vmem>>, %arg6: memref<1x1x8xf32, #tpu.memory_space<vmem>>) attributes {dimension_semantics = [#tpu.dimension_semantics<parallel>, #tpu.dimension_semantics<arbitrary>], iteration_bounds = array<i64: 2, 2>, scalar_prefetch = 0 : i64, scratch_operands = 0 : i64, tpu.core_type = #tpu.core_type<tc>, window_params = [{transform_indices = @transform_0, window_bounds = array<i64: 128, 4>}, {pipeline_mode = #tpu.pipeline_mode<synchronous>, transform_indices = @transform_1, window_bounds = array<i64: 4, 8>}, {transform_indices = @transform_2, window_bounds = array<i64: 128, 8>}, {transform_indices = @transform_3, window_bounds = array<i64: 1, 1, 8>}, {transform_indices = @transform_4, window_bounds = array<i64: 1, 1, 8>}]} {
    %c0_i32 = arith.constant 0 : i32
    %0 = arith.cmpi eq, %arg1, %c0_i32 : i32
    %1 = arith.extui %0 : i1 to i32
    %c0_i32_0 = arith.constant 0 : i32
    %2 = arith.cmpi ne, %1, %c0_i32_0 : i32
    scf.if %2 {
      %cst_20 = arith.constant 0.000000e+00 : f32
      %24 = vector.broadcast %cst_20 : f32 to vector<1x8xf32>
      %c0_21 = arith.constant 0 : index
      %c0_22 = arith.constant 0 : index
      %c0_23 = arith.constant 0 : index
      %25 = vector.load %arg5[%c0_21, %c0_22, %c0_23] : memref<1x1x8xf32, #tpu.memory_space<vmem>>, vector<1x1x8xf32>
      %26 = vector.shape_cast %25 : vector<1x1x8xf32> to vector<1x8xf32>
      %27 = vector.shape_cast %24 : vector<1x8xf32> to vector<1x1x8xf32>
      tpu.vector_store %arg5[%c0_21, %c0_22, %c0_23], %27 {strides = array<i32>} : memref<1x1x8xf32, #tpu.memory_space<vmem>>, vector<1x1x8xf32>,
      %cst_24 = arith.constant 0.000000e+00 : f32
      %28 = vector.broadcast %cst_24 : f32 to vector<1x8xf32>
      %c0_25 = arith.constant 0 : index
      %c0_26 = arith.constant 0 : index
      %c0_27 = arith.constant 0 : index
      %29 = vector.load %arg6[%c0_25, %c0_26, %c0_27] : memref<1x1x8xf32, #tpu.memory_space<vmem>>, vector<1x1x8xf32>
      %30 = vector.shape_cast %29 : vector<1x1x8xf32> to vector<1x8xf32>
      %31 = vector.shape_cast %28 : vector<1x8xf32> to vector<1x1x8xf32>
      tpu.vector_store %arg6[%c0_25, %c0_26, %c0_27], %31 {strides = array<i32>} : memref<1x1x8xf32, #tpu.memory_space<vmem>>, vector<1x1x8xf32>,
    } else {
    }
    %c0 = arith.constant 0 : index
    %c0_1 = arith.constant 0 : index
    %3 = vector.load %arg2[%c0, %c0_1] : memref<128x4xf32, #tpu.memory_space<vmem>>, vector<128x4xf32>
    %c0_2 = arith.constant 0 : index
    %c0_3 = arith.constant 0 : index
    %4 = vector.load %arg3[%c0_2, %c0_3] : memref<4x8xf32, #tpu.memory_space<vmem>>, vector<4x8xf32>
    %cst = arith.constant dense<0.000000e+00> : vector<128x8xf32>
    %5 = tpu.matmul %3, %4, %cst {dimension_numbers = #tpu.dot_dimension_numbers<[1], [0], [0], [1], [0, 0, 1, 1], [], []>} : vector<128x4xf32>, vector<4x8xf32>, vector<128x8xf32> -> vector<128x8xf32>
    %c0_4 = arith.constant 0 : index
    %c0_5 = arith.constant 0 : index
    %6 = vector.load %arg4[%c0_4, %c0_5] : memref<128x8xf32, #tpu.memory_space<vmem>>, vector<128x8xf32>
    tpu.vector_store %arg4[%c0_4, %c0_5], %5 {strides = array<i32>} : memref<128x8xf32, #tpu.memory_space<vmem>>, vector<128x8xf32>,
    %c0_6 = arith.constant 0 : index
    %c0_7 = arith.constant 0 : index
    %c0_8 = arith.constant 0 : index
    %7 = vector.load %arg5[%c0_6, %c0_7, %c0_8] : memref<1x1x8xf32, #tpu.memory_space<vmem>>, vector<1x1x8xf32>
    %8 = vector.shape_cast %7 : vector<1x1x8xf32> to vector<1x8xf32>
    %cst_9 = arith.constant dense<0.000000e+00> : vector<8xf32>
    %9 = vector.multi_reduction <add>, %5, %cst_9 [0] : vector<128x8xf32> to vector<8xf32>
    %10 = vector.shape_cast %9 : vector<8xf32> to vector<1x8xf32>
    %11 = arith.addf %8, %10 : vector<1x8xf32>
    %c0_10 = arith.constant 0 : index
    %c0_11 = arith.constant 0 : index
    %c0_12 = arith.constant 0 : index
    %12 = vector.load %arg5[%c0_10, %c0_11, %c0_12] : memref<1x1x8xf32, #tpu.memory_space<vmem>>, vector<1x1x8xf32>
    %13 = vector.shape_cast %12 : vector<1x1x8xf32> to vector<1x8xf32>
    %14 = vector.shape_cast %11 : vector<1x8xf32> to vector<1x1x8xf32>
    tpu.vector_store %arg5[%c0_10, %c0_11, %c0_12], %14 {strides = array<i32>} : memref<1x1x8xf32, #tpu.memory_space<vmem>>, vector<1x1x8xf32>,
    %c0_13 = arith.constant 0 : index
    %c0_14 = arith.constant 0 : index
    %c0_15 = arith.constant 0 : index
    %15 = vector.load %arg6[%c0_13, %c0_14, %c0_15] : memref<1x1x8xf32, #tpu.memory_space<vmem>>, vector<1x1x8xf32>
    %16 = vector.shape_cast %15 : vector<1x1x8xf32> to vector<1x8xf32>
    %17 = arith.mulf %5, %5 : vector<128x8xf32>
    %cst_16 = arith.constant dense<0.000000e+00> : vector<8xf32>
    %18 = vector.multi_reduction <add>, %17, %cst_16 [0] : vector<128x8xf32> to vector<8xf32>
    %19 = vector.shape_cast %18 : vector<8xf32> to vector<1x8xf32>
    %20 = arith.addf %16, %19 : vector<1x8xf32>
    %c0_17 = arith.constant 0 : index
    %c0_18 = arith.constant 0 : index
    %c0_19 = arith.constant 0 : index
    %21 = vector.load %arg6[%c0_17, %c0_18, %c0_19] : memref<1x1x8xf32, #tpu.memory_space<vmem>>, vector<1x1x8xf32>
    %22 = vector.shape_cast %21 : vector<1x1x8xf32> to vector<1x8xf32>
    %23 = vector.shape_cast %20 : vector<1x8xf32> to vector<1x1x8xf32>
    tpu.vector_store %arg6[%c0_17, %c0_18, %c0_19], %23 {strides = array<i32>} : memref<1x1x8xf32, #tpu.memory_space<vmem>>, vector<1x1x8xf32>,
    return
  }
  func.func @transform_0(%arg0: i32, %arg1: i32) -> (i32, i32) {
    %c2_i32 = arith.constant 2 : i32
    %0 = arith.muli %arg0, %c2_i32 : i32
    %1 = arith.addi %0, %arg1 : i32
    %c0_i32 = arith.constant 0 : i32
    %c0_i32_0 = arith.constant 0 : i32
    return %1, %c0_i32 : i32, i32
  }
  func.func @transform_1(%arg0: i32, %arg1: i32) -> (i32, i32) {
    %c0_i32 = arith.constant 0 : i32
    %c0_i32_0 = arith.constant 0 : i32
    %c0_i32_1 = arith.constant 0 : i32
    return %c0_i32, %c0_i32_0 : i32, i32
  }
  func.func @transform_2(%arg0: i32, %arg1: i32) -> (i32, i32) {
    %c2_i32 = arith.constant 2 : i32
    %0 = arith.muli %arg0, %c2_i32 : i32
    %1 = arith.addi %0, %arg1 : i32
    %c0_i32 = arith.constant 0 : i32
    %c0_i32_0 = arith.constant 0 : i32
    return %1, %c0_i32 : i32, i32
  }
  func.func @transform_3(%arg0: i32, %arg1: i32) -> (i32, i32, i32) {
    %c0_i32 = arith.constant 0 : i32
    %c0_i32_0 = arith.constant 0 : i32
    %c0_i32_1 = arith.constant 0 : i32
    return %arg0, %c0_i32, %c0_i32_0 : i32, i32, i32
  }
  func.func @transform_4(%arg0: i32, %arg1: i32) -> (i32, i32, i32) {
    %c0_i32 = arith.constant 0 : i32
    %c0_i32_0 = arith.constant 0 : i32
    %c0_i32_1 = arith.constant 0 : i32
    return %arg0, %c0_i32, %c0_i32_0 : i32, i32, i32
  }
}

module attributes {stable_mosaic.version = 11 : i64} {
  func.func @_bn_relu_conv1x1_stats_kernel(%arg0: i32, %arg1: i32, %arg2: memref<128x8xf32, #tpu.memory_space<vmem>>, %arg3: memref<1x8xf32, #tpu.memory_space<vmem>>, %arg4: memref<1x8xf32, #tpu.memory_space<vmem>>, %arg5: memref<8x8xf32, #tpu.memory_space<vmem>>, %arg6: memref<128x8xf32, #tpu.memory_space<vmem>>, %arg7: memref<1x1x8xf32, #tpu.memory_space<vmem>>, %arg8: memref<1x1x8xf32, #tpu.memory_space<vmem>>) attributes {dimension_semantics = [#tpu.dimension_semantics<parallel>, #tpu.dimension_semantics<arbitrary>], iteration_bounds = array<i64: 2, 2>, scalar_prefetch = 0 : i64, scratch_operands = 0 : i64, tpu.core_type = #tpu.core_type<tc>, window_params = [{transform_indices = @transform_0, window_bounds = array<i64: 128, 8>}, {pipeline_mode = #tpu.pipeline_mode<synchronous>, transform_indices = @transform_1, window_bounds = array<i64: 1, 8>}, {pipeline_mode = #tpu.pipeline_mode<synchronous>, transform_indices = @transform_2, window_bounds = array<i64: 1, 8>}, {pipeline_mode = #tpu.pipeline_mode<synchronous>, transform_indices = @transform_3, window_bounds = array<i64: 8, 8>}, {transform_indices = @transform_4, window_bounds = array<i64: 128, 8>}, {transform_indices = @transform_5, window_bounds = array<i64: 1, 1, 8>}, {transform_indices = @transform_6, window_bounds = array<i64: 1, 1, 8>}]} {
    %c0_i32 = arith.constant 0 : i32
    %0 = arith.cmpi eq, %arg1, %c0_i32 : i32
    %1 = arith.extui %0 : i1 to i32
    %c0_i32_0 = arith.constant 0 : i32
    %2 = arith.cmpi ne, %1, %c0_i32_0 : i32
    scf.if %2 {
      %cst_25 = arith.constant 0.000000e+00 : f32
      %32 = vector.broadcast %cst_25 : f32 to vector<1x8xf32>
      %c0_26 = arith.constant 0 : index
      %c0_27 = arith.constant 0 : index
      %c0_28 = arith.constant 0 : index
      %33 = vector.load %arg7[%c0_26, %c0_27, %c0_28] : memref<1x1x8xf32, #tpu.memory_space<vmem>>, vector<1x1x8xf32>
      %34 = vector.shape_cast %33 : vector<1x1x8xf32> to vector<1x8xf32>
      %35 = vector.shape_cast %32 : vector<1x8xf32> to vector<1x1x8xf32>
      tpu.vector_store %arg7[%c0_26, %c0_27, %c0_28], %35 {strides = array<i32>} : memref<1x1x8xf32, #tpu.memory_space<vmem>>, vector<1x1x8xf32>,
      %cst_29 = arith.constant 0.000000e+00 : f32
      %36 = vector.broadcast %cst_29 : f32 to vector<1x8xf32>
      %c0_30 = arith.constant 0 : index
      %c0_31 = arith.constant 0 : index
      %c0_32 = arith.constant 0 : index
      %37 = vector.load %arg8[%c0_30, %c0_31, %c0_32] : memref<1x1x8xf32, #tpu.memory_space<vmem>>, vector<1x1x8xf32>
      %38 = vector.shape_cast %37 : vector<1x1x8xf32> to vector<1x8xf32>
      %39 = vector.shape_cast %36 : vector<1x8xf32> to vector<1x1x8xf32>
      tpu.vector_store %arg8[%c0_30, %c0_31, %c0_32], %39 {strides = array<i32>} : memref<1x1x8xf32, #tpu.memory_space<vmem>>, vector<1x1x8xf32>,
    } else {
    }
    %c0 = arith.constant 0 : index
    %c0_1 = arith.constant 0 : index
    %3 = vector.load %arg2[%c0, %c0_1] : memref<128x8xf32, #tpu.memory_space<vmem>>, vector<128x8xf32>
    %c0_2 = arith.constant 0 : index
    %c0_3 = arith.constant 0 : index
    %4 = vector.load %arg3[%c0_2, %c0_3] : memref<1x8xf32, #tpu.memory_space<vmem>>, vector<1x8xf32>
    %5 = vector.broadcast %4 : vector<1x8xf32> to vector<128x8xf32>
    %6 = arith.mulf %3, %5 : vector<128x8xf32>
    %c0_4 = arith.constant 0 : index
    %c0_5 = arith.constant 0 : index
    %7 = vector.load %arg4[%c0_4, %c0_5] : memref<1x8xf32, #tpu.memory_space<vmem>>, vector<1x8xf32>
    %8 = vector.broadcast %7 : vector<1x8xf32> to vector<128x8xf32>
    %9 = arith.addf %6, %8 : vector<128x8xf32>
    %cst = arith.constant 0.000000e+00 : f32
    %10 = vector.broadcast %cst : f32 to vector<128x8xf32>
    %11 = arith.maximumf %9, %10 : vector<128x8xf32>
    %c0_6 = arith.constant 0 : index
    %c0_7 = arith.constant 0 : index
    %12 = vector.load %arg5[%c0_6, %c0_7] : memref<8x8xf32, #tpu.memory_space<vmem>>, vector<8x8xf32>
    %cst_8 = arith.constant dense<0.000000e+00> : vector<128x8xf32>
    %13 = tpu.matmul %11, %12, %cst_8 {dimension_numbers = #tpu.dot_dimension_numbers<[1], [0], [0], [1], [0, 0, 1, 1], [], []>} : vector<128x8xf32>, vector<8x8xf32>, vector<128x8xf32> -> vector<128x8xf32>
    %c0_9 = arith.constant 0 : index
    %c0_10 = arith.constant 0 : index
    %14 = vector.load %arg6[%c0_9, %c0_10] : memref<128x8xf32, #tpu.memory_space<vmem>>, vector<128x8xf32>
    tpu.vector_store %arg6[%c0_9, %c0_10], %13 {strides = array<i32>} : memref<128x8xf32, #tpu.memory_space<vmem>>, vector<128x8xf32>,
    %c0_11 = arith.constant 0 : index
    %c0_12 = arith.constant 0 : index
    %c0_13 = arith.constant 0 : index
    %15 = vector.load %arg7[%c0_11, %c0_12, %c0_13] : memref<1x1x8xf32, #tpu.memory_space<vmem>>, vector<1x1x8xf32>
    %16 = vector.shape_cast %15 : vector<1x1x8xf32> to vector<1x8xf32>
    %cst_14 = arith.constant dense<0.000000e+00> : vector<8xf32>
    %17 = vector.multi_reduction <add>, %13, %cst_14 [0] : vector<128x8xf32> to vector<8xf32>
    %18 = vector.shape_cast %17 : vector<8xf32> to vector<1x8xf32>
    %19 = arith.addf %16, %18 : vector<1x8xf32>
    %c0_15 = arith.constant 0 : index
    %c0_16 = arith.constant 0 : index
    %c0_17 = arith.constant 0 : index
    %20 = vector.load %arg7[%c0_15, %c0_16, %c0_17] : memref<1x1x8xf32, #tpu.memory_space<vmem>>, vector<1x1x8xf32>
    %21 = vector.shape_cast %20 : vector<1x1x8xf32> to vector<1x8xf32>
    %22 = vector.shape_cast %19 : vector<1x8xf32> to vector<1x1x8xf32>
    tpu.vector_store %arg7[%c0_15, %c0_16, %c0_17], %22 {strides = array<i32>} : memref<1x1x8xf32, #tpu.memory_space<vmem>>, vector<1x1x8xf32>,
    %c0_18 = arith.constant 0 : index
    %c0_19 = arith.constant 0 : index
    %c0_20 = arith.constant 0 : index
    %23 = vector.load %arg8[%c0_18, %c0_19, %c0_20] : memref<1x1x8xf32, #tpu.memory_space<vmem>>, vector<1x1x8xf32>
    %24 = vector.shape_cast %23 : vector<1x1x8xf32> to vector<1x8xf32>
    %25 = arith.mulf %13, %13 : vector<128x8xf32>
    %cst_21 = arith.constant dense<0.000000e+00> : vector<8xf32>
    %26 = vector.multi_reduction <add>, %25, %cst_21 [0] : vector<128x8xf32> to vector<8xf32>
    %27 = vector.shape_cast %26 : vector<8xf32> to vector<1x8xf32>
    %28 = arith.addf %24, %27 : vector<1x8xf32>
    %c0_22 = arith.constant 0 : index
    %c0_23 = arith.constant 0 : index
    %c0_24 = arith.constant 0 : index
    %29 = vector.load %arg8[%c0_22, %c0_23, %c0_24] : memref<1x1x8xf32, #tpu.memory_space<vmem>>, vector<1x1x8xf32>
    %30 = vector.shape_cast %29 : vector<1x1x8xf32> to vector<1x8xf32>
    %31 = vector.shape_cast %28 : vector<1x8xf32> to vector<1x1x8xf32>
    tpu.vector_store %arg8[%c0_22, %c0_23, %c0_24], %31 {strides = array<i32>} : memref<1x1x8xf32, #tpu.memory_space<vmem>>, vector<1x1x8xf32>,
    return
  }
  func.func @transform_0(%arg0: i32, %arg1: i32) -> (i32, i32) {
    %c2_i32 = arith.constant 2 : i32
    %0 = arith.muli %arg0, %c2_i32 : i32
    %1 = arith.addi %0, %arg1 : i32
    %c0_i32 = arith.constant 0 : i32
    %c0_i32_0 = arith.constant 0 : i32
    return %1, %c0_i32 : i32, i32
  }
  func.func @transform_1(%arg0: i32, %arg1: i32) -> (i32, i32) {
    %c0_i32 = arith.constant 0 : i32
    %c0_i32_0 = arith.constant 0 : i32
    %c0_i32_1 = arith.constant 0 : i32
    return %c0_i32, %c0_i32_0 : i32, i32
  }
  func.func @transform_2(%arg0: i32, %arg1: i32) -> (i32, i32) {
    %c0_i32 = arith.constant 0 : i32
    %c0_i32_0 = arith.constant 0 : i32
    %c0_i32_1 = arith.constant 0 : i32
    return %c0_i32, %c0_i32_0 : i32, i32
  }
  func.func @transform_3(%arg0: i32, %arg1: i32) -> (i32, i32) {
    %c0_i32 = arith.constant 0 : i32
    %c0_i32_0 = arith.constant 0 : i32
    %c0_i32_1 = arith.constant 0 : i32
    return %c0_i32, %c0_i32_0 : i32, i32
  }
  func.func @transform_4(%arg0: i32, %arg1: i32) -> (i32, i32) {
    %c2_i32 = arith.constant 2 : i32
    %0 = arith.muli %arg0, %c2_i32 : i32
    %1 = arith.addi %0, %arg1 : i32
    %c0_i32 = arith.constant 0 : i32
    %c0_i32_0 = arith.constant 0 : i32
    return %1, %c0_i32 : i32, i32
  }
  func.func @transform_5(%arg0: i32, %arg1: i32) -> (i32, i32, i32) {
    %c0_i32 = arith.constant 0 : i32
    %c0_i32_0 = arith.constant 0 : i32
    %c0_i32_1 = arith.constant 0 : i32
    return %arg0, %c0_i32, %c0_i32_0 : i32, i32, i32
  }
  func.func @transform_6(%arg0: i32, %arg1: i32) -> (i32, i32, i32) {
    %c0_i32 = arith.constant 0 : i32
    %c0_i32_0 = arith.constant 0 : i32
    %c0_i32_1 = arith.constant 0 : i32
    return %arg0, %c0_i32, %c0_i32_0 : i32, i32, i32
  }
}

module attributes {stable_mosaic.version = 11 : i64} {
  func.func @_conv3x3_bn_stats_kernel(%arg0: i32, %arg1: i32, %arg2: memref<1x64x8xf32, #tpu.memory_space<vmem>>, %arg3: memref<1x16x8xf32, #tpu.memory_space<vmem>>, %arg4: memref<1x16x8xf32, #tpu.memory_space<vmem>>, %arg5: memref<1x8xf32, #tpu.memory_space<vmem>>, %arg6: memref<1x8xf32, #tpu.memory_space<vmem>>, %arg7: memref<9x8x8xf32, #tpu.memory_space<vmem>>, %arg8: memref<1x64x8xf32, #tpu.memory_space<vmem>>, %arg9: memref<1x1x8xf32, #tpu.memory_space<vmem>>, %arg10: memref<1x1x8xf32, #tpu.memory_space<vmem>>, %arg11: memref<112x8xf32, #tpu.memory_space<vmem>>) attributes {dimension_semantics = [#tpu.dimension_semantics<parallel>, #tpu.dimension_semantics<arbitrary>], iteration_bounds = array<i64: 2, 4>, scalar_prefetch = 0 : i64, scratch_operands = 1 : i64, tpu.core_type = #tpu.core_type<tc>, window_params = [{transform_indices = @transform_0, window_bounds = array<i64: 1, 64, 8>}, {transform_indices = @transform_1, window_bounds = array<i64: 1, 16, 8>}, {transform_indices = @transform_2, window_bounds = array<i64: 1, 16, 8>}, {pipeline_mode = #tpu.pipeline_mode<synchronous>, transform_indices = @transform_3, window_bounds = array<i64: 1, 8>}, {pipeline_mode = #tpu.pipeline_mode<synchronous>, transform_indices = @transform_4, window_bounds = array<i64: 1, 8>}, {pipeline_mode = #tpu.pipeline_mode<synchronous>, transform_indices = @transform_5, window_bounds = array<i64: 9, 8, 8>}, {transform_indices = @transform_6, window_bounds = array<i64: 1, 64, 8>}, {transform_indices = @transform_7, window_bounds = array<i64: 1, 1, 8>}, {transform_indices = @transform_8, window_bounds = array<i64: 1, 1, 8>}]} {
    %c0_i32 = arith.constant 0 : i32
    %0 = arith.cmpi eq, %arg1, %c0_i32 : i32
    %1 = arith.extui %0 : i1 to i32
    %c0_i32_0 = arith.constant 0 : i32
    %2 = arith.cmpi ne, %1, %c0_i32_0 : i32
    scf.if %2 {
      %cst_97 = arith.constant 0.000000e+00 : f32
      %157 = vector.broadcast %cst_97 : f32 to vector<1x8xf32>
      %c0_98 = arith.constant 0 : index
      %c0_99 = arith.constant 0 : index
      %c0_100 = arith.constant 0 : index
      %158 = vector.load %arg9[%c0_98, %c0_99, %c0_100] : memref<1x1x8xf32, #tpu.memory_space<vmem>>, vector<1x1x8xf32>
      %159 = vector.shape_cast %158 : vector<1x1x8xf32> to vector<1x8xf32>
      %160 = vector.shape_cast %157 : vector<1x8xf32> to vector<1x1x8xf32>
      tpu.vector_store %arg9[%c0_98, %c0_99, %c0_100], %160 {strides = array<i32>} : memref<1x1x8xf32, #tpu.memory_space<vmem>>, vector<1x1x8xf32>,
      %cst_101 = arith.constant 0.000000e+00 : f32
      %161 = vector.broadcast %cst_101 : f32 to vector<1x8xf32>
      %c0_102 = arith.constant 0 : index
      %c0_103 = arith.constant 0 : index
      %c0_104 = arith.constant 0 : index
      %162 = vector.load %arg10[%c0_102, %c0_103, %c0_104] : memref<1x1x8xf32, #tpu.memory_space<vmem>>, vector<1x1x8xf32>
      %163 = vector.shape_cast %162 : vector<1x1x8xf32> to vector<1x8xf32>
      %164 = vector.shape_cast %161 : vector<1x8xf32> to vector<1x1x8xf32>
      tpu.vector_store %arg10[%c0_102, %c0_103, %c0_104], %164 {strides = array<i32>} : memref<1x1x8xf32, #tpu.memory_space<vmem>>, vector<1x1x8xf32>,
    } else {
    }
    %c0 = arith.constant 0 : index
    %c0_1 = arith.constant 0 : index
    %c0_2 = arith.constant 0 : index
    %3 = vector.load %arg3[%c0, %c0_1, %c0_2] : memref<1x16x8xf32, #tpu.memory_space<vmem>>, vector<1x16x8xf32>
    %4 = vector.shape_cast %3 : vector<1x16x8xf32> to vector<16x8xf32>
    %c0_3 = arith.constant 0 : index
    %c0_4 = arith.constant 0 : index
    %5 = vector.load %arg5[%c0_3, %c0_4] : memref<1x8xf32, #tpu.memory_space<vmem>>, vector<1x8xf32>
    %6 = vector.broadcast %5 : vector<1x8xf32> to vector<16x8xf32>
    %7 = arith.mulf %4, %6 : vector<16x8xf32>
    %c0_5 = arith.constant 0 : index
    %c0_6 = arith.constant 0 : index
    %8 = vector.load %arg6[%c0_5, %c0_6] : memref<1x8xf32, #tpu.memory_space<vmem>>, vector<1x8xf32>
    %9 = vector.broadcast %8 : vector<1x8xf32> to vector<16x8xf32>
    %10 = arith.addf %7, %9 : vector<16x8xf32>
    %cst = arith.constant 0.000000e+00 : f32
    %11 = vector.broadcast %cst : f32 to vector<16x8xf32>
    %12 = arith.maximumf %10, %11 : vector<16x8xf32>
    %c0_i32_7 = arith.constant 0 : i32
    %13 = arith.cmpi sgt, %arg1, %c0_i32_7 : i32
    %14 = arith.extui %13 : i1 to i32
    %15 = arith.sitofp %14 : i32 to f32
    %16 = vector.broadcast %15 : f32 to vector<16x8xf32>
    %17 = arith.mulf %12, %16 : vector<16x8xf32>
    %c0_8 = arith.constant 0 : index
    %c0_9 = arith.constant 0 : index
    %c0_10 = arith.constant 0 : index
    %18 = vector.load %arg4[%c0_8, %c0_9, %c0_10] : memref<1x16x8xf32, #tpu.memory_space<vmem>>, vector<1x16x8xf32>
    %19 = vector.shape_cast %18 : vector<1x16x8xf32> to vector<16x8xf32>
    %c0_11 = arith.constant 0 : index
    %c0_12 = arith.constant 0 : index
    %20 = vector.load %arg5[%c0_11, %c0_12] : memref<1x8xf32, #tpu.memory_space<vmem>>, vector<1x8xf32>
    %21 = vector.broadcast %20 : vector<1x8xf32> to vector<16x8xf32>
    %22 = arith.mulf %19, %21 : vector<16x8xf32>
    %c0_13 = arith.constant 0 : index
    %c0_14 = arith.constant 0 : index
    %23 = vector.load %arg6[%c0_13, %c0_14] : memref<1x8xf32, #tpu.memory_space<vmem>>, vector<1x8xf32>
    %24 = vector.broadcast %23 : vector<1x8xf32> to vector<16x8xf32>
    %25 = arith.addf %22, %24 : vector<16x8xf32>
    %cst_15 = arith.constant 0.000000e+00 : f32
    %26 = vector.broadcast %cst_15 : f32 to vector<16x8xf32>
    %27 = arith.maximumf %25, %26 : vector<16x8xf32>
    %c3_i32 = arith.constant 3 : i32
    %28 = arith.cmpi slt, %arg1, %c3_i32 : i32
    %29 = arith.extui %28 : i1 to i32
    %30 = arith.sitofp %29 : i32 to f32
    %31 = vector.broadcast %30 : f32 to vector<16x8xf32>
    %32 = arith.mulf %27, %31 : vector<16x8xf32>
    %c8 = arith.constant 8 : index
    %c0_16 = arith.constant 0 : index
    %33 = vector.load %arg11[%c8, %c0_16] : memref<112x8xf32, #tpu.memory_space<vmem>>, vector<16x8xf32>
    tpu.vector_store %arg11[%c8, %c0_16], %17 {strides = array<i32>} : memref<112x8xf32, #tpu.memory_space<vmem>>, vector<16x8xf32>,
    %c0_17 = arith.constant 0 : index
    %c0_18 = arith.constant 0 : index
    %c0_19 = arith.constant 0 : index
    %34 = vector.load %arg2[%c0_17, %c0_18, %c0_19] : memref<1x64x8xf32, #tpu.memory_space<vmem>>, vector<1x64x8xf32>
    %35 = vector.shape_cast %34 : vector<1x64x8xf32> to vector<64x8xf32>
    %c0_20 = arith.constant 0 : index
    %c0_21 = arith.constant 0 : index
    %36 = vector.load %arg5[%c0_20, %c0_21] : memref<1x8xf32, #tpu.memory_space<vmem>>, vector<1x8xf32>
    %37 = vector.broadcast %36 : vector<1x8xf32> to vector<64x8xf32>
    %38 = arith.mulf %35, %37 : vector<64x8xf32>
    %c0_22 = arith.constant 0 : index
    %c0_23 = arith.constant 0 : index
    %39 = vector.load %arg6[%c0_22, %c0_23] : memref<1x8xf32, #tpu.memory_space<vmem>>, vector<1x8xf32>
    %40 = vector.broadcast %39 : vector<1x8xf32> to vector<64x8xf32>
    %41 = arith.addf %38, %40 : vector<64x8xf32>
    %cst_24 = arith.constant 0.000000e+00 : f32
    %42 = vector.broadcast %cst_24 : f32 to vector<64x8xf32>
    %43 = arith.maximumf %41, %42 : vector<64x8xf32>
    %c24 = arith.constant 24 : index
    %c0_25 = arith.constant 0 : index
    %44 = vector.load %arg11[%c24, %c0_25] : memref<112x8xf32, #tpu.memory_space<vmem>>, vector<64x8xf32>
    tpu.vector_store %arg11[%c24, %c0_25], %43 {strides = array<i32>} : memref<112x8xf32, #tpu.memory_space<vmem>>, vector<64x8xf32>,
    %c88 = arith.constant 88 : index
    %c0_26 = arith.constant 0 : index
    %45 = vector.load %arg11[%c88, %c0_26] : memref<112x8xf32, #tpu.memory_space<vmem>>, vector<16x8xf32>
    tpu.vector_store %arg11[%c88, %c0_26], %32 {strides = array<i32>} : memref<112x8xf32, #tpu.memory_space<vmem>>, vector<16x8xf32>,
    %46 = tpu.iota {dimensions = array<i32: 0>} : vector<64x1xi32>
    %c16_i32 = arith.constant 16 : i32
    %c0_i32_27 = arith.constant 0 : i32
    %47 = arith.cmpi eq, %c16_i32, %c0_i32_27 : i32
    %c1_i32 = arith.constant 1 : i32
    %48 = arith.select %47, %c1_i32, %c16_i32 : i32
    %49 = vector.broadcast %48 : i32 to vector<64x1xi32>
    %50 = arith.remsi %46, %49 : vector<64x1xi32>
    %c0_i32_28 = arith.constant 0 : i32
    %51 = vector.broadcast %c0_i32_28 : i32 to vector<64x1xi32>
    %52 = arith.cmpi ne, %50, %51 : vector<64x1xi32>
    %c0_i32_29 = arith.constant 0 : i32
    %53 = vector.broadcast %c0_i32_29 : i32 to vector<64x1xi32>
    %54 = arith.cmpi slt, %50, %53 : vector<64x1xi32>
    %c0_i32_30 = arith.constant 0 : i32
    %55 = arith.cmpi slt, %48, %c0_i32_30 : i32
    %56 = vector.broadcast %55 : i1 to vector<64x1xi1>
    %57 = vector.broadcast %56 : vector<64x1xi1> to vector<64x1xi1>
    %58 = arith.xori %54, %57 : vector<64x1xi1>
    %59 = arith.andi %58, %52 : vector<64x1xi1>
    %60 = vector.broadcast %48 : i32 to vector<64x1xi32>
    %61 = arith.addi %50, %60 : vector<64x1xi32>
    %62 = arith.select %59, %61, %50 : vector<64x1xi1>, vector<64x1xi32>
    %c1_i32_31 = arith.constant 1 : i32
    %63 = vector.broadcast %c1_i32_31 : i32 to vector<64x1xi32>
    %64 = arith.cmpi sge, %62, %63 : vector<64x1xi32>
    %c14_i32 = arith.constant 14 : i32
    %65 = vector.broadcast %c14_i32 : i32 to vector<64x1xi32>
    %66 = arith.cmpi sle, %62, %65 : vector<64x1xi32>
    %cst_32 = arith.constant 0.000000e+00 : f32
    %67 = vector.broadcast %cst_32 : f32 to vector<64x8xf32>
    %c7 = arith.constant 7 : index
    %c0_33 = arith.constant 0 : index
    %68 = vector.load %arg11[%c7, %c0_33] : memref<112x8xf32, #tpu.memory_space<vmem>>, vector<64x8xf32>
    %cst_34 = arith.constant 0.000000e+00 : f32
    %69 = vector.broadcast %cst_34 : f32 to vector<64x8xf32>
    %70 = vector.shape_cast %64 : vector<64x1xi1> to vector<64x1xi1>
    %71 = vector.broadcast %70 : vector<64x1xi1> to vector<64x8xi1>
    %72 = arith.select %71, %68, %69 : vector<64x8xi1>, vector<64x8xf32>
    %c0_35 = arith.constant 0 : index
    %c0_36 = arith.constant 0 : index
    %c0_37 = arith.constant 0 : index
    %73 = vector.load %arg7[%c0_35, %c0_36, %c0_37] : memref<9x8x8xf32, #tpu.memory_space<vmem>>, vector<1x8x8xf32>
    %74 = vector.shape_cast %73 : vector<1x8x8xf32> to vector<8x8xf32>
    %cst_38 = arith.constant dense<0.000000e+00> : vector<64x8xf32>
    %75 = tpu.matmul %72, %74, %cst_38 {dimension_numbers = #tpu.dot_dimension_numbers<[1], [0], [0], [1], [0, 0, 1, 1], [], []>} : vector<64x8xf32>, vector<8x8xf32>, vector<64x8xf32> -> vector<64x8xf32>
    %76 = arith.addf %67, %75 : vector<64x8xf32>
    %c8_39 = arith.constant 8 : index
    %c0_40 = arith.constant 0 : index
    %77 = vector.load %arg11[%c8_39, %c0_40] : memref<112x8xf32, #tpu.memory_space<vmem>>, vector<64x8xf32>
    %c1 = arith.constant 1 : index
    %c0_41 = arith.constant 0 : index
    %c0_42 = arith.constant 0 : index
    %78 = vector.load %arg7[%c1, %c0_41, %c0_42] : memref<9x8x8xf32, #tpu.memory_space<vmem>>, vector<1x8x8xf32>
    %79 = vector.shape_cast %78 : vector<1x8x8xf32> to vector<8x8xf32>
    %cst_43 = arith.constant dense<0.000000e+00> : vector<64x8xf32>
    %80 = tpu.matmul %77, %79, %cst_43 {dimension_numbers = #tpu.dot_dimension_numbers<[1], [0], [0], [1], [0, 0, 1, 1], [], []>} : vector<64x8xf32>, vector<8x8xf32>, vector<64x8xf32> -> vector<64x8xf32>
    %81 = arith.addf %76, %80 : vector<64x8xf32>
    %c9 = arith.constant 9 : index
    %c0_44 = arith.constant 0 : index
    %82 = vector.load %arg11[%c9, %c0_44] : memref<112x8xf32, #tpu.memory_space<vmem>>, vector<64x8xf32>
    %cst_45 = arith.constant 0.000000e+00 : f32
    %83 = vector.broadcast %cst_45 : f32 to vector<64x8xf32>
    %84 = vector.shape_cast %66 : vector<64x1xi1> to vector<64x1xi1>
    %85 = vector.broadcast %84 : vector<64x1xi1> to vector<64x8xi1>
    %86 = arith.select %85, %82, %83 : vector<64x8xi1>, vector<64x8xf32>
    %c2 = arith.constant 2 : index
    %c0_46 = arith.constant 0 : index
    %c0_47 = arith.constant 0 : index
    %87 = vector.load %arg7[%c2, %c0_46, %c0_47] : memref<9x8x8xf32, #tpu.memory_space<vmem>>, vector<1x8x8xf32>
    %88 = vector.shape_cast %87 : vector<1x8x8xf32> to vector<8x8xf32>
    %cst_48 = arith.constant dense<0.000000e+00> : vector<64x8xf32>
    %89 = tpu.matmul %86, %88, %cst_48 {dimension_numbers = #tpu.dot_dimension_numbers<[1], [0], [0], [1], [0, 0, 1, 1], [], []>} : vector<64x8xf32>, vector<8x8xf32>, vector<64x8xf32> -> vector<64x8xf32>
    %90 = arith.addf %81, %89 : vector<64x8xf32>
    %c23 = arith.constant 23 : index
    %c0_49 = arith.constant 0 : index
    %91 = vector.load %arg11[%c23, %c0_49] : memref<112x8xf32, #tpu.memory_space<vmem>>, vector<64x8xf32>
    %cst_50 = arith.constant 0.000000e+00 : f32
    %92 = vector.broadcast %cst_50 : f32 to vector<64x8xf32>
    %93 = vector.shape_cast %64 : vector<64x1xi1> to vector<64x1xi1>
    %94 = vector.broadcast %93 : vector<64x1xi1> to vector<64x8xi1>
    %95 = arith.select %94, %91, %92 : vector<64x8xi1>, vector<64x8xf32>
    %c3 = arith.constant 3 : index
    %c0_51 = arith.constant 0 : index
    %c0_52 = arith.constant 0 : index
    %96 = vector.load %arg7[%c3, %c0_51, %c0_52] : memref<9x8x8xf32, #tpu.memory_space<vmem>>, vector<1x8x8xf32>
    %97 = vector.shape_cast %96 : vector<1x8x8xf32> to vector<8x8xf32>
    %cst_53 = arith.constant dense<0.000000e+00> : vector<64x8xf32>
    %98 = tpu.matmul %95, %97, %cst_53 {dimension_numbers = #tpu.dot_dimension_numbers<[1], [0], [0], [1], [0, 0, 1, 1], [], []>} : vector<64x8xf32>, vector<8x8xf32>, vector<64x8xf32> -> vector<64x8xf32>
    %99 = arith.addf %90, %98 : vector<64x8xf32>
    %c24_54 = arith.constant 24 : index
    %c0_55 = arith.constant 0 : index
    %100 = vector.load %arg11[%c24_54, %c0_55] : memref<112x8xf32, #tpu.memory_space<vmem>>, vector<64x8xf32>
    %c4 = arith.constant 4 : index
    %c0_56 = arith.constant 0 : index
    %c0_57 = arith.constant 0 : index
    %101 = vector.load %arg7[%c4, %c0_56, %c0_57] : memref<9x8x8xf32, #tpu.memory_space<vmem>>, vector<1x8x8xf32>
    %102 = vector.shape_cast %101 : vector<1x8x8xf32> to vector<8x8xf32>
    %cst_58 = arith.constant dense<0.000000e+00> : vector<64x8xf32>
    %103 = tpu.matmul %100, %102, %cst_58 {dimension_numbers = #tpu.dot_dimension_numbers<[1], [0], [0], [1], [0, 0, 1, 1], [], []>} : vector<64x8xf32>, vector<8x8xf32>, vector<64x8xf32> -> vector<64x8xf32>
    %104 = arith.addf %99, %103 : vector<64x8xf32>
    %c25 = arith.constant 25 : index
    %c0_59 = arith.constant 0 : index
    %105 = vector.load %arg11[%c25, %c0_59] : memref<112x8xf32, #tpu.memory_space<vmem>>, vector<64x8xf32>
    %cst_60 = arith.constant 0.000000e+00 : f32
    %106 = vector.broadcast %cst_60 : f32 to vector<64x8xf32>
    %107 = vector.shape_cast %66 : vector<64x1xi1> to vector<64x1xi1>
    %108 = vector.broadcast %107 : vector<64x1xi1> to vector<64x8xi1>
    %109 = arith.select %108, %105, %106 : vector<64x8xi1>, vector<64x8xf32>
    %c5 = arith.constant 5 : index
    %c0_61 = arith.constant 0 : index
    %c0_62 = arith.constant 0 : index
    %110 = vector.load %arg7[%c5, %c0_61, %c0_62] : memref<9x8x8xf32, #tpu.memory_space<vmem>>, vector<1x8x8xf32>
    %111 = vector.shape_cast %110 : vector<1x8x8xf32> to vector<8x8xf32>
    %cst_63 = arith.constant dense<0.000000e+00> : vector<64x8xf32>
    %112 = tpu.matmul %109, %111, %cst_63 {dimension_numbers = #tpu.dot_dimension_numbers<[1], [0], [0], [1], [0, 0, 1, 1], [], []>} : vector<64x8xf32>, vector<8x8xf32>, vector<64x8xf32> -> vector<64x8xf32>
    %113 = arith.addf %104, %112 : vector<64x8xf32>
    %c39 = arith.constant 39 : index
    %c0_64 = arith.constant 0 : index
    %114 = vector.load %arg11[%c39, %c0_64] : memref<112x8xf32, #tpu.memory_space<vmem>>, vector<64x8xf32>
    %cst_65 = arith.constant 0.000000e+00 : f32
    %115 = vector.broadcast %cst_65 : f32 to vector<64x8xf32>
    %116 = vector.shape_cast %64 : vector<64x1xi1> to vector<64x1xi1>
    %117 = vector.broadcast %116 : vector<64x1xi1> to vector<64x8xi1>
    %118 = arith.select %117, %114, %115 : vector<64x8xi1>, vector<64x8xf32>
    %c6 = arith.constant 6 : index
    %c0_66 = arith.constant 0 : index
    %c0_67 = arith.constant 0 : index
    %119 = vector.load %arg7[%c6, %c0_66, %c0_67] : memref<9x8x8xf32, #tpu.memory_space<vmem>>, vector<1x8x8xf32>
    %120 = vector.shape_cast %119 : vector<1x8x8xf32> to vector<8x8xf32>
    %cst_68 = arith.constant dense<0.000000e+00> : vector<64x8xf32>
    %121 = tpu.matmul %118, %120, %cst_68 {dimension_numbers = #tpu.dot_dimension_numbers<[1], [0], [0], [1], [0, 0, 1, 1], [], []>} : vector<64x8xf32>, vector<8x8xf32>, vector<64x8xf32> -> vector<64x8xf32>
    %122 = arith.addf %113, %121 : vector<64x8xf32>
    %c40 = arith.constant 40 : index
    %c0_69 = arith.constant 0 : index
    %123 = vector.load %arg11[%c40, %c0_69] : memref<112x8xf32, #tpu.memory_space<vmem>>, vector<64x8xf32>
    %c7_70 = arith.constant 7 : index
    %c0_71 = arith.constant 0 : index
    %c0_72 = arith.constant 0 : index
    %124 = vector.load %arg7[%c7_70, %c0_71, %c0_72] : memref<9x8x8xf32, #tpu.memory_space<vmem>>, vector<1x8x8xf32>
    %125 = vector.shape_cast %124 : vector<1x8x8xf32> to vector<8x8xf32>
    %cst_73 = arith.constant dense<0.000000e+00> : vector<64x8xf32>
    %126 = tpu.matmul %123, %125, %cst_73 {dimension_numbers = #tpu.dot_dimension_numbers<[1], [0], [0], [1], [0, 0, 1, 1], [], []>} : vector<64x8xf32>, vector<8x8xf32>, vector<64x8xf32> -> vector<64x8xf32>
    %127 = arith.addf %122, %126 : vector<64x8xf32>
    %c41 = arith.constant 41 : index
    %c0_74 = arith.constant 0 : index
    %128 = vector.load %arg11[%c41, %c0_74] : memref<112x8xf32, #tpu.memory_space<vmem>>, vector<64x8xf32>
    %cst_75 = arith.constant 0.000000e+00 : f32
    %129 = vector.broadcast %cst_75 : f32 to vector<64x8xf32>
    %130 = vector.shape_cast %66 : vector<64x1xi1> to vector<64x1xi1>
    %131 = vector.broadcast %130 : vector<64x1xi1> to vector<64x8xi1>
    %132 = arith.select %131, %128, %129 : vector<64x8xi1>, vector<64x8xf32>
    %c8_76 = arith.constant 8 : index
    %c0_77 = arith.constant 0 : index
    %c0_78 = arith.constant 0 : index
    %133 = vector.load %arg7[%c8_76, %c0_77, %c0_78] : memref<9x8x8xf32, #tpu.memory_space<vmem>>, vector<1x8x8xf32>
    %134 = vector.shape_cast %133 : vector<1x8x8xf32> to vector<8x8xf32>
    %cst_79 = arith.constant dense<0.000000e+00> : vector<64x8xf32>
    %135 = tpu.matmul %132, %134, %cst_79 {dimension_numbers = #tpu.dot_dimension_numbers<[1], [0], [0], [1], [0, 0, 1, 1], [], []>} : vector<64x8xf32>, vector<8x8xf32>, vector<64x8xf32> -> vector<64x8xf32>
    %136 = arith.addf %127, %135 : vector<64x8xf32>
    %c0_80 = arith.constant 0 : index
    %c0_81 = arith.constant 0 : index
    %c0_82 = arith.constant 0 : index
    %137 = vector.load %arg8[%c0_80, %c0_81, %c0_82] : memref<1x64x8xf32, #tpu.memory_space<vmem>>, vector<1x64x8xf32>
    %138 = vector.shape_cast %137 : vector<1x64x8xf32> to vector<64x8xf32>
    %139 = vector.shape_cast %136 : vector<64x8xf32> to vector<1x64x8xf32>
    tpu.vector_store %arg8[%c0_80, %c0_81, %c0_82], %139 {strides = array<i32>} : memref<1x64x8xf32, #tpu.memory_space<vmem>>, vector<1x64x8xf32>,
    %c0_83 = arith.constant 0 : index
    %c0_84 = arith.constant 0 : index
    %c0_85 = arith.constant 0 : index
    %140 = vector.load %arg9[%c0_83, %c0_84, %c0_85] : memref<1x1x8xf32, #tpu.memory_space<vmem>>, vector<1x1x8xf32>
    %141 = vector.shape_cast %140 : vector<1x1x8xf32> to vector<1x8xf32>
    %cst_86 = arith.constant dense<0.000000e+00> : vector<8xf32>
    %142 = vector.multi_reduction <add>, %136, %cst_86 [0] : vector<64x8xf32> to vector<8xf32>
    %143 = vector.shape_cast %142 : vector<8xf32> to vector<1x8xf32>
    %144 = arith.addf %141, %143 : vector<1x8xf32>
    %c0_87 = arith.constant 0 : index
    %c0_88 = arith.constant 0 : index
    %c0_89 = arith.constant 0 : index
    %145 = vector.load %arg9[%c0_87, %c0_88, %c0_89] : memref<1x1x8xf32, #tpu.memory_space<vmem>>, vector<1x1x8xf32>
    %146 = vector.shape_cast %145 : vector<1x1x8xf32> to vector<1x8xf32>
    %147 = vector.shape_cast %144 : vector<1x8xf32> to vector<1x1x8xf32>
    tpu.vector_store %arg9[%c0_87, %c0_88, %c0_89], %147 {strides = array<i32>} : memref<1x1x8xf32, #tpu.memory_space<vmem>>, vector<1x1x8xf32>,
    %c0_90 = arith.constant 0 : index
    %c0_91 = arith.constant 0 : index
    %c0_92 = arith.constant 0 : index
    %148 = vector.load %arg10[%c0_90, %c0_91, %c0_92] : memref<1x1x8xf32, #tpu.memory_space<vmem>>, vector<1x1x8xf32>
    %149 = vector.shape_cast %148 : vector<1x1x8xf32> to vector<1x8xf32>
    %150 = arith.mulf %136, %136 : vector<64x8xf32>
    %cst_93 = arith.constant dense<0.000000e+00> : vector<8xf32>
    %151 = vector.multi_reduction <add>, %150, %cst_93 [0] : vector<64x8xf32> to vector<8xf32>
    %152 = vector.shape_cast %151 : vector<8xf32> to vector<1x8xf32>
    %153 = arith.addf %149, %152 : vector<1x8xf32>
    %c0_94 = arith.constant 0 : index
    %c0_95 = arith.constant 0 : index
    %c0_96 = arith.constant 0 : index
    %154 = vector.load %arg10[%c0_94, %c0_95, %c0_96] : memref<1x1x8xf32, #tpu.memory_space<vmem>>, vector<1x1x8xf32>
    %155 = vector.shape_cast %154 : vector<1x1x8xf32> to vector<1x8xf32>
    %156 = vector.shape_cast %153 : vector<1x8xf32> to vector<1x1x8xf32>
    tpu.vector_store %arg10[%c0_94, %c0_95, %c0_96], %156 {strides = array<i32>} : memref<1x1x8xf32, #tpu.memory_space<vmem>>, vector<1x1x8xf32>,
    return
  }
  func.func @transform_0(%arg0: i32, %arg1: i32) -> (i32, i32, i32) {
    %c0_i32 = arith.constant 0 : i32
    %c0_i32_0 = arith.constant 0 : i32
    return %arg0, %arg1, %c0_i32 : i32, i32, i32
  }
  func.func @transform_1(%arg0: i32, %arg1: i32) -> (i32, i32, i32) {
    %c4_i32 = arith.constant 4 : i32
    %0 = arith.muli %arg1, %c4_i32 : i32
    %c1_i32 = arith.constant 1 : i32
    %1 = arith.subi %0, %c1_i32 : i32
    %c0_i32 = arith.constant 0 : i32
    %2 = arith.maxsi %1, %c0_i32 : i32
    %c0_i32_0 = arith.constant 0 : i32
    %c0_i32_1 = arith.constant 0 : i32
    return %arg0, %2, %c0_i32_0 : i32, i32, i32
  }
  func.func @transform_2(%arg0: i32, %arg1: i32) -> (i32, i32, i32) {
    %c1_i32 = arith.constant 1 : i32
    %0 = arith.addi %arg1, %c1_i32 : i32
    %c4_i32 = arith.constant 4 : i32
    %1 = arith.muli %0, %c4_i32 : i32
    %c15_i32 = arith.constant 15 : i32
    %2 = arith.minsi %1, %c15_i32 : i32
    %c0_i32 = arith.constant 0 : i32
    %c0_i32_0 = arith.constant 0 : i32
    return %arg0, %2, %c0_i32 : i32, i32, i32
  }
  func.func @transform_3(%arg0: i32, %arg1: i32) -> (i32, i32) {
    %c0_i32 = arith.constant 0 : i32
    %c0_i32_0 = arith.constant 0 : i32
    %c0_i32_1 = arith.constant 0 : i32
    return %c0_i32, %c0_i32_0 : i32, i32
  }
  func.func @transform_4(%arg0: i32, %arg1: i32) -> (i32, i32) {
    %c0_i32 = arith.constant 0 : i32
    %c0_i32_0 = arith.constant 0 : i32
    %c0_i32_1 = arith.constant 0 : i32
    return %c0_i32, %c0_i32_0 : i32, i32
  }
  func.func @transform_5(%arg0: i32, %arg1: i32) -> (i32, i32, i32) {
    %c0_i32 = arith.constant 0 : i32
    %c0_i32_0 = arith.constant 0 : i32
    %c0_i32_1 = arith.constant 0 : i32
    %c0_i32_2 = arith.constant 0 : i32
    return %c0_i32, %c0_i32_0, %c0_i32_1 : i32, i32, i32
  }
  func.func @transform_6(%arg0: i32, %arg1: i32) -> (i32, i32, i32) {
    %c0_i32 = arith.constant 0 : i32
    %c0_i32_0 = arith.constant 0 : i32
    return %arg0, %arg1, %c0_i32 : i32, i32, i32
  }
  func.func @transform_7(%arg0: i32, %arg1: i32) -> (i32, i32, i32) {
    %c0_i32 = arith.constant 0 : i32
    %c0_i32_0 = arith.constant 0 : i32
    %c0_i32_1 = arith.constant 0 : i32
    return %arg0, %c0_i32, %c0_i32_0 : i32, i32, i32
  }
  func.func @transform_8(%arg0: i32, %arg1: i32) -> (i32, i32, i32) {
    %c0_i32 = arith.constant 0 : i32
    %c0_i32_0 = arith.constant 0 : i32
    %c0_i32_1 = arith.constant 0 : i32
    return %arg0, %c0_i32, %c0_i32_0 : i32, i32, i32
  }
}

module attributes {stable_mosaic.version = 11 : i64} {
  func.func @_bn_residual_relu_kernel(%arg0: i32, %arg1: memref<128x8xf32, #tpu.memory_space<vmem>>, %arg2: memref<1x8xf32, #tpu.memory_space<vmem>>, %arg3: memref<1x8xf32, #tpu.memory_space<vmem>>, %arg4: memref<128x4xf32, #tpu.memory_space<vmem>>, %arg5: memref<128x8xf32, #tpu.memory_space<vmem>>) attributes {dimension_semantics = [#tpu.dimension_semantics<parallel>], iteration_bounds = array<i64: 4>, scalar_prefetch = 0 : i64, scratch_operands = 0 : i64, tpu.core_type = #tpu.core_type<tc>, window_params = [{transform_indices = @transform_0, window_bounds = array<i64: 128, 8>}, {pipeline_mode = #tpu.pipeline_mode<synchronous>, transform_indices = @transform_1, window_bounds = array<i64: 1, 8>}, {pipeline_mode = #tpu.pipeline_mode<synchronous>, transform_indices = @transform_2, window_bounds = array<i64: 1, 8>}, {transform_indices = @transform_3, window_bounds = array<i64: 128, 4>}, {transform_indices = @transform_4, window_bounds = array<i64: 128, 8>}]} {
    %c0 = arith.constant 0 : index
    %c0_0 = arith.constant 0 : index
    %0 = vector.load %arg1[%c0, %c0_0] : memref<128x8xf32, #tpu.memory_space<vmem>>, vector<128x8xf32>
    %c0_1 = arith.constant 0 : index
    %c0_2 = arith.constant 0 : index
    %1 = vector.load %arg2[%c0_1, %c0_2] : memref<1x8xf32, #tpu.memory_space<vmem>>, vector<1x8xf32>
    %2 = vector.broadcast %1 : vector<1x8xf32> to vector<128x8xf32>
    %3 = arith.mulf %0, %2 : vector<128x8xf32>
    %c0_3 = arith.constant 0 : index
    %c0_4 = arith.constant 0 : index
    %4 = vector.load %arg3[%c0_3, %c0_4] : memref<1x8xf32, #tpu.memory_space<vmem>>, vector<1x8xf32>
    %5 = vector.broadcast %4 : vector<1x8xf32> to vector<128x8xf32>
    %6 = arith.addf %3, %5 : vector<128x8xf32>
    %c0_5 = arith.constant 0 : index
    %c0_6 = arith.constant 0 : index
    %7 = vector.load %arg4[%c0_5, %c0_6] : memref<128x4xf32, #tpu.memory_space<vmem>>, vector<128x4xf32>
    %8 = tpu.concatenate %7, %7 in 1 : vector<128x4xf32>, vector<128x4xf32> -> vector<128x8xf32>
    %9 = arith.addf %6, %8 : vector<128x8xf32>
    %cst = arith.constant 0.000000e+00 : f32
    %10 = vector.broadcast %cst : f32 to vector<128x8xf32>
    %11 = arith.maximumf %9, %10 : vector<128x8xf32>
    %c0_7 = arith.constant 0 : index
    %c0_8 = arith.constant 0 : index
    %12 = vector.load %arg5[%c0_7, %c0_8] : memref<128x8xf32, #tpu.memory_space<vmem>>, vector<128x8xf32>
    tpu.vector_store %arg5[%c0_7, %c0_8], %11 {strides = array<i32>} : memref<128x8xf32, #tpu.memory_space<vmem>>, vector<128x8xf32>,
    return
  }
  func.func @transform_0(%arg0: i32) -> (i32, i32) {
    %c0_i32 = arith.constant 0 : i32
    %c0_i32_0 = arith.constant 0 : i32
    return %arg0, %c0_i32 : i32, i32
  }
  func.func @transform_1(%arg0: i32) -> (i32, i32) {
    %c0_i32 = arith.constant 0 : i32
    %c0_i32_0 = arith.constant 0 : i32
    %c0_i32_1 = arith.constant 0 : i32
    return %c0_i32, %c0_i32_0 : i32, i32
  }
  func.func @transform_2(%arg0: i32) -> (i32, i32) {
    %c0_i32 = arith.constant 0 : i32
    %c0_i32_0 = arith.constant 0 : i32
    %c0_i32_1 = arith.constant 0 : i32
    return %c0_i32, %c0_i32_0 : i32, i32
  }
  func.func @transform_3(%arg0: i32) -> (i32, i32) {
    %c0_i32 = arith.constant 0 : i32
    %c0_i32_0 = arith.constant 0 : i32
    return %arg0, %c0_i32 : i32, i32
  }
  func.func @transform_4(%arg0: i32) -> (i32, i32) {
    %c0_i32 = arith.constant 0 : i32
    %c0_i32_0 = arith.constant 0 : i32
    return %arg0, %c0_i32 : i32, i32
  }
}

</mosaic_0001>

<bundles_post_ra>
// kernel: _lambda_.4
= control target key start
LH: loop header
LB: loop body
LE: loop exit
PB: predicated region body
PF: predicated region fallthrough
CT: control target
= control target key end

     0   :  { %s1818_s0 = inlined_call_operand.hbm [shape: f32[512,4], index: 0, kind: input, shape index: {}]   ;;  %s1819_s1 = inlined_call_operand.hbm [shape: f32[4,8], index: 1, kind: input, shape index: {}]   ;;  %s1820_s2 = inlined_call_operand.hbm [shape: f32[512,8], index: 2, kind: output, shape index: {0}]   ;;  %s1821_s3 = inlined_call_operand.hbm [shape: f32[2,1,8], index: 3, kind: output, shape index: {1}]   ;;  %s1822_s4 = inlined_call_operand.hbm [shape: f32[2,1,8], index: 4, kind: output, shape index: {2}]  }
   0x1   :  { %1838 = sst [smem:[#allocation20_spill]] %s1819_s1 }
   0x2   :  { %1839 = sst [smem:[#allocation21_spill]] %s1821_s3 }
   0x3   :  { %1840 = sst [smem:[#allocation22_spill]] %s1822_s4 }
   0x4   :  { %10 = vsyncpa [#allocation3], 0 }
   0x5   :  { %12 = vsyncpa [#allocation3 + $0x1], 0 }
   0x6   :  { %13 = vsyncpa [#allocation6], 0 }
   0x7   :  { %14 = vsyncpa [#allocation4], 0 }
   0x8   :  { %16 = vsyncpa [#allocation4 + $0x1], 0 }
   0x9   :  { %17 = vsyncpa [#allocation9], 0 }
   0xa   :  { %19 = vsyncpa [#allocation9 + $0x1], 0  ;;  %s1309_s15 = smov 0   ;;  %s1311_s16 = smov 0  }
   0xb   :  { %s1313_s17 = smov 0   ;;  %s1315_s18 = smov 0  }
   0xc   :  { %s1317_s19 = smov 0   ;;  %s1319_s20 = smov 0  }
   0xd   :  { %s1321_s21 = smov 0   ;;  %s1323_s22 = smov 0  }
   0xe   :  { %s1325_s23 = smov 0   ;;  %s1327_s24 = smov 0  }
   0xf   :  { %s1329_s25 = smov 0  }
  0x10 LB: > { %1841 = sst [smem:[#allocation15_spill]] %s1244_s18  ;;  %s1365_s26 = sadd.s32 4294967295, %s1272_s25   ;;  %s1272_s25 = sphi %s1329_s25, %s25_s25   ;;  %s1268_s24 = sphi %s1327_s24, %s1884_s24   ;;  %s1264_s23 = sphi %s1325_s23, %s1883_s23   ;;  %s1260_s22 = sphi %s1323_s22, %s1882_s22   ;;  %s1256_s21 = sphi %s1321_s21, %s1875_s21   ;;  %s1252_s20 = sphi %s1319_s20, %s1881_s20   ;;  %s1248_s19 = sphi %s1317_s19, %s1880_s19   ;;  %s1244_s18 = sphi %s1315_s18, %s1879_s18   ;;  %s1240_s17 = sphi %s1313_s17, %s1878_s17   ;;  %s1236_s16 = sphi %s1311_s16, %s1877_s16   ;;  %s1232_s15 = sphi %s1309_s15, %s1876_s15  }
  0x11   : > { %1842 = sst [smem:[#allocation16_spill]] %s1264_s23  ;;  %s1825_s27 = sadd.s32 4294967294, %s1272_s25  }
  0x12   : > { %1843 = sst [smem:[#allocation17_spill]] %s1272_s25  ;;  %p55_p0 = scmp.ne.s32.totalorder %s1252_s20, %s1248_s19 }
  0x13   : > { %p56_p1 = scmp.eq.s32.totalorder %s1272_s25, 0  ;;  %p61_p2 = scmp.ne.s32.totalorder %s1248_s19, %s1244_s18 }
  0x14   : > { %p1823_p3 = scmp.eq.s32.totalorder %s1365_s26, 0  ;;  %p110_p4 = scmp.eq.s32.totalorder %s1365_s26, 3 }
  0x15   : > { %p1376_p5 = por %p56_p1, %p55_p0  ;;  %p116_p6 = scmp.eq.s32.totalorder %s1825_s27, 3 }
  0x16   : > { %p1384_p7 = por %p1823_p3, %p61_p2  ;;  %p1388_p8 = por %p110_p4, %p55_p0 }
  0x17   : > { %p1392_p9 = por %p116_p6, %p61_p2  ;;  %p135_p10 = scmp.ne.s32.totalorder %s1240_s17, %s1236_s16 }
  0x18   : > { %s1845_s30 = scalar_select %p1384_p7, 1, 0 }
  0x19   : > { %s1846_s5 = scalar_select %p1388_p8, 1, 0 }
  0x1a   : > { %s1847_s6 = scalar_select %p1392_p9, 1, 0 }
  0x1b   : > { %p141_p11 = scmp.ne.s32.totalorder %s1236_s16, %s1232_s15  ;;  %p816_p12 = scmp.ge.s32.totalorder %s1272_s25, 1 }
  0x1c   : > { %1848 = sst [smem:[#allocation18_spill]] %s1847_s6  ;;  %p175_p13 = scmp.lt.s32.totalorder %s1272_s25, 5 }
  0x1d   : > { %p1403_p1 = por %p135_p10, %p110_p4  ;;  %p1407_p3 = por %p141_p11, %p116_p6 }
  0x1e   : > { %p1411_p0 = pnand %p816_p12, %p175_p13  ;;  %s1274_s11 = smov [#allocation5]  }
  0x1f   : > { %s1849_s8 = scalar_select %p1403_p1, 1, 0 }
  0x20   : > { %s1850_s9 = scalar_select %p1407_p3, 1, 0 }
  0x21   : > { %s1852_s10 = scalar_select %p1411_p0, 1, 0 }
  0x22   : > { %1851 = sst [smem:[#allocation19_spill]] %s1850_s9  ;;  %p912_p2 = pneg %p1411_p0 }
  0x23   : > { %s188_s12 = sshll.u32 %s1274_s11, 4  ;;  %p931_p9 = scmp.lt.s32.totalorder %s1272_s25, 4  ;;  %s189_s12 = int_to_ptr.vmem [resolvable:$true] %s188_s12 }
  0x24   : > { %p1853_p8 = scmp.eq.s32.totalorder %s1365_s26, 0  ;;  %s1856_s1 = sld [smem:[#allocation20_spill]] }
  0x25   : > { %p1426_p6 = pnand %p931_p9, %p1376_p5 }
  0x26   : > { %p1420_p4 = pnand %p912_p2, %p1853_p8 }
  0x27   : > { %s1855_s14 = scalar_select %p1426_p6, 1, 0 }
  0x28   : > { %p1030_p11 = pneg %p1420_p4 }
  0x2a   : > { %s1028_s28 = scalar_lea.hbm %s1856_s1, 64 }
  0x2b   : > { %p1029_p10 = scmp.ne.s32.totalorder %s1856_s1, %s1028_s28  ;;  %p1035_p13 = scmp.lt.u32.totalorder %s1028_s28, %s1856_s1 }
  0x2d   : > { %p1031_p8 = pnand %p1030_p11, %p1029_p10 }
  0x2f   : > { %p1032_p12 = pneg %p1031_p8 }
  0x31   : > { %p1037_p5 = pnand %p1035_p13, %p1032_p12 }
  0x33   : > { %1040 = shalt.err (!%p1037_p5)
}
  0x34   : > { %s1041_s29 = scalar_lea.vmem %s189_s12, 64  ;;  %p1049_p1 = scmp.lt.s32.totalorder %s189_s12, %s189_s12 }
  0x35   : > { %p1042_p9 = scmp.ne.s32.totalorder %s189_s12, %s1041_s29  ;;  %p1050_p7 = scmp.lt.s32.totalorder %s1041_s29, %s1041_s29 }
  0x37   : > { %p1044_p2 = pnand %p1042_p9, %p1030_p11  ;;  %p1051_p0 = por %p1050_p7, %p1049_p1 }
  0x39   : > { %p1045_p3 = pneg %p1044_p2 }
  0x3b   : > { %p1052_p6 = pnand %p1051_p0, %p1045_p3 }
  0x3d   : > { %1055 = shalt.err (!%p1052_p6)
}
  0x3e   : > { %915 = dma.hbm_to_vmem [thread:$0]  (!%p1420_p4), %s1856_s1, 64, %s189_s12, [#allocation6]  }
  0x3f   : > { %s34_s28 = sadd.s32 1, %s1264_s23  ;;  %s37_s6 = sadd.s32 1, %s1268_s24 }
  0x40   : > { %p35_p10 = scmp.ge.s32.totalorder %s34_s28, 2  ;;  %s812_s9 = sshll.u32 %s1268_s24, 1 }
  0x41   : > { %s42_s15 = sadd.s32 %s1264_s23, %s812_s9  ;;  %s199_s11 = sand.u32 1, %s1252_s20  }
  0x42   : > { %s1886_s28 = smov (%p35_p10, %s34_s28), 0  ;;  %s1888_s6 = smov (!%p35_p10, %s37_s6), %s1268_s24 }
  0x43   : > { %s819_s13 = sshll.u32 %s199_s11, 7  ;;  %p39_p3 = scmp.ge.s32.totalorder %s1888_s6, 2 }
  0x44   : > { %s853_s29 = sshll.u32 %s42_s15, 11  ;;  %s203_s27 = scalar_lea.vmem [#allocation2], %s819_s13 }
  0x45   : > { %s212_s12 = sshll.u32 %s203_s27, 4  ;;  %s1890_s6 = smov (%p39_p3, %s1888_s6), 0  ;;  %s1461_s12 = int_to_ptr.vmem [resolvable:$true] %s212_s12 }
  0x46   : > { %s1459_s1 = scalar_lea.hbm %s1818_s0, %s853_s29  ;;  %s813_s23 = sshll.u32 %s1890_s6, 1 }
  0x47   : > { %s122_s18 = ssub.s32 %s1268_s24, %s1890_s6  ;;  %s44_s13 = sadd.s32 %s813_s23, %s1886_s28 }
  0x48   : > { %p123_p7 = scmp.eq.s32.totalorder %s122_s18, 0  ;;  %s45_s27 = ssub.s32 %s42_s15, %s44_s13 }
  0x49   : > { %p46_p1 = scmp.eq.s32.totalorder %s45_s27, 0  ;;  %s1857_s25 = sadd.s32 1, %s1240_s17 }
  0x4a   : > { %s1470_s4 = scalar_select %p123_p7, %s1240_s17, %s1857_s25  }
  0x4b   : > { %s1858_s7 = sadd.s32 1, %s1252_s20  ;;  %s1477_s29 = scalar_lea.sflag [#allocation3], %s199_s11 }
  0x4c   : > { %s1475_s9 = scalar_select %p46_p1, %s1252_s20, %s1858_s7  }
  0x4d   : > { %s1056_s3 = scalar_lea.hbm %s1459_s1, 2048  ;;  %p1859_p4 = scmp.ne.s32.totalorder %s1855_s14, 0 }
  0x4e   : > { %p1057_p0 = scmp.ne.s32.totalorder %s1459_s1, %s1056_s3  ;;  %s1061_s15 = scalar_lea.hbm %s1818_s0, 8192 }
  0x4f   : > { %p1058_p6 = pneg %p1859_p4  ;;  %p1062_p12 = scmp.lt.u32.totalorder %s1459_s1, %s1818_s0 }
  0x50   : > { %p1063_p13 = scmp.lt.u32.totalorder %s1061_s15, %s1056_s3  ;;  %p1065_p9 = scmp.lt.u32.totalorder %s1056_s3, %s1459_s1 }
  0x51   : > { %p1059_p11 = pnand %p1058_p6, %p1057_p0 }
  0x52   : > { %p1064_p5 = por %p1063_p13, %p1062_p12 }
  0x53   : > { %p1060_p8 = pneg %p1059_p11 }
  0x54   : > { %p1066_p2 = por %p1065_p9, %p1064_p5 }
  0x56   : > { %p1067_p10 = pnand %p1066_p2, %p1060_p8 }
  0x58   : > { %1070 = shalt.err (!%p1067_p10)
}
  0x59   : > { %s1071_s11 = scalar_lea.vmem %s1461_s12, 2048  ;;  %s1275_s27 = smov [#allocation2]  }
  0x5a   : > { %p1072_p3 = scmp.ne.s32.totalorder %s1461_s12, %s1071_s11  ;;  %s1076_s7 = sshll.u32 %s1275_s27, 4  ;;  %s1077_s7 = int_to_ptr.vmem [resolvable:$false] %s1076_s7 }
  0x5b   : > { %s1078_s23 = scalar_lea.vmem %s1077_s7, 4096  ;;  %p1079_p0 = scmp.lt.s32.totalorder %s1461_s12, %s1077_s7 }
  0x5c   : > { %p1074_p7 = pnand %p1072_p3, %p1058_p6  ;;  %p1080_p11 = scmp.lt.s32.totalorder %s1078_s23, %s1071_s11 }
  0x5e   : > { %p1075_p1 = pneg %p1074_p7  ;;  %p1081_p12 = por %p1080_p11, %p1079_p0 }
  0x60   : > { %p1082_p13 = pnand %p1081_p12, %p1075_p1 }
  0x62   : > { %1085 = shalt.err (!%p1082_p13)
}
  0x63   : > { %s1276_s3 = smov 128   ;;  %s1277_s18 = smov 8  }
  0x64   : > { %919 = dma.hbm_to_vmem [thread:$0]  (!%p1859_p4), %s1459_s1, 2048, %s1461_s12, %s1477_s29, %s1276_s3, %s1276_s3, %s1277_s18  }
  0x65   : > { %p1860_p6 = scmp.ne.s32.totalorder %s1852_s10, 0 }
  0x66   : > { %s1508_s15 = sand.u32 (!%p1860_p6), 1, %s1248_s19   ;;  %p1861_p8 = scmp.ne.s32.totalorder (!%p1860_p6), %s1845_s30, 0 }
  0x67   : > { %224 = sbr.rel (%p1860_p6) target bundleno = 436 (0x1b4), region = 28  ;;  %s824_s13 = sshll.u32 (!%p1860_p6), %s1508_s15, 7 }
  0x68   : > { %s227_s25 = scalar_lea.sflag (!%p1860_p6), [#allocation3], %s1508_s15  ;;  %s1512_s11 = scalar_lea.vmem (!%p1860_p6), [#allocation2], %s824_s13 }
  0x6e   : > { %1215 = dma.done.wait (%p1861_p8), %s227_s25, 2048  }
  0x6f   : > { %1217 = vsyncadd (%p1861_p8), %s227_s25, 4294965248  ;;  %p1862_p4 = scmp.eq.s32.totalorder %s1365_s26, 0 }
  0x71   : > { %1219 = dma.done.wait (%p1862_p4), [#allocation6], 64   ;;  %p1863_p5 = pmov %p1862_p4 }
  0x72   : > { %s259_s1 = sand.u32 1, %s1236_s16   ;;  %s1523_s10 = scalar_lea.vmem [#allocation7], %s824_s13 }
  0x73   : > { %1221 = vsyncadd (%p1863_p5), [#allocation6], 4294967232  ;;  %s1525_s14 = scalar_lea.vmem [#allocation8], %s259_s1  ;;  %s1527_s12 = scalar_lea.vmem [#allocation10], %s259_s1 }
  0x74   : > { %p827_p9 = scmp.ne.s32.totalorder %s1256_s21, 0 }
  0x75   : > { %vm277_vm0 = vcmask (!%p827_p9), 57344   ;;  %v1278_v0 = vmov (!%p827_p9), 0.0  }
  0x76   : > { %276 = sbr.rel (%p827_p9) target bundleno = 125 (0x7d), region = 40  ;;  %278 = vst.msk [vmem:[%s1525_s14] sm:$0x1] (!%p827_p9), %vm277_vm0, %v1278_v0  ;;  %279 = vst.msk [vmem:[%s1527_s12] sm:$0x1] (!%p827_p9), %vm277_vm0, %v1278_v0 }
  0x7d PF: > { %v296_v1 = vld [vmem:[#allocation5] sm:$0xf]  ;;  %vm346_vm1 = vcmask 1043456   ;;  %vm297_vm2 = vcmask 31744   ;;  %v281_v3 = vld [vmem:[%s1512_s11 + $0x8] sm:$0xff]  ;;  %v282_v4 = vld [vmem:[%s1512_s11 + $0x10] sm:$0xff] }
  0x7e   : > { %v280_v2 = vld [vmem:[%s1512_s11] sm:$0xff]  ;;  %872 = vmatprep.subr.msk.mxu0 %vm346_vm1, %v296_v1  ;;  %898 = vmatprep.subr.msk.mxu1 %vm346_vm1, %v296_v1  ;;  %v289_v6 = vld [vmem:[%s1512_s11 + $0x48] sm:$0xff]  ;;  %v290_v7 = vld [vmem:[%s1512_s11 + $0x50] sm:$0xff]  ;;  %vm495_vm3 = vcmask 64512   ;;  %s846_s30 = sshll.u32 %s1260_s22, 1  ;;  %s633_s27 = sshll.u32 %s1523_s10, 4  ;;  %s1627_s27 = int_to_ptr.vmem [resolvable:$true] %s633_s27 }
  0x7f   : > { %874 = vmatprep.mubr.msk.f32.mxu0 %vm297_vm2, %v280_v2  ;;  %873 = vmatpush3.msk.msra.mxu0 %vm346_vm1, %v296_v1  ;;  %v288_v5 = vld [vmem:[%s1512_s11 + $0x40] sm:$0xff]  ;;  %v283_v8 = vld [vmem:[%s1512_s11 + $0x18] sm:$0xff]  ;;  %v285_v12 = vld [vmem:[%s1512_s11 + $0x28] sm:$0xff]  ;;  %s1593_s29 = sadd.s32 %s1256_s21, %s846_s30  ;;  %s610_s18 = scalar_lea.sflag [#allocation4], %s1508_s15 }
  0x80   : > { %875 = vmatmul.mubr.msk.f32.vlgmr.msra.gmra.mrb[0].mxu0 %vm297_vm2, %v281_v3  ;;  %899 = vmatpush3.msk.msra.mxu1 %vm346_vm1, %v296_v1  ;;  %v284_v9 = vld [vmem:[%s1512_s11 + $0x20] sm:$0xff]  ;;  %v291_v10 = vld [vmem:[%s1512_s11 + $0x58] sm:$0xff]  ;;  %v286_v13 = vld [vmem:[%s1512_s11 + $0x30] sm:$0xff]  ;;  %s854_s21 = sshll.u32 %s1593_s29, 11  ;;  %s1086_s13 = scalar_lea.vmem %s1627_s27, 2048 }
  0x81   : > { %877 = vmatprep.mubr.msk.f32.mxu0 %vm297_vm2, %v282_v4  ;;  %886 = vmatprep.mubr.msk.f32.mxu1 %vm297_vm2, %v288_v5  ;;  %v292_v11 = vld [vmem:[%s1512_s11 + $0x60] sm:$0xff]  ;;  %v293_v14 = vld [vmem:[%s1512_s11 + $0x68] sm:$0xff]  ;;  %v294_v15 = vld [vmem:[%s1512_s11 + $0x70] sm:$0xff]  ;;  %s1625_s3 = scalar_lea.hbm %s1820_s2, %s854_s21  ;;  %p1087_p2 = scmp.ne.s32.totalorder %s1627_s27, %s1086_s13 }
  0x82   : > { %887 = vmatmul.mubr.msk.f32.vlgmr.msra.gmra.mrb[0].mxu1 %vm297_vm2, %v289_v6  ;;  %v287_v16 = vld [vmem:[%s1512_s11 + $0x38] sm:$0xff]  ;;  %p1864_p10 = scmp.ne.s32.totalorder %s1846_s5, 0  ;;  %s1279_s25 = smov [#allocation7]  }
  0x83   : > { %889 = vmatprep.mubr.msk.f32.mxu1 %vm297_vm2, %v290_v7  ;;  %v295_v17 = vld [vmem:[%s1512_s11 + $0x78] sm:$0xff]  ;;  %s1090_s11 = sshll.u32 %s1279_s25, 4  ;;  %s1091_s11 = int_to_ptr.vmem [resolvable:$false] %s1090_s11 }
  0x84   : > { %878 = vmatmul.mubr.msk.f32.gmra.mrb[2].mxu0 %vm297_vm2, %v283_v8  ;;  %p1088_p3 = pnand %p1087_p2, %p1864_p10  ;;  %s1092_s1 = scalar_lea.vmem %s1091_s11, 4096 }
  0x85   : > { %880 = vmatprep.mubr.msk.f32.mxu0 %vm297_vm2, %v284_v9  ;;  %p1093_p1 = scmp.lt.s32.totalorder %s1627_s27, %s1091_s11  ;;  %p1094_p0 = scmp.lt.s32.totalorder %s1092_s1, %s1086_s13 }
  0x86   : > { %890 = vmatmul.mubr.msk.f32.gmra.mrb[2].mxu1 %vm297_vm2, %v291_v10  ;;  %p1089_p7 = pneg %p1088_p3 }
  0x87   : > { %892 = vmatprep.mubr.msk.f32.mxu1 %vm297_vm2, %v292_v11  ;;  %p1095_p11 = por %p1094_p0, %p1093_p1 }
  0x88   : > { %881 = vmatmul.mubr.msk.f32.gmra.mrb[4].mxu0 %vm297_vm2, %v285_v12 }
  0x89   : > { %883 = vmatprep.mubr.msk.f32.mxu0 %vm297_vm2, %v286_v13  ;;  %p1096_p12 = pnand %p1095_p11, %p1089_p7 }
  0x8a   : > { %893 = vmatmul.mubr.msk.f32.gmra.mrb[4].mxu1 %vm297_vm2, %v293_v14 }
  0x8b   : > { %895 = vmatprep.mubr.msk.f32.mxu1 %vm297_vm2, %v294_v15 }
  0x8c   : > { %884 = vmatmul.mubr.msk.f32.gmra.mrb[6].mxu0 %vm297_vm2, %v287_v16 }
  0x8e   : > { %896 = vmatmul.mubr.msk.f32.gmra.mrb[6].mxu1 %vm297_vm2, %v295_v17 }
 0x153   : > { %v876_v18 = vpop.f32.mrb[0].mxu0 }
 0x154   : > { %497 = vst.msk [vmem:[%s1523_s10 + $0x8] sm:$0xff] %vm495_vm3, %v876_v18  ;;  %v514_v19 = vsel %vm495_vm3, %v876_v18, 0.0  ;;  %v555_v20 = vmul.f32 %v876_v18, %v876_v18  ;;  %v416_v21 = vpop.f32.mrb[1].mxu0 }
 0x155   : > { %496 = vst.msk [vmem:[%s1523_s10] sm:$0xff] %vm495_vm3, %v416_v21  ;;  %v513_v22 = vsel %vm495_vm3, %v416_v21, 0.0  ;;  %v554_v23 = vmul.f32 %v416_v21, %v416_v21  ;;  %v1570_v24 = vpop.f32.mrb[0].mxu1 }
 0x156   : > { %v571_v25 = vsel %vm495_vm3, %v555_v20, 0.0  ;;  %v515_v26 = vadd.f32 %v514_v19, %v513_v22  ;;  %505 = vst.msk [vmem:[%s1523_s10 + $0x48] sm:$0xff] %vm495_vm3, %v1570_v24  ;;  %v456_v27 = vpop.f32.mrb[1].mxu1 }
 0x157   : > { %v570_v28 = vsel %vm495_vm3, %v554_v23, 0.0  ;;  %v879_v29 = vpop.f32.mrb[2].mxu0  ;;  %504 = vst.msk [vmem:[%s1523_s10 + $0x40] sm:$0xff] %vm495_vm3, %v456_v27  ;;  %v562_v58 = vmul.f32 %v456_v27, %v456_v27  ;;  %v528_v5 = vsel %vm495_vm3, %v456_v27, 0.0 }
 0x158   : > { %v572_v30 = vadd.f32 %v571_v25, %v570_v28  ;;  %499 = vst.msk [vmem:[%s1523_s10 + $0x18] sm:$0xff] %vm495_vm3, %v879_v29  ;;  %v426_v31 = vpop.f32.mrb[3].mxu0  ;;  %v557_v32 = vmul.f32 %v879_v29, %v879_v29  ;;  %v518_v38 = vsel %vm495_vm3, %v879_v29, 0.0 }
 0x159   : > { %498 = vst.msk [vmem:[%s1523_s10 + $0x10] sm:$0xff] %vm495_vm3, %v426_v31  ;;  %v516_v33 = vsel %vm495_vm3, %v426_v31, 0.0  ;;  %v556_v34 = vmul.f32 %v426_v31, %v426_v31  ;;  %v1585_v35 = vpop.f32.mrb[2].mxu1 }
 0x15a   : > { %v517_v36 = vadd.f32 %v516_v33, %v515_v26  ;;  %507 = vst.msk [vmem:[%s1523_s10 + $0x58] sm:$0xff] %vm495_vm3, %v1585_v35  ;;  %v1590_v37 = vpop.f32.mrb[3].mxu1  ;;  %v575_v44 = vsel %vm495_vm3, %v557_v32, 0.0 }
 0x15b   : > { %v573_v39 = vsel %vm495_vm3, %v556_v34, 0.0  ;;  %v882_v40 = vpop.f32.mrb[4].mxu0  ;;  %506 = vst.msk [vmem:[%s1523_s10 + $0x50] sm:$0xff] %vm495_vm3, %v1590_v37 }
 0x15c   : > { %v574_v41 = vadd.f32 %v573_v39, %v572_v30  ;;  %501 = vst.msk [vmem:[%s1523_s10 + $0x28] sm:$0xff] %vm495_vm3, %v882_v40  ;;  %v436_v42 = vpop.f32.mrb[5].mxu0  ;;  %v519_v43 = vadd.f32 %v518_v38, %v517_v36  ;;  %v559_v45 = vmul.f32 %v882_v40, %v882_v40  ;;  %v522_v52 = vsel %vm495_vm3, %v882_v40, 0.0 }
 0x15d   : > { %500 = vst.msk [vmem:[%s1523_s10 + $0x20] sm:$0xff] %vm495_vm3, %v436_v42  ;;  %v520_v46 = vsel %vm495_vm3, %v436_v42, 0.0  ;;  %v558_v47 = vmul.f32 %v436_v42, %v436_v42  ;;  %v1606_v48 = vpop.f32.mrb[4].mxu1 }
 0x15e   : > { %v521_v49 = vadd.f32 %v520_v46, %v519_v43  ;;  %v576_v50 = vadd.f32 %v575_v44, %v574_v41  ;;  %509 = vst.msk [vmem:[%s1523_s10 + $0x68] sm:$0xff] %vm495_vm3, %v1606_v48  ;;  %v1613_v51 = vpop.f32.mrb[5].mxu1  ;;  %v579_v59 = vsel %vm495_vm3, %v559_v45, 0.0 }
 0x15f   : > { %v577_v53 = vsel %vm495_vm3, %v558_v47, 0.0  ;;  %v885_v54 = vpop.f32.mrb[6].mxu0  ;;  %508 = vst.msk [vmem:[%s1523_s10 + $0x60] sm:$0xff] %vm495_vm3, %v1613_v51 }
 0x160   : > { %v578_v55 = vadd.f32 %v577_v53, %v576_v50  ;;  %503 = vst.msk [vmem:[%s1523_s10 + $0x38] sm:$0xff] %vm495_vm3, %v885_v54  ;;  %v446_v56 = vpop.f32.mrb[7].mxu0  ;;  %v523_v57 = vadd.f32 %v522_v52, %v521_v49  ;;  %v561_v60 = vmul.f32 %v885_v54, %v885_v54  ;;  %v526_v3 = vsel %vm495_vm3, %v885_v54, 0.0 }
 0x161   : > { %502 = vst.msk [vmem:[%s1523_s10 + $0x30] sm:$0xff] %vm495_vm3, %v446_v56  ;;  %v524_v61 = vsel %vm495_vm3, %v446_v56, 0.0  ;;  %v560_v62 = vmul.f32 %v446_v56, %v446_v56  ;;  %v1633_v63 = vpop.f32.mrb[6].mxu1 }
 0x162   : > { %v525_v0 = vadd.f32 %v524_v61, %v523_v57  ;;  %v580_v1 = vadd.f32 %v579_v59, %v578_v55  ;;  %511 = vst.msk [vmem:[%s1523_s10 + $0x78] sm:$0xff] %vm495_vm3, %v1633_v63  ;;  %v1638_v2 = vpop.f32.mrb[7].mxu1 }
 0x163   : > { %v581_v4 = vsel %vm495_vm3, %v560_v62, 0.0  ;;  %510 = vst.msk [vmem:[%s1523_s10 + $0x70] sm:$0xff] %vm495_vm3, %v1638_v2 }
 0x164   : > { %v527_v6 = vadd.f32 %v526_v3, %v525_v0  ;;  %v582_v7 = vadd.f32 %v581_v4, %v580_v1 }
 0x165   : > { %1099 = shalt.err (!%p1096_p12)
}
 0x166   : > { %s1100_s10 = scalar_lea.hbm %s1625_s3, 2048  ;;  %s1104_s21 = scalar_lea.hbm %s1820_s2, 8192 }
 0x167   : > { %p1101_p13 = scmp.ne.s32.totalorder %s1625_s3, %s1100_s10  ;;  %p1105_p4 = scmp.lt.u32.totalorder %s1625_s3, %s1820_s2 }
 0x168   : > { %p1106_p5 = scmp.lt.u32.totalorder %s1104_s21, %s1100_s10  ;;  %p1108_p2 = scmp.lt.u32.totalorder %s1100_s10, %s1625_s3 }
 0x169   : > { %p1102_p6 = pnand %p1101_p13, %p1864_p10 }
 0x16a   : > { %p1107_p9 = por %p1106_p5, %p1105_p4 }
 0x16b   : > { %p1103_p8 = pneg %p1102_p6 }
 0x16c   : > { %p1109_p3 = por %p1108_p2, %p1107_p9 }
 0x16e   : > { %p1110_p7 = pnand %p1109_p3, %p1103_p8 }
 0x170   : > { %1113 = shalt.err (!%p1110_p7)
}
 0x171   : > { %s1280_s13 = smov 128   ;;  %s1281_s25 = smov 8   ;;  %v583_v8 = vsel %vm495_vm3, %v561_v60, 0.0  ;;  %v563_v9 = vmul.f32 %v1570_v24, %v1570_v24  ;;  %v585_v10 = vsel %vm495_vm3, %v562_v58, 0.0  ;;  %v564_v11 = vmul.f32 %v1590_v37, %v1590_v37  ;;  %v512_v57 = vld [vmem:[%s1525_s14] sm:$0x1] }
 0x172   : > { %906 = dma.vmem_to_hbm [thread:$0]  (%p1864_p10), %s1627_s27, 2048, %s1625_s3, %s610_s18, %s1280_s13, %s1280_s13, %s1281_s25   ;;  %v584_v12 = vadd.f32 %v583_v8, %v582_v7  ;;  %v529_v13 = vadd.f32 %v528_v5, %v527_v6  ;;  %v530_v14 = vsel %vm495_vm3, %v1570_v24, 0.0  ;;  %v532_v15 = vsel %vm495_vm3, %v1590_v37, 0.0 }
 0x173   : > { %v587_v18 = vsel %vm495_vm3, %v563_v9, 0.0  ;;  %v565_v19 = vmul.f32 %v1585_v35, %v1585_v35  ;;  %v589_v20 = vsel %vm495_vm3, %v564_v11, 0.0  ;;  %v566_v21 = vmul.f32 %v1613_v51, %v1613_v51  ;;  %s614_s5 = sand.u32 1, %s1365_s26   ;;  %s849_s15 = sshll.u32 %s1260_s22, 4  ;;  %v553_v60 = vld [vmem:[%s1527_s12] sm:$0x1] }
 0x174   : > { %v586_v16 = vadd.f32 %v585_v10, %v584_v12  ;;  %v531_v17 = vadd.f32 %v530_v14, %v529_v13  ;;  %v534_v24 = vsel %vm495_vm3, %v1585_v35, 0.0  ;;  %v536_v25 = vsel %vm495_vm3, %v1613_v51, 0.0  ;;  %s649_s27 = sshll.u32 %s1525_s14, 4  ;;  %s662_s3 = sshll.u32 %s1527_s12, 4  ;;  %s1718_s27 = int_to_ptr.vmem [resolvable:$true] %s649_s27  ;;  %s1727_s3 = int_to_ptr.vmem [resolvable:$true] %s662_s3 }
 0x175   : > { %v591_v28 = vsel %vm495_vm3, %v565_v19, 0.0  ;;  %v567_v29 = vmul.f32 %v1606_v48, %v1606_v48  ;;  %v593_v30 = vsel %vm495_vm3, %v566_v21, 0.0  ;;  %v568_v31 = vmul.f32 %v1638_v2, %v1638_v2  ;;  %s1865_s1 = sld [smem:[#allocation21_spill]]  ;;  %s1866_s30 = sld [smem:[#allocation22_spill]] }
 0x176   : > { %v533_v22 = vadd.f32 %v532_v15, %v531_v17  ;;  %v588_v23 = vadd.f32 %v587_v18, %v586_v16  ;;  %v538_v34 = vsel %vm495_vm3, %v1606_v48, 0.0  ;;  %v540_v35 = vsel %vm495_vm3, %v1638_v2, 0.0  ;;  %s1729_s21 = scalar_lea.sflag [#allocation9], %s614_s5  ;;  %s1114_s7 = scalar_lea.vmem %s1718_s27, 16 }
 0x177   : > { %v595_v38 = vsel %vm495_vm3, %v567_v29, 0.0  ;;  %v569_v39 = vmul.f32 %v1633_v63, %v1633_v63  ;;  %v597_v40 = vsel %vm495_vm3, %v568_v31, 0.0  ;;  %v542_v43 = vsel %vm495_vm3, %v1633_v63, 0.0  ;;  %p1115_p10 = scmp.ne.s32.totalorder %s1718_s27, %s1114_s7  ;;  %p1867_p1 = scmp.ne.s32.totalorder %s1849_s8, 0 }
 0x178   : > { %v590_v26 = vadd.f32 %v589_v20, %v588_v23  ;;  %v535_v27 = vadd.f32 %v534_v24, %v533_v22  ;;  %vm551_vm4 = vcmask 57344   ;;  %s1282_s23 = smov [#allocation8]  }
 0x179   : > { %v599_v46 = vsel %vm495_vm3, %v569_v39, 0.0  ;;  %p1116_p0 = pnand %p1115_p10, %p1867_p1  ;;  %s1118_s13 = sshll.u32 %s1282_s23, 4  ;;  %s1119_s13 = int_to_ptr.vmem [resolvable:$false] %s1118_s13 }
 0x17a   : > { %v537_v32 = vadd.f32 %v536_v25, %v535_v27  ;;  %v592_v33 = vadd.f32 %v591_v28, %v590_v26  ;;  %s1120_s25 = scalar_lea.vmem %s1119_s13, 32  ;;  %p1121_p12 = scmp.lt.s32.totalorder %s1718_s27, %s1119_s13 }
 0x17b   : > { %s1716_s10 = scalar_lea.hbm %s1865_s1, %s849_s15  ;;  %s1725_s29 = scalar_lea.hbm %s1866_s30, %s849_s15 }
 0x17c   : > { %v594_v36 = vadd.f32 %v593_v30, %v592_v33  ;;  %v539_v37 = vadd.f32 %v538_v34, %v537_v32  ;;  %p1117_p11 = pneg %p1116_p0  ;;  %p1122_p13 = scmp.lt.s32.totalorder %s1120_s25, %s1114_s7 }
 0x17e   : > { %v541_v41 = vadd.f32 %v540_v35, %v539_v37  ;;  %v596_v42 = vadd.f32 %v595_v38, %v594_v36  ;;  %p1123_p6 = por %p1122_p13, %p1121_p12 }
 0x180   : > { %v543_v44 = vadd.f32 %v542_v43, %v541_v41  ;;  %v598_v45 = vadd.f32 %v597_v40, %v596_v42  ;;  %p1124_p8 = pnand %p1123_p6, %p1117_p11 }
 0x182   : > { %v544_v47 = vrot.slane %v543_v44, 4  ;;  %v600_v48 = vadd.f32 %v599_v46, %v598_v45 }
 0x184   : > { %v545_v49 = vadd.f32 %v544_v47, %v543_v44  ;;  %v601_v50 = vrot.slane %v600_v48, 4 }
 0x186   : > { %v546_v51 = vrot.slane %v545_v49, 2  ;;  %v602_v52 = vadd.f32 %v601_v50, %v600_v48 }
 0x188   : > { %v547_v53 = vadd.f32 %v546_v51, %v545_v49  ;;  %v603_v54 = vrot.slane %v602_v52, 2 }
 0x18a   : > { %v604_v55 = vadd.f32 %v603_v54, %v602_v52  ;;  %v548_v56 = vrot.slane %v547_v53, 1 }
 0x18c   : > { %v605_v58 = vrot.slane %v604_v55, 1  ;;  %v549_v59 = vadd.f32 %v548_v56, %v547_v53 }
 0x18e   : > { %v550_v61 = vadd.f32 %v549_v59, %v512_v57  ;;  %v606_v62 = vadd.f32 %v605_v58, %v604_v55 }
 0x190   : > { %552 = vst.msk [vmem:[%s1525_s14] sm:$0x1] %vm551_vm4, %v550_v61  ;;  %v607_v63 = vadd.f32 %v606_v62, %v553_v60 }
 0x191   : > { %1127 = shalt.err (!%p1124_p8)
}
 0x192   : > { %s1128_s14 = scalar_lea.hbm %s1716_s10, 16  ;;  %s1132_s18 = scalar_lea.hbm %s1865_s1, 32 }
 0x193   : > { %p1129_p4 = scmp.ne.s32.totalorder %s1716_s10, %s1128_s14  ;;  %p1133_p2 = scmp.lt.u32.totalorder %s1716_s10, %s1865_s1 }
 0x194   : > { %p1134_p3 = scmp.lt.u32.totalorder %s1132_s18, %s1128_s14  ;;  %p1136_p10 = scmp.lt.u32.totalorder %s1128_s14, %s1716_s10 }
 0x195   : > { %p1130_p5 = pnand %p1129_p4, %p1867_p1 }
 0x196   : > { %p1135_p7 = por %p1134_p3, %p1133_p2 }
 0x197   : > { %p1131_p9 = pneg %p1130_p5 }
 0x198   : > { %p1137_p0 = por %p1136_p10, %p1135_p7 }
 0x19a   : > { %p1138_p11 = pnand %p1137_p0, %p1131_p9 }
 0x19c   : > { %1141 = shalt.err (!%p1138_p11)
}
 0x19d   : > { %907 = dma.vmem_to_hbm [thread:$0]  (%p1867_p1), %s1718_s27, 16, %s1716_s10, %s1729_s21   ;;  %608 = vst.msk [vmem:[%s1527_s12] sm:$0x1] %vm551_vm4, %v607_v63 }
 0x19e   : > { %s1142_s26 = scalar_lea.vmem %s1727_s3, 16  ;;  %s1283_s7 = smov [#allocation10]  }
 0x19f   : > { %p1143_p12 = scmp.ne.s32.totalorder %s1727_s3, %s1142_s26  ;;  %s1146_s23 = sshll.u32 %s1283_s7, 4  ;;  %s1147_s23 = int_to_ptr.vmem [resolvable:$false] %s1146_s23 }
 0x1a0   : > { %s1148_s13 = scalar_lea.vmem %s1147_s23, 32  ;;  %p1149_p8 = scmp.lt.s32.totalorder %s1727_s3, %s1147_s23 }
 0x1a1   : > { %p1144_p13 = pnand %p1143_p12, %p1867_p1  ;;  %p1150_p4 = scmp.lt.s32.totalorder %s1148_s13, %s1142_s26 }
 0x1a3   : > { %p1145_p6 = pneg %p1144_p13  ;;  %p1151_p5 = por %p1150_p4, %p1149_p8 }
 0x1a5   : > { %p1152_p9 = pnand %p1151_p5, %p1145_p6 }
 0x1a7   : > { %1155 = shalt.err (!%p1152_p9)
}
 0x1a8   : > { %s1156_s12 = scalar_lea.hbm %s1725_s29, 16  ;;  %s1160_s25 = scalar_lea.hbm %s1866_s30, 32 }
 0x1a9   : > { %p1157_p2 = scmp.ne.s32.totalorder %s1725_s29, %s1156_s12  ;;  %p1161_p10 = scmp.lt.u32.totalorder %s1725_s29, %s1866_s30 }
 0x1aa   : > { %p1162_p0 = scmp.lt.u32.totalorder %s1160_s25, %s1156_s12  ;;  %p1164_p12 = scmp.lt.u32.totalorder %s1156_s12, %s1725_s29 }
 0x1ab   : > { %p1158_p3 = pnand %p1157_p2, %p1867_p1 }
 0x1ac   : > { %p1163_p11 = por %p1162_p0, %p1161_p10 }
 0x1ad   : > { %p1159_p7 = pneg %p1158_p3 }
 0x1ae   : > { %p1165_p13 = por %p1164_p12, %p1163_p11 }
 0x1b0   : > { %p1166_p6 = pnand %p1165_p13, %p1159_p7 }
 0x1b2   : > { %1169 = shalt.err (!%p1166_p6)
}
 0x1b3   : > { %908 = dma.vmem_to_hbm [thread:$0]  (%p1867_p1), %s1727_s3, 16, %s1725_s29, %s1729_s21  }
 0x1b4 PF: > { %s1868_s15 = sld [smem:[#allocation17_spill]]  ;;  %s1869_s18 = sld [smem:[#allocation15_spill]] }
 0x1b5   : > { %s1870_s11 = sld [smem:[#allocation18_spill]] }
 0x1ba   : > { %p933_p8 = scmp.ge.s32.totalorder %s1868_s15, 2  ;;  %s674_s22 = sand.u32 1, %s1869_s18  }
 0x1bb   : > { %p1871_p4 = scmp.ne.s32.totalorder %s1870_s11, 0  ;;  %s675_s26 = scalar_lea.sflag [#allocation4], %s674_s22 }
 0x1bd   : > { %p921_p5 = pnand %p933_p8, %p1871_p4 }
 0x1bf   : > { %1223 = dma.done.wait (!%p921_p5), %s675_s26, 2048  }
 0x1c0   : > { %1225 = vsyncadd (!%p921_p5), %s675_s26, 4294965248  ;;  %s1872_s7 = sadd.s32 4294967294, %s1868_s15   ;;  %s1873_s23 = sld [smem:[#allocation19_spill]] }
 0x1c1   : > { %s683_s13 = sand.u32 1, %s1872_s7  }
 0x1c2   : > { %s684_s8 = scalar_lea.sflag [#allocation9], %s683_s13 }
 0x1c6   : > { %p1874_p9 = scmp.ne.s32.totalorder %s1873_s23, 0 }
 0x1c8   : > { %p924_p2 = pnand %p933_p8, %p1874_p9 }
 0x1ca   : > { %1227 = dma.done.wait (!%p924_p2), %s684_s8, 32  }
 0x1cb   : > { %1229 = vsyncadd (!%p924_p2), %s684_s8, 4294967264  ;;  %s25_s25 = sadd.s32 1, %s1868_s15   ;;  %s1875_s21 = sld [smem:[#allocation16_spill]] }
 0x1cc   : > { %p22_p1 = scmp.ge.s32.totalorder %s25_s25, 6   ;;  %s1876_s15 = smov %s1236_s16 }
 0x1cd   : > { %s1877_s16 = smov %s1240_s17  ;;  %s1878_s17 = smov %s1470_s4 }
 0x1ce   : > { %s1879_s18 = smov %s1248_s19  ;;  %s1880_s19 = smov %s1252_s20 }
 0x1cf   : > { %s1881_s20 = smov %s1475_s9  ;;  %s1882_s22 = smov %s1268_s24 }
 0x1d0   : > { %s1883_s23 = smov %s1886_s28  ;;  %s1884_s24 = smov %s1890_s6 }
 0x1d1   :  { %24 = sbr.rel (!%p22_p1) target bundleno = 16 (0x10), region = 113 }
 0x1d8   :  { %696 = vsyncpa [#allocation3], 1 }
 0x1d9   :  { %698 = vsyncpa [#allocation3 + $0x1], 1 }
 0x1da   :  { %699 = vsyncpa [#allocation6], 1 }
 0x1db   :  { %700 = vsyncpa [#allocation4], 1 }
 0x1dc   :  { %702 = vsyncpa [#allocation4 + $0x1], 1 }
 0x1dd   :  { %703 = vsyncpa [#allocation9], 1 }
 0x1de   :  { %705 = vsyncpa [#allocation9 + $0x1], 1 }

// kernel: _lambda_.7
= control target key start
LH: loop header
LB: loop body
LE: loop exit
PB: predicated region body
PF: predicated region fallthrough
CT: control target
= control target key end

     0   :  { %s1413_s0 = inlined_call_operand.hbm [shape: f32[512,8], index: 0, kind: input, shape index: {}]   ;;  %s1414_s1 = inlined_call_operand.hbm [shape: f32[1,8], index: 1, kind: input, shape index: {}]   ;;  %s1415_s2 = inlined_call_operand.hbm [shape: f32[1,8], index: 2, kind: input, shape index: {}]   ;;  %s1416_s3 = inlined_call_operand.hbm [shape: f32[512,4], index: 3, kind: input, shape index: {}]   ;;  %s1417_s4 = inlined_call_operand.hbm [shape: f32[512,8], index: 4, kind: output, shape index: {}]  }
   0x1   :  { %1423 = sst [smem:[#allocation15_spill]] %s1413_s0 }
   0x2   :  { %9 = vsyncpa [#allocation3], 0 }
   0x3   :  { %11 = vsyncpa [#allocation3 + $0x1], 0 }
   0x4   :  { %12 = vsyncpa [#allocation6], 0 }
   0x5   :  { %13 = vsyncpa [#allocation9], 0 }
   0x6   :  { %15 = vsyncpa [#allocation9 + $0x1], 0 }
   0x7   :  { %16 = vsyncpa [#allocation4], 0 }
   0x8   :  { %18 = vsyncpa [#allocation4 + $0x1], 0  ;;  %s952_s15 = smov 0   ;;  %s954_s16 = smov 0  }
   0x9   :  { %s956_s17 = smov 0   ;;  %s958_s18 = smov 0  }
   0xa LB: > { %s973_s19 = sadd.s32 4294967295, %s915_s18   ;;  %s621_s20 = sadd.s32 4294967294, %s915_s18   ;;  %s915_s18 = sphi %s958_s18, %s1442_s18   ;;  %s911_s17 = sphi %s956_s17, %s1441_s17   ;;  %s907_s16 = sphi %s954_s16, %s1440_s16   ;;  %s903_s15 = sphi %s952_s15, %s1439_s15  }
   0xb   : > { %s977_s21 = sadd.s32 1, %s915_s18   ;;  %s31_s22 = sadd.s32 1, %s911_s17 }
   0xc   : > { %s28_s23 = ssub.s32 %s915_s18, %s977_s21  ;;  %p38_p0 = scmp.ne.s32.totalorder %s911_s17, %s907_s16 }
   0xd   : > { %p29_p1 = scmp.eq.s32.totalorder %s28_s23, 0  ;;  %p39_p2 = scmp.eq.s32.totalorder %s915_s18, 0 }
   0xe   : > { %p44_p3 = scmp.ne.s32.totalorder %s907_s16, %s903_s15  ;;  %p1418_p4 = scmp.eq.s32.totalorder %s973_s19, 0 }
   0xf   : > { %s989_s24 = scalar_select %p29_p1, %s911_s17, %s31_s22  }
  0x10   : > { %p991_p5 = por %p39_p2, %p38_p0  ;;  %p997_p6 = por %p1418_p4, %p44_p3 }
  0x11   : > { %p136_p7 = scmp.eq.s32.totalorder %s973_s19, 3  ;;  %p142_p8 = scmp.eq.s32.totalorder %s621_s20, 3 }
  0x12   : > { %s1425_s26 = scalar_select %p997_p6, 1, 0 }
  0x13   : > { %p622_p9 = scmp.ge.s32.totalorder %s915_s18, 1  ;;  %p149_p10 = scmp.lt.s32.totalorder %s915_s18, 5 }
  0x14   : > { %p1004_p11 = por %p136_p7, %p38_p0  ;;  %p1008_p12 = por %p142_p8, %p44_p3 }
  0x15   : > { %p1012_p13 = pnand %p622_p9, %p149_p10  ;;  %s917_s30 = smov [#allocation5]  }
  0x16   : > { %s1426_s27 = scalar_select %p1004_p11, 1, 0 }
  0x17   : > { %s1427_s28 = scalar_select %p1008_p12, 1, 0 }
  0x18   : > { %s1428_s29 = scalar_select %p1012_p13, 1, 0 }
  0x19   : > { %p662_p1 = pneg %p1012_p13  ;;  %s162_s5 = sshll.u32 %s917_s30, 4  ;;  %s163_s5 = int_to_ptr.vmem [resolvable:$true] %s162_s5 }
  0x1a   : > { %p682_p2 = scmp.lt.s32.totalorder %s915_s18, 4  ;;  %s918_s8 = smov [#allocation7]  }
  0x1b   : > { %p1021_p0 = pnand %p662_p1, %p1418_p4  ;;  %s173_s9 = sshll.u32 %s918_s8, 4  ;;  %s1031_s9 = int_to_ptr.vmem [resolvable:$true] %s173_s9 }
  0x1c   : > { %p1027_p3 = pnand %p682_p2, %p991_p5  ;;  %s725_s12 = scalar_lea.hbm %s1414_s1, 16 }
  0x1d   : > { %p726_p7 = scmp.ne.s32.totalorder %s1414_s1, %s725_s12  ;;  %p727_p8 = pneg %p1021_p0 }
  0x1e   : > { %s1430_s7 = scalar_select %p1027_p3, 1, 0 }
  0x1f   : > { %p728_p5 = pnand %p727_p8, %p726_p7  ;;  %p732_p10 = scmp.lt.u32.totalorder %s725_s12, %s1414_s1 }
  0x21   : > { %p729_p9 = pneg %p728_p5 }
  0x23   : > { %p734_p1 = pnand %p732_p10, %p729_p9 }
  0x25   : > { %737 = shalt.err (!%p734_p1)
}
  0x26   : > { %s738_s23 = scalar_lea.vmem %s163_s5, 16  ;;  %s745_s25 = scalar_lea.vmem %s163_s5, 32 }
  0x27   : > { %p739_p2 = scmp.ne.s32.totalorder %s163_s5, %s738_s23  ;;  %p746_p11 = scmp.lt.s32.totalorder %s163_s5, %s163_s5 }
  0x28   : > { %p747_p6 = scmp.lt.s32.totalorder %s745_s25, %s738_s23 }
  0x29   : > { %p741_p4 = pnand %p739_p2, %p727_p8 }
  0x2a   : > { %p748_p13 = por %p747_p6, %p746_p11 }
  0x2b   : > { %p742_p12 = pneg %p741_p4 }
  0x2d   : > { %p749_p3 = pnand %p748_p13, %p742_p12 }
  0x2f   : > { %752 = shalt.err (!%p749_p3)
}
  0x30   : > { %665 = dma.hbm_to_vmem [thread:$0]  (!%p1021_p0), %s1414_s1, 16, %s163_s5, [#allocation6]  }
  0x31   : > { %s1056_s10 = sand.u32 1, %s911_s17   ;;  %s753_s13 = scalar_lea.hbm %s1415_s2, 16 }
  0x32   : > { %p754_p4 = scmp.ne.s32.totalorder %s1415_s2, %s753_s13  ;;  %p760_p12 = scmp.lt.u32.totalorder %s753_s13, %s1415_s2 }
  0x34   : > { %p756_p6 = pnand %p754_p4, %p727_p8 }
  0x36   : > { %p757_p11 = pneg %p756_p6 }
  0x38   : > { %p762_p13 = pnand %p760_p12, %p757_p11 }
  0x3a   : > { %765 = shalt.err (!%p762_p13)
}
  0x3b   : > { %s766_s5 = scalar_lea.vmem %s1031_s9, 16  ;;  %s773_s25 = scalar_lea.vmem %s1031_s9, 32 }
  0x3c   : > { %p767_p3 = scmp.ne.s32.totalorder %s1031_s9, %s766_s5  ;;  %p774_p9 = scmp.lt.s32.totalorder %s1031_s9, %s1031_s9 }
  0x3d   : > { %p775_p10 = scmp.lt.s32.totalorder %s773_s25, %s766_s5 }
  0x3e   : > { %p769_p7 = pnand %p767_p3, %p727_p8 }
  0x3f   : > { %p776_p1 = por %p775_p10, %p774_p9 }
  0x40   : > { %p770_p5 = pneg %p769_p7 }
  0x42   : > { %p777_p2 = pnand %p776_p1, %p770_p5 }
  0x44   : > { %780 = shalt.err (!%p777_p2)
}
  0x45   : > { %668 = dma.hbm_to_vmem [thread:$0]  (!%p1021_p0), %s1415_s2, 16, %s1031_s9, [#allocation6]  }
  0x46   : > { %s626_s11 = sshll.u32 %s1056_s10, 7  ;;  %s645_s12 = sshll.u32 %s915_s18, 11 }
  0x47   : > { %s1431_s0 = sld [smem:[#allocation15_spill]]  ;;  %s188_s6 = scalar_lea.vmem [#allocation2], %s626_s11 }
  0x48   : > { %s195_s22 = sshll.u32 %s188_s6, 4  ;;  %s185_s23 = scalar_lea.sflag [#allocation3], %s1056_s10  ;;  %s1095_s22 = int_to_ptr.vmem [resolvable:$true] %s195_s22 }
  0x49   : > { %p1432_p8 = scmp.ne.s32.totalorder %s1430_s7, 0 }
  0x4b   : > { %p783_p4 = pneg %p1432_p8 }
  0x4d   : > { %s1091_s20 = scalar_lea.hbm %s1431_s0, %s645_s12  ;;  %s786_s30 = scalar_lea.hbm %s1431_s0, 8192 }
  0x4e   : > { %s781_s5 = scalar_lea.hbm %s1091_s20, 2048  ;;  %p787_p12 = scmp.lt.u32.totalorder %s1091_s20, %s1431_s0 }
  0x4f   : > { %p782_p0 = scmp.ne.s32.totalorder %s1091_s20, %s781_s5  ;;  %p788_p13 = scmp.lt.u32.totalorder %s786_s30, %s781_s5 }
  0x50   : > { %p790_p7 = scmp.lt.u32.totalorder %s781_s5, %s1091_s20 }
  0x51   : > { %p784_p6 = pnand %p783_p4, %p782_p0  ;;  %p789_p3 = por %p788_p13, %p787_p12 }
  0x53   : > { %p785_p11 = pneg %p784_p6  ;;  %p791_p5 = por %p790_p7, %p789_p3 }
  0x55   : > { %p792_p9 = pnand %p791_p5, %p785_p11 }
  0x57   : > { %795 = shalt.err (!%p792_p9)
}
  0x58   : > { %s796_s14 = scalar_lea.vmem %s1095_s22, 2048  ;;  %s919_s6 = smov [#allocation2]  }
  0x59   : > { %p797_p10 = scmp.ne.s32.totalorder %s1095_s22, %s796_s14  ;;  %s801_s9 = sshll.u32 %s919_s6, 4  ;;  %s802_s9 = int_to_ptr.vmem [resolvable:$false] %s801_s9 }
  0x5a   : > { %s803_s25 = scalar_lea.vmem %s802_s9, 4096  ;;  %p804_p0 = scmp.lt.s32.totalorder %s1095_s22, %s802_s9 }
  0x5b   : > { %p799_p1 = pnand %p797_p10, %p783_p4  ;;  %p805_p6 = scmp.lt.s32.totalorder %s803_s25, %s796_s14 }
  0x5d   : > { %p800_p2 = pneg %p799_p1  ;;  %p806_p12 = por %p805_p6, %p804_p0 }
  0x5f   : > { %p807_p13 = pnand %p806_p12, %p800_p2 }
  0x61   : > { %810 = shalt.err (!%p807_p13)
}
  0x62   : > { %s920_s5 = smov 128   ;;  %s921_s30 = smov 8  }
  0x63   : > { %672 = dma.hbm_to_vmem [thread:$0]  (!%p1432_p8), %s1091_s20, 2048, %s1095_s22, %s185_s23, %s920_s5, %s920_s5, %s921_s30  }
  0x64   : > { %s1133_s14 = scalar_lea.hbm %s1416_s3, %s645_s12  ;;  %s209_s6 = scalar_lea.vmem [#allocation8], %s626_s11 }
  0x65   : > { %s216_s9 = sshll.u32 %s209_s6, 4  ;;  %s206_s25 = scalar_lea.sflag [#allocation9], %s1056_s10  ;;  %s1137_s9 = int_to_ptr.vmem [resolvable:$true] %s216_s9 }
  0x66   : > { %s811_s0 = scalar_lea.hbm %s1133_s14, 2048  ;;  %s816_s12 = scalar_lea.hbm %s1416_s3, 8192 }
  0x67   : > { %p812_p11 = scmp.ne.s32.totalorder %s1133_s14, %s811_s0  ;;  %p817_p5 = scmp.lt.u32.totalorder %s1133_s14, %s1416_s3 }
  0x68   : > { %p818_p9 = scmp.lt.u32.totalorder %s816_s12, %s811_s0  ;;  %p820_p1 = scmp.lt.u32.totalorder %s811_s0, %s1133_s14 }
  0x69   : > { %p814_p3 = pnand %p812_p11, %p783_p4 }
  0x6a   : > { %p819_p10 = por %p818_p9, %p817_p5 }
  0x6b   : > { %p815_p7 = pneg %p814_p3 }
  0x6c   : > { %p821_p2 = por %p820_p1, %p819_p10 }
  0x6e   : > { %p822_p0 = pnand %p821_p2, %p815_p7 }
  0x70   : > { %825 = shalt.err (!%p822_p0)
}
  0x71   : > { %s826_s11 = scalar_lea.vmem %s1137_s9, 2048  ;;  %s922_s13 = smov [#allocation8]  }
  0x72   : > { %p827_p6 = scmp.ne.s32.totalorder %s1137_s9, %s826_s11  ;;  %s831_s6 = sshll.u32 %s922_s13, 4  ;;  %s832_s6 = int_to_ptr.vmem [resolvable:$false] %s831_s6 }
  0x73   : > { %s833_s20 = scalar_lea.vmem %s832_s6, 4096  ;;  %p834_p11 = scmp.lt.s32.totalorder %s1137_s9, %s832_s6 }
  0x74   : > { %p829_p12 = pnand %p827_p6, %p783_p4  ;;  %p835_p3 = scmp.lt.s32.totalorder %s833_s20, %s826_s11 }
  0x76   : > { %p830_p13 = pneg %p829_p12  ;;  %p836_p5 = por %p835_p3, %p834_p11 }
  0x78   : > { %p837_p9 = pnand %p836_p5, %p830_p13 }
  0x7a   : > { %840 = shalt.err (!%p837_p9)
}
  0x7b   : > { %675 = dma.hbm_to_vmem [thread:$0]  (!%p1432_p8), %s1133_s14, 2048, %s1137_s9, %s206_s25, %s920_s5, %s920_s5, %s921_s30  }
  0x7c   : > { %p1433_p4 = scmp.ne.s32.totalorder %s1428_s29, 0 }
  0x7d   : > { %s1171_s0 = sand.u32 (!%p1433_p4), 1, %s907_s16   ;;  %p1434_p7 = scmp.ne.s32.totalorder (!%p1433_p4), %s1425_s26, 0 }
  0x7e   : > { %228 = sbr.rel (%p1433_p4) target bundleno = 304 (0x130), region = 36  ;;  %s1174_s22 = sshll.u32 (!%p1433_p4), %s1171_s0, 7 }
  0x7f   : > { %s231_s7 = scalar_lea.sflag (!%p1433_p4), [#allocation3], %s1171_s0  ;;  %s1178_s12 = scalar_lea.vmem (!%p1433_p4), [#allocation2], %s1174_s22 }
  0x85   : > { %886 = dma.done.wait (%p1434_p7), %s231_s7, 2048  }
  0x86   : > { %888 = vsyncadd (%p1434_p7), %s231_s7, 4294965248  ;;  %p1435_p8 = scmp.eq.s32.totalorder %s973_s19, 0 }
  0x88   : > { %890 = dma.done.wait (%p1435_p8), [#allocation6], 32   ;;  %p1436_p10 = pmov %p1435_p8 }
  0x89   : > { %s248_s29 = scalar_lea.sflag [#allocation9], %s1171_s0  ;;  %s1190_s10 = scalar_lea.vmem [#allocation8], %s1174_s22 }
  0x8a   : > { %892 = vsyncadd (%p1436_p10), [#allocation6], 4294967264 }
  0x8b   : > { %894 = dma.done.wait (%p1434_p7), %s248_s29, 2048  }
  0x8c   : > { %896 = vsyncadd (%p1434_p7), %s248_s29, 4294965248  ;;  %v348_v0 = vld [vmem:[%s1190_s10 + $0x10] sm:$0xff]  ;;  %v346_v1 = vld [vmem:[%s1190_s10] sm:$0xff]  ;;  %s923_s5 = smov 4   ;;  %vm426_vm0 = vcmask 31744   ;;  %vm475_vm1 = vcmask 64512  }
  0x8d   : > { %382 = vrot.lane.b32.xlu1 %v348_v0, %s923_s5  ;;  %378 = vrot.lane.b32.xlu0 %v346_v1, %s923_s5  ;;  %v349_v2 = vld [vmem:[%s1190_s10 + $0x18] sm:$0xff]  ;;  %v347_v3 = vld [vmem:[%s1190_s10 + $0x8] sm:$0xff]  ;;  %s1277_s26 = scalar_lea.vmem [#allocation10], %s1174_s22  ;;  %s647_s30 = sshll.u32 %s973_s19, 11 }
  0x8e   : > { %v1201_v4 = vld [vmem:[%s1190_s10 + $0x28] sm:$0xff]  ;;  %v1204_v5 = vld [vmem:[%s1190_s10 + $0x20] sm:$0xff]  ;;  %v1209_v6 = vld [vmem:[%s1190_s10 + $0x38] sm:$0xff]  ;;  %s506_s14 = sshll.u32 %s1277_s26, 4  ;;  %s1364_s23 = scalar_lea.hbm %s1417_s4, %s647_s30  ;;  %s1366_s14 = int_to_ptr.vmem [resolvable:$true] %s506_s14 }
  0x8f   : > { %v1212_v7 = vld [vmem:[%s1190_s10 + $0x30] sm:$0xff]  ;;  %v1217_v8 = vld [vmem:[%s1190_s10 + $0x48] sm:$0xff]  ;;  %v1220_v9 = vld [vmem:[%s1190_s10 + $0x40] sm:$0xff]  ;;  %s493_s19 = scalar_lea.sflag [#allocation4], %s1171_s0  ;;  %s841_s8 = scalar_lea.vmem %s1366_s14, 2048 }
  0x90   : > { %v1225_v10 = vld [vmem:[%s1190_s10 + $0x58] sm:$0xff]  ;;  %v1228_v11 = vld [vmem:[%s1190_s10 + $0x50] sm:$0xff]  ;;  %v1233_v12 = vld [vmem:[%s1190_s10 + $0x68] sm:$0xff]  ;;  %p842_p1 = scmp.ne.s32.totalorder %s1366_s14, %s841_s8  ;;  %p1437_p2 = scmp.ne.s32.totalorder %s1426_s27, 0 }
  0x91   : > { %384 = vrot.lane.b32.xlu1 %v349_v2, %s923_s5  ;;  %380 = vrot.lane.b32.xlu0 %v347_v3, %s923_s5  ;;  %v1236_v13 = vld [vmem:[%s1190_s10 + $0x60] sm:$0xff]  ;;  %v1241_v14 = vld [vmem:[%s1190_s10 + $0x78] sm:$0xff]  ;;  %s924_s11 = smov [#allocation10]  }
  0x92   : > { %v1244_v15 = vld [vmem:[%s1190_s10 + $0x70] sm:$0xff]  ;;  %v1249_v17 = vld [vmem:[#allocation5] ss:$0 sm:$0xff]  ;;  %v1254_v21 = vld [vmem:[#allocation7] ss:$0 sm:$0xff]  ;;  %p843_p0 = pnand %p842_p1, %p1437_p2  ;;  %s845_s13 = sshll.u32 %s924_s11, 4  ;;  %s846_s13 = int_to_ptr.vmem [resolvable:$false] %s845_s13 }
  0x93   : > { %v286_v16 = vld [vmem:[%s1178_s12 + $0x10] sm:$0xff]  ;;  %v284_v18 = vld [vmem:[%s1178_s12] sm:$0xff]  ;;  %v287_v22 = vld [vmem:[%s1178_s12 + $0x18] sm:$0xff]  ;;  %s847_s6 = scalar_lea.vmem %s846_s13, 4096  ;;  %p848_p12 = scmp.lt.s32.totalorder %s1366_s14, %s846_s13 }
  0x94   : > { %v309_v19 = vmul.f32 %v1249_v17, %v286_v16  ;;  %v307_v20 = vmul.f32 %v1249_v17, %v284_v18  ;;  %v285_v23 = vld [vmem:[%s1178_s12 + $0x8] sm:$0xff]  ;;  %v310_v26 = vmul.f32 %v1249_v17, %v287_v22  ;;  %v288_v29 = vld [vmem:[%s1178_s12 + $0x20] sm:$0xff]  ;;  %v291_v40 = vld [vmem:[%s1178_s12 + $0x38] sm:$0xff]  ;;  %p844_p6 = pneg %p843_p0  ;;  %p849_p13 = scmp.lt.s32.totalorder %s847_s6, %s841_s8 }
  0x95   : > { %388 = vrot.lane.b32.xlu1 %v1201_v4, %s923_s5  ;;  %386 = vrot.lane.b32.xlu0 %v1204_v5, %s923_s5  ;;  %v308_v27 = vmul.f32 %v1249_v17, %v285_v23  ;;  %v289_v28 = vld [vmem:[%s1178_s12 + $0x28] sm:$0xff]  ;;  %v311_v35 = vmul.f32 %v1249_v17, %v288_v29  ;;  %v290_v41 = vld [vmem:[%s1178_s12 + $0x30] sm:$0xff]  ;;  %v314_v52 = vmul.f32 %v1249_v17, %v291_v40 }
  0x96   : > { %v332_v24 = vadd.f32 %v1254_v21, %v309_v19  ;;  %v330_v25 = vadd.f32 %v1254_v21, %v307_v20  ;;  %v312_v34 = vmul.f32 %v1249_v17, %v289_v28  ;;  %v333_v38 = vadd.f32 %v1254_v21, %v310_v26  ;;  %v293_v54 = vld [vmem:[%s1178_s12 + $0x48] sm:$0xff]  ;;  %v292_v55 = vld [vmem:[%s1178_s12 + $0x40] sm:$0xff]  ;;  %v294_v16 = vld [vmem:[%s1178_s12 + $0x50] sm:$0xff]  ;;  %p850_p11 = por %p849_p13, %p848_p12 }
  0x97   : > { %v331_v39 = vadd.f32 %v1254_v21, %v308_v27  ;;  %v334_v49 = vadd.f32 %v1254_v21, %v311_v35  ;;  %v313_v53 = vmul.f32 %v1249_v17, %v290_v41  ;;  %v316_v62 = vmul.f32 %v1249_v17, %v293_v54 }
  0x98   : > { %v335_v48 = vadd.f32 %v1254_v21, %v312_v34  ;;  %v315_v63 = vmul.f32 %v1249_v17, %v292_v55  ;;  %p851_p3 = pnand %p850_p11, %p844_p6 }
  0x99   : > { %392 = vrot.lane.b32.xlu1 %v1209_v6, %s923_s5  ;;  %390 = vrot.lane.b32.xlu0 %v1212_v7, %s923_s5  ;;  %v339_v28 = vadd.f32 %v1254_v21, %v316_v62 }
  0x9a   : > { %v338_v29 = vadd.f32 %v1254_v21, %v315_v63 }
  0x9d   : > { %396 = vrot.lane.b32.xlu1 %v1217_v8, %s923_s5  ;;  %394 = vrot.lane.b32.xlu0 %v1220_v9, %s923_s5 }
  0xa1   : > { %400 = vrot.lane.b32.xlu1 %v1225_v10, %s923_s5  ;;  %398 = vrot.lane.b32.xlu0 %v1228_v11, %s923_s5 }
  0xa5   : > { %404 = vrot.lane.b32.xlu1 %v1233_v12, %s923_s5  ;;  %402 = vrot.lane.b32.xlu0 %v1236_v13, %s923_s5 }
  0xa9   : > { %408 = vrot.lane.b32.xlu1 %v1241_v14, %s923_s5  ;;  %406 = vrot.lane.b32.xlu0 %v1244_v15, %s923_s5 }
  0xff   : > { %v383_v30 = vpop.permute.xlu1 %382  ;;  %v379_v31 = vpop.permute.xlu0 %378 }
 0x100   : > { %v429_v32 = vsel %vm426_vm0, %v348_v0, %v383_v30  ;;  %v427_v33 = vsel %vm426_vm0, %v346_v1, %v379_v31  ;;  %v296_v30 = vld [vmem:[%s1178_s12 + $0x60] sm:$0xff] }
 0x101   : > { %v445_v36 = vadd.f32 %v429_v32, %v332_v24  ;;  %v443_v37 = vadd.f32 %v427_v33, %v330_v25  ;;  %v317_v25 = vmul.f32 %v1249_v17, %v294_v16 }
 0x103   : > { %v461_v42 = vmax.f32 %v445_v36, 0.0  ;;  %v459_v43 = vmax.f32 %v443_v37, 0.0  ;;  %v385_v44 = vpop.permute.xlu1 %384  ;;  %v381_v45 = vpop.permute.xlu0 %380  ;;  %v319_v37 = vmul.f32 %v1249_v17, %v296_v30  ;;  %v340_v41 = vadd.f32 %v1254_v21, %v317_v25 }
 0x104   : > { %v430_v46 = vsel %vm426_vm0, %v349_v2, %v385_v44  ;;  %v428_v47 = vsel %vm426_vm0, %v347_v3, %v381_v45  ;;  %v337_v2 = vadd.f32 %v1254_v21, %v314_v52  ;;  %v336_v3 = vadd.f32 %v1254_v21, %v313_v53 }
 0x105   : > { %478 = vst.msk [vmem:[%s1277_s26 + $0x10] sm:$0xff] %vm475_vm1, %v461_v42  ;;  %476 = vst.msk [vmem:[%s1277_s26] sm:$0xff] %vm475_vm1, %v459_v43  ;;  %v446_v50 = vadd.f32 %v430_v46, %v333_v38  ;;  %v444_v51 = vadd.f32 %v428_v47, %v331_v39  ;;  %v298_v42 = vld [vmem:[%s1178_s12 + $0x70] sm:$0xff] }
 0x106   : > { %v321_v53 = vmul.f32 %v1249_v17, %v298_v42 }
 0x107   : > { %v462_v56 = vmax.f32 %v446_v50, 0.0  ;;  %v460_v57 = vmax.f32 %v444_v51, 0.0  ;;  %v389_v58 = vpop.permute.xlu1 %388  ;;  %v387_v59 = vpop.permute.xlu0 %386 }
 0x108   : > { %v432_v60 = vsel %vm426_vm0, %v1201_v4, %v389_v58  ;;  %v431_v61 = vsel %vm426_vm0, %v1204_v5, %v387_v59  ;;  %v295_v4 = vld [vmem:[%s1178_s12 + $0x58] sm:$0xff] }
 0x109   : > { %479 = vst.msk [vmem:[%s1277_s26 + $0x18] sm:$0xff] %vm475_vm1, %v462_v56  ;;  %477 = vst.msk [vmem:[%s1277_s26 + $0x8] sm:$0xff] %vm475_vm1, %v460_v57  ;;  %v448_v0 = vadd.f32 %v432_v60, %v335_v48  ;;  %v447_v1 = vadd.f32 %v431_v61, %v334_v49  ;;  %v318_v24 = vmul.f32 %v1249_v17, %v295_v4 }
 0x10a   : > { %v342_v49 = vadd.f32 %v1254_v21, %v319_v37  ;;  %v344_v60 = vadd.f32 %v1254_v21, %v321_v53 }
 0x10b   : > { %v464_v5 = vmax.f32 %v448_v0, 0.0  ;;  %v463_v18 = vmax.f32 %v447_v1, 0.0  ;;  %v393_v19 = vpop.permute.xlu1 %392  ;;  %v391_v20 = vpop.permute.xlu0 %390  ;;  %v341_v40 = vadd.f32 %v1254_v21, %v318_v24 }
 0x10c   : > { %v434_v22 = vsel %vm426_vm0, %v1209_v6, %v393_v19  ;;  %v433_v23 = vsel %vm426_vm0, %v1212_v7, %v391_v20  ;;  %v297_v6 = vld [vmem:[%s1178_s12 + $0x68] sm:$0xff] }
 0x10d   : > { %481 = vst.msk [vmem:[%s1277_s26 + $0x28] sm:$0xff] %vm475_vm1, %v464_v5  ;;  %480 = vst.msk [vmem:[%s1277_s26 + $0x20] sm:$0xff] %vm475_vm1, %v463_v18  ;;  %v450_v26 = vadd.f32 %v434_v22, %v337_v2  ;;  %v449_v27 = vadd.f32 %v433_v23, %v336_v3  ;;  %v320_v36 = vmul.f32 %v1249_v17, %v297_v6 }
 0x10f   : > { %v466_v7 = vmax.f32 %v450_v26, 0.0  ;;  %v465_v31 = vmax.f32 %v449_v27, 0.0  ;;  %v397_v32 = vpop.permute.xlu1 %396  ;;  %v395_v33 = vpop.permute.xlu0 %394  ;;  %v343_v48 = vadd.f32 %v1254_v21, %v320_v36 }
 0x110   : > { %v436_v34 = vsel %vm426_vm0, %v1217_v8, %v397_v32  ;;  %v435_v35 = vsel %vm426_vm0, %v1220_v9, %v395_v33  ;;  %v299_v8 = vld [vmem:[%s1178_s12 + $0x78] sm:$0xff] }
 0x111   : > { %483 = vst.msk [vmem:[%s1277_s26 + $0x38] sm:$0xff] %vm475_vm1, %v466_v7  ;;  %482 = vst.msk [vmem:[%s1277_s26 + $0x30] sm:$0xff] %vm475_vm1, %v465_v31  ;;  %v452_v38 = vadd.f32 %v436_v34, %v339_v28  ;;  %v451_v39 = vadd.f32 %v435_v35, %v338_v29  ;;  %v322_v52 = vmul.f32 %v1249_v17, %v299_v8 }
 0x113   : > { %v468_v43 = vmax.f32 %v452_v38, 0.0  ;;  %v467_v9 = vmax.f32 %v451_v39, 0.0  ;;  %v401_v44 = vpop.permute.xlu1 %400  ;;  %v399_v45 = vpop.permute.xlu0 %398  ;;  %v345_v59 = vadd.f32 %v1254_v21, %v322_v52 }
 0x114   : > { %v438_v46 = vsel %vm426_vm0, %v1225_v10, %v401_v44  ;;  %v437_v47 = vsel %vm426_vm0, %v1228_v11, %v399_v45 }
 0x115   : > { %485 = vst.msk [vmem:[%s1277_s26 + $0x48] sm:$0xff] %vm475_vm1, %v468_v43  ;;  %484 = vst.msk [vmem:[%s1277_s26 + $0x40] sm:$0xff] %vm475_vm1, %v467_v9  ;;  %v454_v50 = vadd.f32 %v438_v46, %v341_v40  ;;  %v453_v51 = vadd.f32 %v437_v47, %v340_v41 }
 0x117   : > { %v470_v10 = vmax.f32 %v454_v50, 0.0  ;;  %v469_v54 = vmax.f32 %v453_v51, 0.0  ;;  %v405_v11 = vpop.permute.xlu1 %404  ;;  %v403_v55 = vpop.permute.xlu0 %402 }
 0x118   : > { %v440_v56 = vsel %vm426_vm0, %v1233_v12, %v405_v11  ;;  %v439_v57 = vsel %vm426_vm0, %v1236_v13, %v403_v55 }
 0x119   : > { %487 = vst.msk [vmem:[%s1277_s26 + $0x58] sm:$0xff] %vm475_vm1, %v470_v10  ;;  %486 = vst.msk [vmem:[%s1277_s26 + $0x50] sm:$0xff] %vm475_vm1, %v469_v54  ;;  %v456_v58 = vadd.f32 %v440_v56, %v343_v48  ;;  %v455_v17 = vadd.f32 %v439_v57, %v342_v49 }
 0x11b   : > { %v472_v61 = vmax.f32 %v456_v58, 0.0  ;;  %v471_v62 = vmax.f32 %v455_v17, 0.0  ;;  %v409_v12 = vpop.permute.xlu1 %408  ;;  %v407_v63 = vpop.permute.xlu0 %406 }
 0x11c   : > { %v442_v13 = vsel %vm426_vm0, %v1241_v14, %v409_v12  ;;  %v441_v0 = vsel %vm426_vm0, %v1244_v15, %v407_v63 }
 0x11d   : > { %489 = vst.msk [vmem:[%s1277_s26 + $0x68] sm:$0xff] %vm475_vm1, %v472_v61  ;;  %488 = vst.msk [vmem:[%s1277_s26 + $0x60] sm:$0xff] %vm475_vm1, %v471_v62  ;;  %v458_v21 = vadd.f32 %v442_v13, %v345_v59  ;;  %v457_v1 = vadd.f32 %v441_v0, %v344_v60 }
 0x11f   : > { %v474_v14 = vmax.f32 %v458_v21, 0.0  ;;  %v473_v2 = vmax.f32 %v457_v1, 0.0 }
 0x121   : > { %491 = vst.msk [vmem:[%s1277_s26 + $0x78] sm:$0xff] %vm475_vm1, %v474_v14  ;;  %490 = vst.msk [vmem:[%s1277_s26 + $0x70] sm:$0xff] %vm475_vm1, %v473_v2 }
 0x122   : > { %854 = shalt.err (!%p851_p3)
}
 0x123   : > { %s855_s20 = scalar_lea.hbm %s1364_s23, 2048  ;;  %s859_s12 = scalar_lea.hbm %s1417_s4, 8192 }
 0x124   : > { %p856_p5 = scmp.ne.s32.totalorder %s1364_s23, %s855_s20  ;;  %p860_p7 = scmp.lt.u32.totalorder %s1364_s23, %s1417_s4 }
 0x125   : > { %p861_p8 = scmp.lt.u32.totalorder %s859_s12, %s855_s20  ;;  %p863_p1 = scmp.lt.u32.totalorder %s855_s20, %s1364_s23 }
 0x126   : > { %p857_p9 = pnand %p856_p5, %p1437_p2 }
 0x127   : > { %p862_p10 = por %p861_p8, %p860_p7 }
 0x128   : > { %p858_p4 = pneg %p857_p9 }
 0x129   : > { %p864_p0 = por %p863_p1, %p862_p10 }
 0x12b   : > { %p865_p6 = pnand %p864_p0, %p858_p4 }
 0x12d   : > { %868 = shalt.err (!%p865_p6)
}
 0x12e   : > { %s925_s5 = smov 128   ;;  %s926_s26 = smov 8  }
 0x12f   : > { %660 = dma.vmem_to_hbm [thread:$0]  (%p1437_p2), %s1366_s14, 2048, %s1364_s23, %s493_s19, %s925_s5, %s925_s5, %s926_s26  }
 0x130 PF: > { %p685_p12 = scmp.ge.s32.totalorder %s915_s18, 2  ;;  %s521_s30 = sand.u32 1, %s903_s15  }
 0x131   : > { %p1438_p13 = scmp.ne.s32.totalorder %s1427_s28, 0  ;;  %s522_s9 = scalar_lea.sflag [#allocation4], %s521_s30 }
 0x133   : > { %p677_p11 = pnand %p685_p12, %p1438_p13 }
 0x135   : > { %898 = dma.done.wait (!%p677_p11), %s522_s9, 2048  }
 0x136   : > { %900 = vsyncadd (!%p677_p11), %s522_s9, 4294965248  ;;  %p21_p3 = scmp.ge.s32.totalorder %s977_s21, 6   ;;  %s1439_s15 = smov %s907_s16 }
 0x137   : > { %s1440_s16 = smov %s911_s17  ;;  %s1441_s17 = smov %s989_s24 }
 0x138   : > { %s1442_s18 = smov %s977_s21  ;;  %23 = sbr.rel (!%p21_p3) target bundleno = 10 (0xa), region = 102 }
 0x13f   :  { %527 = vsyncpa [#allocation3], 1 }
 0x140   :  { %529 = vsyncpa [#allocation3 + $0x1], 1 }
 0x141   :  { %530 = vsyncpa [#allocation6], 1 }
 0x142   :  { %531 = vsyncpa [#allocation9], 1 }
 0x143   :  { %533 = vsyncpa [#allocation9 + $0x1], 1 }
 0x144   :  { %534 = vsyncpa [#allocation4], 1 }
 0x145   :  { %536 = vsyncpa [#allocation4 + $0x1], 1 }

// kernel: _lambda_.6
= control target key start
LH: loop header
LB: loop body
LE: loop exit
PB: predicated region body
PF: predicated region fallthrough
CT: control target
= control target key end

     0   :  { %s2146_s0 = inlined_call_operand.hbm [shape: f32[512,8], index: 0, kind: input, shape index: {}]   ;;  %s2147_s1 = inlined_call_operand.hbm [shape: f32[1,8], index: 1, kind: input, shape index: {}]   ;;  %s2148_s2 = inlined_call_operand.hbm [shape: f32[1,8], index: 2, kind: input, shape index: {}]   ;;  %s2149_s3 = inlined_call_operand.hbm [shape: f32[8,8], index: 3, kind: input, shape index: {}]   ;;  %s2150_s4 = inlined_call_operand.hbm [shape: f32[512,8], index: 4, kind: output, shape index: {0}]   ;;  %s2151_s5 = inlined_call_operand.hbm [shape: f32[2,1,8], index: 5, kind: output, shape index: {1}]   ;;  %s2152_s6 = inlined_call_operand.hbm [shape: f32[2,1,8], index: 6, kind: output, shape index: {2}]  }
   0x1   :  { %2170 = sst [smem:[#allocation26_spill]] %s2147_s1 }
   0x2   :  { %2171 = sst [smem:[#allocation27_spill]] %s2148_s2 }
   0x3   :  { %2172 = sst [smem:[#allocation28_spill]] %s2149_s3 }
   0x4   :  { %2173 = sst [smem:[#allocation29_spill]] %s2151_s5 }
   0x5   :  { %2174 = sst [smem:[#allocation30_spill]] %s2152_s6 }
   0x6   :  { %12 = vsyncpa [#allocation3], 0 }
   0x7   :  { %14 = vsyncpa [#allocation3 + $0x1], 0 }
   0x8   :  { %15 = vsyncpa [#allocation6], 0 }
   0x9   :  { %16 = vsyncpa [#allocation9], 0 }
   0xa   :  { %17 = vsyncpa [#allocation4], 0 }
   0xb   :  { %19 = vsyncpa [#allocation4 + $0x1], 0 }
   0xc   :  { %20 = vsyncpa [#allocation12], 0 }
   0xd   :  { %22 = vsyncpa [#allocation12 + $0x1], 0  ;;  %s1561_s21 = smov 0   ;;  %s1563_s22 = smov 0  }
   0xe   :  { %s1565_s23 = smov 0   ;;  %s1567_s24 = smov 0  }
   0xf   :  { %s1569_s25 = smov 0   ;;  %s1571_s26 = smov 0  }
  0x10   :  { %s1573_s27 = smov 0   ;;  %s1575_s28 = smov 0  }
  0x11   :  { %s1577_s29 = smov 0   ;;  %s1579_s30 = smov 0  }
  0x12   :  { %s1581_s7 = smov 0  }
  0x13 LB: > { %2175 = sst [smem:[#allocation19_spill]] %s1484_s24  ;;  %s1615_s8 = sadd.s32 4294967295, %s1512_s7   ;;  %s1512_s7 = sphi %s1581_s7, %s28_s7   ;;  %s1508_s30 = sphi %s1579_s30, %s2224_s30   ;;  %s1504_s29 = sphi %s1577_s29, %s2223_s29   ;;  %s1500_s28 = sphi %s1575_s28, %s2222_s28   ;;  %s1496_s27 = sphi %s1573_s27, %s2214_s27   ;;  %s1492_s26 = sphi %s1571_s26, %s2221_s26   ;;  %s1488_s25 = sphi %s1569_s25, %s2220_s25   ;;  %s1484_s24 = sphi %s1567_s24, %s2219_s24   ;;  %s1480_s23 = sphi %s1565_s23, %s2218_s23   ;;  %s1476_s22 = sphi %s1563_s22, %s2217_s22   ;;  %s1472_s21 = sphi %s1561_s21, %s2216_s21  }
  0x14   : > { %2176 = sst [smem:[#allocation20_spill]] %s1504_s29  ;;  %s2153_s9 = sadd.s32 4294967294, %s1512_s7  }
  0x15   : > { %p64_p0 = scmp.ne.s32.totalorder %s1488_s25, %s1484_s24  ;;  %p2158_p1 = scmp.eq.s32.totalorder %s1615_s8, 0 }
  0x16   : > { %p2159_p2 = scmp.eq.s32.totalorder %s1615_s8, 3  ;;  %p161_p3 = scmp.eq.s32.totalorder %s2153_s9, 3 }
  0x17   : > { %p1626_p4 = por %p2158_p1, %p64_p0  ;;  %p180_p6 = scmp.ne.s32.totalorder %s1480_s23, %s1476_s22 }
  0x18   : > { %p1631_p5 = por %p161_p3, %p64_p0  ;;  %p186_p7 = scmp.ne.s32.totalorder %s1476_s22, %s1472_s21 }
  0x19   : > { %s2177_s10 = scalar_select %p1626_p4, 1, 0 }
  0x1a   : > { %s2178_s12 = scalar_select %p1631_p5, 1, 0 }
  0x1b   : > { %p971_p8 = scmp.ge.s32.totalorder %s1512_s7, 1  ;;  %p1641_p9 = por %p180_p6, %p2159_p2 }
  0x1c   : > { %2179 = sst [smem:[#allocation21_spill]] %s2178_s12  ;;  %p220_p10 = scmp.lt.s32.totalorder %s1512_s7, 5 }
  0x1d   : > { %s2180_s13 = scalar_select %p1641_p9, 1, 0 }
  0x1e   : > { %p1646_p11 = por %p186_p7, %p161_p3  ;;  %p1650_p12 = pnand %p971_p8, %p220_p10 }
  0x1f   : > { %2181 = sst [smem:[#allocation22_spill]] %s2180_s13  ;;  %s1514_s16 = smov [#allocation5]  }
  0x20   : > { %s2182_s14 = scalar_select %p1646_p11, 1, 0 }
  0x21   : > { %s2184_s15 = scalar_select %p1650_p12, 1, 0 }
  0x22   : > { %2183 = sst [smem:[#allocation23_spill]] %s2182_s14  ;;  %s233_s17 = sshll.u32 %s1514_s16, 4  ;;  %s234_s17 = int_to_ptr.vmem [resolvable:$true] %s233_s17 }
  0x23   : > { %p1080_p13 = pneg %p1650_p12  ;;  %s1515_s19 = smov [#allocation7]  }
  0x24   : > { %s244_s20 = sshll.u32 %s1515_s19, 4  ;;  %s1516_s21 = smov [#allocation8]   ;;  %s1662_s20 = int_to_ptr.vmem [resolvable:$true] %s244_s20 }
  0x25   : > { %p1658_p0 = pnand %p1080_p13, %p2158_p1  ;;  %s255_s9 = sshll.u32 %s1516_s21, 4  ;;  %s1664_s9 = int_to_ptr.vmem [resolvable:$true] %s255_s9 }
  0x26   : > { %s2186_s1 = sld [smem:[#allocation26_spill]] }
  0x27   : > { %p1674_p6 = pneg %p1658_p0 }
  0x2c   : > { %s1208_s16 = scalar_lea.hbm %s2186_s1, 16 }
  0x2d   : > { %p1209_p3 = scmp.ne.s32.totalorder %s2186_s1, %s1208_s16  ;;  %p1215_p10 = scmp.lt.u32.totalorder %s1208_s16, %s2186_s1 }
  0x2f   : > { %p1211_p7 = pnand %p1674_p6, %p1209_p3 }
  0x31   : > { %p1212_p8 = pneg %p1211_p7 }
  0x33   : > { %p1217_p13 = pnand %p1215_p10, %p1212_p8 }
  0x35   : > { %1220 = shalt.err (!%p1217_p13)
}
  0x36   : > { %s1221_s11 = scalar_lea.vmem %s234_s17, 16  ;;  %s1228_s24 = scalar_lea.vmem %s234_s17, 32 }
  0x37   : > { %p1222_p1 = scmp.ne.s32.totalorder %s234_s17, %s1221_s11  ;;  %p1229_p5 = scmp.lt.s32.totalorder %s234_s17, %s234_s17 }
  0x38   : > { %p1230_p9 = scmp.lt.s32.totalorder %s1228_s24, %s1221_s11 }
  0x39   : > { %p1224_p2 = pnand %p1222_p1, %p1674_p6 }
  0x3a   : > { %p1231_p4 = por %p1230_p9, %p1229_p5 }
  0x3b   : > { %p1225_p11 = pneg %p1224_p2 }
  0x3d   : > { %p1232_p12 = pnand %p1231_p4, %p1225_p11 }
  0x3f   : > { %1235 = shalt.err (!%p1232_p12)
}
  0x40   : > { %1083 = dma.hbm_to_vmem [thread:$0]  (!%p1658_p0), %s2186_s1, 16, %s234_s17, [#allocation6]  }
  0x41   : > { %s2188_s2 = sld [smem:[#allocation27_spill]] }
  0x47   : > { %s1236_s21 = scalar_lea.hbm %s2188_s2, 16 }
  0x48   : > { %p1237_p1 = scmp.ne.s32.totalorder %s2188_s2, %s1236_s21  ;;  %p1243_p4 = scmp.lt.u32.totalorder %s1236_s21, %s2188_s2 }
  0x4a   : > { %p1239_p2 = pnand %p1237_p1, %p1674_p6 }
  0x4c   : > { %p1240_p5 = pneg %p1239_p2 }
  0x4e   : > { %p1245_p9 = pnand %p1243_p4, %p1240_p5 }
  0x50   : > { %1248 = shalt.err (!%p1245_p9)
}
  0x51   : > { %s1249_s17 = scalar_lea.vmem %s1662_s20, 16  ;;  %s1256_s5 = scalar_lea.vmem %s1662_s20, 32 }
  0x52   : > { %p1250_p11 = scmp.ne.s32.totalorder %s1662_s20, %s1249_s17  ;;  %p1257_p7 = scmp.lt.s32.totalorder %s1662_s20, %s1662_s20 }
  0x53   : > { %p1258_p8 = scmp.lt.s32.totalorder %s1256_s5, %s1249_s17 }
  0x54   : > { %p1252_p12 = pnand %p1250_p11, %p1674_p6 }
  0x55   : > { %p1259_p10 = por %p1258_p8, %p1257_p7 }
  0x56   : > { %p1253_p3 = pneg %p1252_p12 }
  0x58   : > { %p1260_p13 = pnand %p1259_p10, %p1253_p3 }
  0x5a   : > { %1263 = shalt.err (!%p1260_p13)
}
  0x5b   : > { %1086 = dma.hbm_to_vmem [thread:$0]  (!%p1658_p0), %s2188_s2, 16, %s1662_s20, [#allocation6]  }
  0x5c   : > { %s2189_s3 = sld [smem:[#allocation28_spill]] }
  0x62   : > { %s1264_s19 = scalar_lea.hbm %s2189_s3, 128 }
  0x63   : > { %p1265_p1 = scmp.ne.s32.totalorder %s2189_s3, %s1264_s19  ;;  %p1271_p4 = scmp.lt.u32.totalorder %s1264_s19, %s2189_s3 }
  0x65   : > { %p1267_p2 = pnand %p1265_p1, %p1674_p6 }
  0x67   : > { %p1268_p5 = pneg %p1267_p2 }
  0x69   : > { %p1273_p9 = pnand %p1271_p4, %p1268_p5 }
  0x6b   : > { %1276 = shalt.err (!%p1273_p9)
}
  0x6c   : > { %s1277_s20 = scalar_lea.vmem %s1664_s9, 128  ;;  %p1285_p7 = scmp.lt.s32.totalorder %s1664_s9, %s1664_s9 }
  0x6d   : > { %p1278_p11 = scmp.ne.s32.totalorder %s1664_s9, %s1277_s20  ;;  %p1286_p8 = scmp.lt.s32.totalorder %s1277_s20, %s1277_s20 }
  0x6f   : > { %p1280_p12 = pnand %p1278_p11, %p1674_p6  ;;  %p1287_p10 = por %p1286_p8, %p1285_p7 }
  0x71   : > { %p1281_p3 = pneg %p1280_p12 }
  0x73   : > { %p1288_p13 = pnand %p1287_p10, %p1281_p3 }
  0x75   : > { %1291 = shalt.err (!%p1288_p13)
}
  0x76   : > { %1089 = dma.hbm_to_vmem [thread:$0]  (!%p1658_p0), %s2189_s3, 128, %s1664_s9, [#allocation9]  }
  0x77   : > { %s37_s6 = sadd.s32 1, %s1504_s29  ;;  %s40_s12 = sadd.s32 1, %s1508_s30 }
  0x78   : > { %p38_p6 = scmp.ge.s32.totalorder %s37_s6, 2  ;;  %s967_s18 = sshll.u32 %s1508_s30, 1 }
  0x79   : > { %s45_s14 = sadd.s32 %s1504_s29, %s967_s18  ;;  %s51_s16 = sadd.s32 1, %s1492_s26 }
  0x7a   : > { %s2226_s6 = smov (%p38_p6, %s37_s6), 0  ;;  %s2228_s12 = smov (!%p38_p6, %s40_s12), %s1508_s30 }
  0x7b   : > { %p58_p1 = scmp.ne.s32.totalorder %s1492_s26, %s1488_s25  ;;  %p59_p2 = scmp.eq.s32.totalorder %s1512_s7, 0 }
  0x7c   : > { %p42_p5 = scmp.ge.s32.totalorder %s2228_s12, 2  ;;  %p1107_p4 = scmp.lt.s32.totalorder %s1512_s7, 4 }
  0x7d   : > { %p1749_p0 = por %p59_p2, %p58_p1  ;;  %p2191_p9 = scmp.eq.s32.totalorder %s1615_s8, 3 }
  0x7e   : > { %s2230_s12 = smov (%p42_p5, %s2228_s12), 0  ;;  %s266_s21 = sand.u32 1, %s1492_s26  }
  0x7f   : > { %p1755_p11 = por %p2191_p9, %p58_p1  ;;  %2194 = sst [smem:[#allocation25_spill]] %s2230_s12 }
  0x80   : > { %s1013_s11 = sshll.u32 %s45_s14, 11  ;;  %s968_s24 = sshll.u32 %s2230_s12, 1 }
  0x81   : > { %s2192_s19 = scalar_select %p1755_p11, 1, 0 }
  0x82   : > { %s167_s17 = ssub.s32 %s1508_s30, %s2230_s12  ;;  %s47_s20 = sadd.s32 %s968_s24, %s2226_s6 }
  0x83   : > { %2193 = sst [smem:[#allocation24_spill]] %s2192_s19  ;;  %p168_p12 = scmp.eq.s32.totalorder %s167_s17, 0 }
  0x84   : > { %s48_s5 = ssub.s32 %s45_s14, %s47_s20  ;;  %s976_s13 = sshll.u32 %s266_s21, 7 }
  0x85   : > { %p49_p3 = scmp.eq.s32.totalorder %s48_s5, 0  ;;  %s2195_s18 = sadd.s32 1, %s1480_s23 }
  0x86   : > { %s1769_s1 = scalar_select %p168_p12, %s1480_s23, %s2195_s18  }
  0x87   : > { %s1772_s2 = scalar_select %p49_p3, %s1492_s26, %s51_s16  }
  0x88   : > { %s1777_s19 = scalar_lea.hbm %s2146_s0, %s1013_s11  ;;  %s270_s12 = scalar_lea.vmem [#allocation2], %s976_s13 }
  0x89   : > { %s279_s24 = sshll.u32 %s270_s12, 4  ;;  %p1783_p7 = pnand %p1107_p4, %p1749_p0  ;;  %s1787_s24 = int_to_ptr.vmem [resolvable:$true] %s279_s24 }
  0x8a   : > { %s1789_s16 = scalar_lea.sflag [#allocation3], %s266_s21  ;;  %s1292_s3 = scalar_lea.hbm %s1777_s19, 2048 }
  0x8b   : > { %p1293_p8 = scmp.ne.s32.totalorder %s1777_s19, %s1292_s3  ;;  %p1294_p10 = pneg %p1783_p7 }
  0x8c   : > { %s1297_s9 = scalar_lea.hbm %s2146_s0, 8192  ;;  %p1298_p1 = scmp.lt.u32.totalorder %s1777_s19, %s2146_s0 }
  0x8d   : > { %p1295_p13 = pnand %p1294_p10, %p1293_p8  ;;  %p1299_p2 = scmp.lt.u32.totalorder %s1297_s9, %s1292_s3 }
  0x8e   : > { %p1301_p4 = scmp.lt.u32.totalorder %s1292_s3, %s1777_s19 }
  0x8f   : > { %p1296_p6 = pneg %p1295_p13  ;;  %p1300_p5 = por %p1299_p2, %p1298_p1 }
  0x91   : > { %p1302_p0 = por %p1301_p4, %p1300_p5 }
  0x93   : > { %p1303_p9 = pnand %p1302_p0, %p1296_p6 }
  0x95   : > { %1306 = shalt.err (!%p1303_p9)
}
  0x96   : > { %s1307_s21 = scalar_lea.vmem %s1787_s24, 2048  ;;  %s1517_s20 = smov [#allocation2]  }
  0x97   : > { %p1308_p12 = scmp.ne.s32.totalorder %s1787_s24, %s1307_s21  ;;  %s1312_s5 = sshll.u32 %s1517_s20, 4  ;;  %s1313_s5 = int_to_ptr.vmem [resolvable:$false] %s1312_s5 }
  0x98   : > { %s1314_s13 = scalar_lea.vmem %s1313_s5, 4096  ;;  %p1315_p13 = scmp.lt.s32.totalorder %s1787_s24, %s1313_s5 }
  0x99   : > { %p1310_p3 = pnand %p1308_p12, %p1294_p10  ;;  %p1316_p1 = scmp.lt.s32.totalorder %s1314_s13, %s1307_s21 }
  0x9b   : > { %p1311_p8 = pneg %p1310_p3  ;;  %p1317_p2 = por %p1316_p1, %p1315_p13 }
  0x9d   : > { %p1318_p5 = pnand %p1317_p2, %p1311_p8 }
  0x9f   : > { %1321 = shalt.err (!%p1318_p5)
}
  0xa0   : > { %s1518_s18 = smov 128   ;;  %s1519_s3 = smov 8  }
  0xa1   : > { %1093 = dma.hbm_to_vmem [thread:$0]  (!%p1783_p7), %s1777_s19, 2048, %s1787_s24, %s1789_s16, %s1518_s18, %s1518_s18, %s1519_s3  }
  0xa2   : > { %p2197_p10 = scmp.ne.s32.totalorder %s2184_s15, 0 }
  0xa3   : > { %s1820_s29 = sand.u32 (!%p2197_p10), 1, %s1488_s25   ;;  %p2198_p6 = scmp.ne.s32.totalorder (!%p2197_p10), %s2177_s10, 0 }
  0xa4   : > { %291 = sbr.rel (%p2197_p10) target bundleno = 507 (0x1fb), region = 36  ;;  %s981_s12 = sshll.u32 (!%p2197_p10), %s1820_s29, 7 }
  0xa5   : > { %s294_s9 = scalar_lea.sflag (!%p2197_p10), [#allocation3], %s1820_s29  ;;  %s1824_s11 = scalar_lea.vmem (!%p2197_p10), [#allocation2], %s981_s12 }
  0xab   : > { %1451 = dma.done.wait (%p2198_p6), %s294_s9, 2048  }
  0xac   : > { %1453 = vsyncadd (%p2198_p6), %s294_s9, 4294965248  ;;  %p2199_p7 = scmp.eq.s32.totalorder %s1615_s8, 0 }
  0xae   : > { %1455 = dma.done.wait (%p2199_p7), [#allocation6], 32   ;;  %p2200_p4 = pmov %p2199_p7 }
  0xb0   : > { %1457 = vsyncadd (%p2200_p4), [#allocation6], 4294967264  ;;  %p2201_p0 = pmov %p2200_p4 }
  0xb2   : > { %1459 = dma.done.wait (%p2201_p0), [#allocation9], 128   ;;  %p2202_p9 = pmov %p2201_p0 }
  0xb3   : > { %s338_s15 = sand.u32 1, %s1476_s22   ;;  %s1839_s19 = scalar_lea.vmem [#allocation10], %s981_s12 }
  0xb4   : > { %1461 = vsyncadd (%p2202_p9), [#allocation9], 4294967168  ;;  %s1841_s24 = scalar_lea.vmem [#allocation11], %s338_s15  ;;  %s1843_s10 = scalar_lea.vmem [#allocation13], %s338_s15 }
  0xb5   : > { %p986_p12 = scmp.ne.s32.totalorder %s1496_s27, 0 }
  0xb6   : > { %vm356_vm0 = vcmask (!%p986_p12), 57344   ;;  %v1520_v0 = vmov (!%p986_p12), 0.0  }
  0xb7   : > { %355 = sbr.rel (%p986_p12) target bundleno = 190 (0xbe), region = 56  ;;  %357 = vst.msk [vmem:[%s1841_s24] sm:$0x1] (!%p986_p12), %vm356_vm0, %v1520_v0  ;;  %358 = vst.msk [vmem:[%s1843_s10] sm:$0x1] (!%p986_p12), %vm356_vm0, %v1520_v0 }
  0xbe PF: > { %v437_v1 = vld [vmem:[#allocation8] sm:$0xff]  ;;  %v1849_v3 = vld [vmem:[#allocation5] ss:$0 sm:$0xff]  ;;  %v1852_v5 = vld [vmem:[#allocation7] ss:$0 sm:$0xff]  ;;  %vm438_vm1 = vcmask 64512  }
  0xbf   : > { %v359_v2 = vld [vmem:[%s1824_s11] sm:$0xff]  ;;  %1032 = vmatprep.subr.mxu0 %v437_v1  ;;  %v360_v6 = vld [vmem:[%s1824_s11 + $0x8] sm:$0xff]  ;;  %v361_v7 = vld [vmem:[%s1824_s11 + $0x10] sm:$0xff]  ;;  %1058 = vmatprep.subr.mxu1 %v437_v1  ;;  %s1006_s14 = sshll.u32 %s1500_s28, 1  ;;  %s769_s17 = sshll.u32 %s1839_s19, 4  ;;  %s1977_s17 = int_to_ptr.vmem [resolvable:$true] %s769_s17 }
  0xc0   : > { %v382_v4 = vmul.f32 %v1849_v3, %v359_v2  ;;  %1033 = vmatpush3.msra.mxu0 %v437_v1  ;;  %v383_v8 = vmul.f32 %v1849_v3, %v360_v6  ;;  %v384_v9 = vmul.f32 %v1849_v3, %v361_v7  ;;  %v362_v10 = vld [vmem:[%s1824_s11 + $0x18] sm:$0xff]  ;;  %v363_v11 = vld [vmem:[%s1824_s11 + $0x20] sm:$0xff]  ;;  %v364_v12 = vld [vmem:[%s1824_s11 + $0x28] sm:$0xff]  ;;  %1059 = vmatpush3.msra.mxu1 %v437_v1  ;;  %s1948_s16 = sadd.s32 %s1496_s27, %s1006_s14  ;;  %s746_s18 = scalar_lea.sflag [#allocation4], %s1820_s29 }
  0xc1   : > { %v385_v14 = vmul.f32 %v1849_v3, %v362_v10  ;;  %v386_v15 = vmul.f32 %v1849_v3, %v363_v11  ;;  %v387_v16 = vmul.f32 %v1849_v3, %v364_v12  ;;  %v365_v17 = vld [vmem:[%s1824_s11 + $0x30] sm:$0xff]  ;;  %v366_v21 = vld [vmem:[%s1824_s11 + $0x38] sm:$0xff]  ;;  %v367_v22 = vld [vmem:[%s1824_s11 + $0x40] sm:$0xff]  ;;  %s1014_s27 = sshll.u32 %s1948_s16, 11  ;;  %s1322_s3 = scalar_lea.vmem %s1977_s17, 2048 }
  0xc2   : > { %v405_v13 = vadd.f32 %v1852_v5, %v382_v4  ;;  %v406_v18 = vadd.f32 %v1852_v5, %v383_v8  ;;  %v407_v19 = vadd.f32 %v1852_v5, %v384_v9  ;;  %v388_v20 = vmul.f32 %v1849_v3, %v365_v17  ;;  %v368_v26 = vld [vmem:[%s1824_s11 + $0x48] sm:$0xff]  ;;  %v369_v27 = vld [vmem:[%s1824_s11 + $0x50] sm:$0xff]  ;;  %v370_v30 = vld [vmem:[%s1824_s11 + $0x58] sm:$0xff]  ;;  %s1975_s5 = scalar_lea.hbm %s2150_s4, %s1014_s27  ;;  %p1323_p3 = scmp.ne.s32.totalorder %s1977_s17, %s1322_s3 }
  0xc3   : > { %v408_v24 = vadd.f32 %v1852_v5, %v385_v14  ;;  %v409_v25 = vadd.f32 %v1852_v5, %v386_v15  ;;  %v371_v31 = vld [vmem:[%s1824_s11 + $0x60] sm:$0xff]  ;;  %v410_v32 = vadd.f32 %v1852_v5, %v387_v16  ;;  %v389_v33 = vmul.f32 %v1849_v3, %v366_v21  ;;  %v372_v35 = vld [vmem:[%s1824_s11 + $0x68] sm:$0xff]  ;;  %v373_v40 = vld [vmem:[%s1824_s11 + $0x70] sm:$0xff]  ;;  %s1521_s12 = smov [#allocation10]  }
  0xc4   : > { %v421_v23 = vmax.f32 %v405_v13, 0.0  ;;  %v422_v28 = vmax.f32 %v406_v18, 0.0  ;;  %v423_v29 = vmax.f32 %v407_v19, 0.0  ;;  %v390_v34 = vmul.f32 %v1849_v3, %v367_v22  ;;  %v374_v52 = vld [vmem:[%s1824_s11 + $0x78] sm:$0xff]  ;;  %p1324_p8 = pnand %p1323_p3, %p1755_p11  ;;  %s1326_s9 = sshll.u32 %s1521_s12, 4  ;;  %s1327_s9 = int_to_ptr.vmem [resolvable:$false] %s1326_s9 }
  0xc5   : > { %v424_v36 = vmax.f32 %v408_v24, 0.0  ;;  %v411_v37 = vadd.f32 %v1852_v5, %v388_v20  ;;  %v391_v38 = vmul.f32 %v1849_v3, %v368_v26  ;;  %v392_v39 = vmul.f32 %v1849_v3, %v369_v27  ;;  %s1328_s11 = scalar_lea.vmem %s1327_s9, 4096  ;;  %p1329_p1 = scmp.lt.s32.totalorder %s1977_s17, %s1327_s9 }
  0xc6   : > { %1034 = vmatprep.mubr.msk.f32.mxu0 %vm438_vm1, %v421_v23  ;;  %v425_v41 = vmax.f32 %v409_v25, 0.0  ;;  %v413_v42 = vadd.f32 %v1852_v5, %v390_v34  ;;  %v393_v43 = vmul.f32 %v1849_v3, %v370_v30  ;;  %v394_v44 = vmul.f32 %v1849_v3, %v371_v31  ;;  %p1325_p13 = pneg %p1324_p8  ;;  %p1330_p2 = scmp.lt.s32.totalorder %s1328_s11, %s1322_s3 }
  0xc7   : > { %1035 = vmatmul.mubr.msk.f32.vlgmr.msra.gmra.mrb[0].mxu0 %vm438_vm1, %v422_v28  ;;  %v414_v45 = vadd.f32 %v1852_v5, %v391_v38  ;;  %v415_v46 = vadd.f32 %v1852_v5, %v392_v39  ;;  %v395_v47 = vmul.f32 %v1849_v3, %v372_v35  ;;  %v396_v51 = vmul.f32 %v1849_v3, %v373_v40 }
  0xc8   : > { %1037 = vmatprep.mubr.msk.f32.mxu0 %vm438_vm1, %v423_v29  ;;  %v429_v48 = vmax.f32 %v413_v42, 0.0  ;;  %v416_v49 = vadd.f32 %v1852_v5, %v393_v43  ;;  %v417_v50 = vadd.f32 %v1852_v5, %v394_v44  ;;  %v426_v53 = vmax.f32 %v410_v32, 0.0  ;;  %p1331_p5 = por %p1330_p2, %p1329_p1 }
  0xc9   : > { %v412_v54 = vadd.f32 %v1852_v5, %v389_v33  ;;  %v430_v55 = vmax.f32 %v414_v45, 0.0  ;;  %v431_v56 = vmax.f32 %v415_v46, 0.0  ;;  %v427_v57 = vmax.f32 %v411_v37, 0.0 }
  0xca   : > { %1046 = vmatprep.mubr.msk.f32.mxu1 %vm438_vm1, %v429_v48  ;;  %v432_v58 = vmax.f32 %v416_v49, 0.0  ;;  %v418_v59 = vadd.f32 %v1852_v5, %v395_v47  ;;  %v397_v60 = vmul.f32 %v1849_v3, %v374_v52  ;;  %v433_v61 = vmax.f32 %v417_v50, 0.0  ;;  %p1332_p10 = pnand %p1331_p5, %p1325_p13 }
  0xcb   : > { %1038 = vmatmul.mubr.msk.f32.gmra.mrb[2].mxu0 %vm438_vm1, %v424_v36  ;;  %1047 = vmatmul.mubr.msk.f32.vlgmr.msra.gmra.mrb[0].mxu1 %vm438_vm1, %v430_v55  ;;  %v419_v62 = vadd.f32 %v1852_v5, %v396_v51  ;;  %v428_v63 = vmax.f32 %v412_v54, 0.0 }
  0xcc   : > { %1040 = vmatprep.mubr.msk.f32.mxu0 %vm438_vm1, %v425_v41  ;;  %1049 = vmatprep.mubr.msk.f32.mxu1 %vm438_vm1, %v431_v56  ;;  %v434_v0 = vmax.f32 %v418_v59, 0.0  ;;  %v420_v1 = vadd.f32 %v1852_v5, %v397_v60 }
  0xcd   : > { %v435_v2 = vmax.f32 %v419_v62, 0.0 }
  0xce   : > { %v436_v3 = vmax.f32 %v420_v1, 0.0 }
  0xcf   : > { %1041 = vmatmul.mubr.msk.f32.gmra.mrb[4].mxu0 %vm438_vm1, %v426_v53  ;;  %1050 = vmatmul.mubr.msk.f32.gmra.mrb[2].mxu1 %vm438_vm1, %v432_v58 }
  0xd0   : > { %1043 = vmatprep.mubr.msk.f32.mxu0 %vm438_vm1, %v427_v57  ;;  %1052 = vmatprep.mubr.msk.f32.mxu1 %vm438_vm1, %v433_v61 }
  0xd3   : > { %1044 = vmatmul.mubr.msk.f32.gmra.mrb[6].mxu0 %vm438_vm1, %v428_v63  ;;  %1053 = vmatmul.mubr.msk.f32.gmra.mrb[4].mxu1 %vm438_vm1, %v434_v0 }
  0xd4   : > { %1055 = vmatprep.mubr.msk.f32.mxu1 %vm438_vm1, %v435_v2 }
  0xd7   : > { %1056 = vmatmul.mubr.msk.f32.gmra.mrb[6].mxu1 %vm438_vm1, %v436_v3 }
 0x19a   : > { %v1036_v4 = vpop.f32.mrb[0].mxu0 }
 0x19b   : > { %633 = vst.msk [vmem:[%s1839_s19 + $0x8] sm:$0xff] %vm438_vm1, %v1036_v4  ;;  %v650_v6 = vsel %vm438_vm1, %v1036_v4, 0.0  ;;  %v691_v5 = vmul.f32 %v1036_v4, %v1036_v4  ;;  %v553_v7 = vpop.f32.mrb[1].mxu0 }
 0x19c   : > { %632 = vst.msk [vmem:[%s1839_s19] sm:$0xff] %vm438_vm1, %v553_v7  ;;  %v649_v8 = vsel %vm438_vm1, %v553_v7, 0.0  ;;  %v690_v9 = vmul.f32 %v553_v7, %v553_v7 }
 0x19d   : > { %v707_v10 = vsel %vm438_vm1, %v691_v5, 0.0  ;;  %v651_v11 = vadd.f32 %v650_v6, %v649_v8 }
 0x19e   : > { %v706_v12 = vsel %vm438_vm1, %v690_v9, 0.0  ;;  %v1039_v13 = vpop.f32.mrb[2].mxu0  ;;  %v1048_v19 = vpop.f32.mrb[0].mxu1 }
 0x19f   : > { %v708_v14 = vadd.f32 %v707_v10, %v706_v12  ;;  %635 = vst.msk [vmem:[%s1839_s19 + $0x18] sm:$0xff] %vm438_vm1, %v1039_v13  ;;  %v563_v15 = vpop.f32.mrb[3].mxu0  ;;  %v693_v16 = vmul.f32 %v1039_v13, %v1039_v13  ;;  %641 = vst.msk [vmem:[%s1839_s19 + $0x48] sm:$0xff] %vm438_vm1, %v1048_v19  ;;  %v593_v21 = vpop.f32.mrb[1].mxu1  ;;  %v654_v22 = vsel %vm438_vm1, %v1039_v13, 0.0  ;;  %v699_v57 = vmul.f32 %v1048_v19, %v1048_v19 }
 0x1a0   : > { %634 = vst.msk [vmem:[%s1839_s19 + $0x10] sm:$0xff] %vm438_vm1, %v563_v15  ;;  %v652_v17 = vsel %vm438_vm1, %v563_v15, 0.0  ;;  %v692_v18 = vmul.f32 %v563_v15, %v563_v15  ;;  %640 = vst.msk [vmem:[%s1839_s19 + $0x40] sm:$0xff] %vm438_vm1, %v593_v21  ;;  %v698_v42 = vmul.f32 %v593_v21, %v593_v21  ;;  %v664_v53 = vsel %vm438_vm1, %v593_v21, 0.0 }
 0x1a1   : > { %v653_v20 = vadd.f32 %v652_v17, %v651_v11  ;;  %v711_v28 = vsel %vm438_vm1, %v693_v16, 0.0  ;;  %v666_v0 = vsel %vm438_vm1, %v1048_v19, 0.0 }
 0x1a2   : > { %v709_v23 = vsel %vm438_vm1, %v692_v18, 0.0  ;;  %v1042_v24 = vpop.f32.mrb[4].mxu0  ;;  %v1942_v32 = vpop.f32.mrb[2].mxu1  ;;  %v721_v58 = vsel %vm438_vm1, %v698_v42, 0.0 }
 0x1a3   : > { %v710_v25 = vadd.f32 %v709_v23, %v708_v14  ;;  %637 = vst.msk [vmem:[%s1839_s19 + $0x28] sm:$0xff] %vm438_vm1, %v1042_v24  ;;  %v573_v26 = vpop.f32.mrb[5].mxu0  ;;  %v655_v27 = vadd.f32 %v654_v22, %v653_v20  ;;  %v695_v29 = vmul.f32 %v1042_v24, %v1042_v24  ;;  %643 = vst.msk [vmem:[%s1839_s19 + $0x58] sm:$0xff] %vm438_vm1, %v1942_v32  ;;  %v603_v35 = vpop.f32.mrb[3].mxu1  ;;  %v658_v36 = vsel %vm438_vm1, %v1042_v24, 0.0 }
 0x1a4   : > { %636 = vst.msk [vmem:[%s1839_s19 + $0x20] sm:$0xff] %vm438_vm1, %v573_v26  ;;  %v656_v30 = vsel %vm438_vm1, %v573_v26, 0.0  ;;  %v694_v31 = vmul.f32 %v573_v26, %v573_v26  ;;  %642 = vst.msk [vmem:[%s1839_s19 + $0x50] sm:$0xff] %vm438_vm1, %v603_v35  ;;  %v700_v59 = vmul.f32 %v603_v35, %v603_v35  ;;  %v668_v1 = vsel %vm438_vm1, %v603_v35, 0.0 }
 0x1a5   : > { %v657_v33 = vadd.f32 %v656_v30, %v655_v27  ;;  %v712_v34 = vadd.f32 %v711_v28, %v710_v25  ;;  %v715_v43 = vsel %vm438_vm1, %v695_v29, 0.0 }
 0x1a6   : > { %v713_v37 = vsel %vm438_vm1, %v694_v31, 0.0  ;;  %v1045_v38 = vpop.f32.mrb[6].mxu0  ;;  %v1960_v47 = vpop.f32.mrb[4].mxu1 }
 0x1a7   : > { %v714_v39 = vadd.f32 %v713_v37, %v712_v34  ;;  %639 = vst.msk [vmem:[%s1839_s19 + $0x38] sm:$0xff] %vm438_vm1, %v1045_v38  ;;  %v583_v40 = vpop.f32.mrb[7].mxu0  ;;  %v659_v41 = vadd.f32 %v658_v36, %v657_v33  ;;  %v697_v44 = vmul.f32 %v1045_v38, %v1045_v38  ;;  %645 = vst.msk [vmem:[%s1839_s19 + $0x68] sm:$0xff] %vm438_vm1, %v1960_v47  ;;  %v613_v50 = vpop.f32.mrb[5].mxu1  ;;  %v662_v51 = vsel %vm438_vm1, %v1045_v38, 0.0 }
 0x1a8   : > { %638 = vst.msk [vmem:[%s1839_s19 + $0x30] sm:$0xff] %vm438_vm1, %v583_v40  ;;  %v660_v45 = vsel %vm438_vm1, %v583_v40, 0.0  ;;  %v696_v46 = vmul.f32 %v583_v40, %v583_v40  ;;  %644 = vst.msk [vmem:[%s1839_s19 + $0x60] sm:$0xff] %vm438_vm1, %v613_v50 }
 0x1a9   : > { %v661_v48 = vadd.f32 %v660_v45, %v659_v41  ;;  %v716_v49 = vadd.f32 %v715_v43, %v714_v39  ;;  %v719_v56 = vsel %vm438_vm1, %v697_v44, 0.0 }
 0x1aa   : > { %v717_v52 = vsel %vm438_vm1, %v696_v46, 0.0  ;;  %v1981_v60 = vpop.f32.mrb[6].mxu1 }
 0x1ab   : > { %v663_v54 = vadd.f32 %v662_v51, %v661_v48  ;;  %v718_v55 = vadd.f32 %v717_v52, %v716_v49  ;;  %647 = vst.msk [vmem:[%s1839_s19 + $0x78] sm:$0xff] %vm438_vm1, %v1981_v60  ;;  %v623_v63 = vpop.f32.mrb[7].mxu1 }
 0x1ac   : > { %646 = vst.msk [vmem:[%s1839_s19 + $0x70] sm:$0xff] %vm438_vm1, %v623_v63 }
 0x1ad   : > { %v720_v61 = vadd.f32 %v719_v56, %v718_v55  ;;  %v665_v62 = vadd.f32 %v664_v53, %v663_v54 }
 0x1af   : > { %v722_v2 = vadd.f32 %v721_v58, %v720_v61  ;;  %v667_v3 = vadd.f32 %v666_v0, %v665_v62 }
 0x1b0   : > { %1335 = shalt.err (!%p1332_p10)
}
 0x1b1   : > { %s1336_s15 = scalar_lea.hbm %s1975_s5, 2048  ;;  %s1340_s16 = scalar_lea.hbm %s2150_s4, 8192 }
 0x1b2   : > { %p1337_p6 = scmp.ne.s32.totalorder %s1975_s5, %s1336_s15  ;;  %p1341_p0 = scmp.lt.u32.totalorder %s1975_s5, %s2150_s4 }
 0x1b3   : > { %p1342_p9 = scmp.lt.u32.totalorder %s1340_s16, %s1336_s15  ;;  %p1344_p3 = scmp.lt.u32.totalorder %s1336_s15, %s1975_s5 }
 0x1b4   : > { %p1338_p7 = pnand %p1337_p6, %p1755_p11 }
 0x1b5   : > { %p1343_p12 = por %p1342_p9, %p1341_p0 }
 0x1b6   : > { %p1339_p4 = pneg %p1338_p7 }
 0x1b7   : > { %p1345_p8 = por %p1344_p3, %p1343_p12 }
 0x1b9   : > { %p1346_p13 = pnand %p1345_p8, %p1339_p4 }
 0x1bb   : > { %1349 = shalt.err (!%p1346_p13)
}
 0x1bc   : > { %s1522_s20 = smov 128   ;;  %s1523_s3 = smov 8   ;;  %v723_v4 = vsel %vm438_vm1, %v699_v57, 0.0  ;;  %v701_v6 = vmul.f32 %v1942_v32, %v1942_v32  ;;  %v725_v5 = vsel %vm438_vm1, %v700_v59, 0.0  ;;  %v702_v7 = vmul.f32 %v613_v50, %v613_v50  ;;  %v648_v43 = vld [vmem:[%s1841_s24] sm:$0x1] }
 0x1bd   : > { %1074 = dma.vmem_to_hbm [thread:$0]  (%p1755_p11), %s1977_s17, 2048, %s1975_s5, %s746_s18, %s1522_s20, %s1522_s20, %s1523_s3   ;;  %v669_v8 = vadd.f32 %v668_v1, %v667_v3  ;;  %v724_v9 = vadd.f32 %v723_v4, %v722_v2  ;;  %v670_v10 = vsel %vm438_vm1, %v1942_v32, 0.0  ;;  %v672_v11 = vsel %vm438_vm1, %v613_v50, 0.0 }
 0x1be   : > { %v727_v14 = vsel %vm438_vm1, %v701_v6, 0.0  ;;  %v703_v15 = vmul.f32 %v1960_v47, %v1960_v47  ;;  %v729_v16 = vsel %vm438_vm1, %v702_v7, 0.0  ;;  %v704_v17 = vmul.f32 %v623_v63, %v623_v63  ;;  %s750_s29 = sand.u32 1, %s1615_s8   ;;  %s1009_s17 = sshll.u32 %s1500_s28, 4  ;;  %v689_v46 = vld [vmem:[%s1843_s10] sm:$0x1] }
 0x1bf   : > { %v726_v12 = vadd.f32 %v725_v5, %v724_v9  ;;  %v671_v13 = vadd.f32 %v670_v10, %v669_v8  ;;  %v674_v20 = vsel %vm438_vm1, %v1960_v47, 0.0  ;;  %v676_v21 = vsel %vm438_vm1, %v623_v63, 0.0  ;;  %s785_s5 = sshll.u32 %s1841_s24, 4  ;;  %s2204_s13 = sld [smem:[#allocation22_spill]]  ;;  %s2046_s5 = int_to_ptr.vmem [resolvable:$true] %s785_s5 }
 0x1c0   : > { %v731_v24 = vsel %vm438_vm1, %v703_v15, 0.0  ;;  %v705_v25 = vmul.f32 %v1981_v60, %v1981_v60  ;;  %v733_v26 = vsel %vm438_vm1, %v704_v17, 0.0  ;;  %v678_v29 = vsel %vm438_vm1, %v1981_v60, 0.0  ;;  %s798_s18 = sshll.u32 %s1843_s10, 4  ;;  %s2205_s11 = sld [smem:[#allocation29_spill]]  ;;  %s2055_s18 = int_to_ptr.vmem [resolvable:$true] %s798_s18 }
 0x1c1   : > { %v673_v18 = vadd.f32 %v672_v11, %v671_v13  ;;  %v728_v19 = vadd.f32 %v727_v14, %v726_v12  ;;  %vm687_vm2 = vcmask 57344   ;;  %s2206_s19 = sld [smem:[#allocation30_spill]]  ;;  %s2057_s16 = scalar_lea.sflag [#allocation12], %s750_s29 }
 0x1c2   : > { %v735_v32 = vsel %vm438_vm1, %v705_v25, 0.0  ;;  %s1350_s27 = scalar_lea.vmem %s2046_s5, 16  ;;  %s1524_s21 = smov [#allocation11]  }
 0x1c3   : > { %v730_v22 = vadd.f32 %v729_v16, %v728_v19  ;;  %v675_v23 = vadd.f32 %v674_v20, %v673_v18  ;;  %p1351_p11 = scmp.ne.s32.totalorder %s2046_s5, %s1350_s27  ;;  %s1354_s20 = sshll.u32 %s1524_s21, 4  ;;  %s1355_s20 = int_to_ptr.vmem [resolvable:$false] %s1354_s20 }
 0x1c4   : > { %s1356_s3 = scalar_lea.vmem %s1355_s20, 32  ;;  %p1357_p10 = scmp.lt.s32.totalorder %s2046_s5, %s1355_s20 }
 0x1c5   : > { %v677_v27 = vadd.f32 %v676_v21, %v675_v23  ;;  %v732_v28 = vadd.f32 %v731_v24, %v730_v22  ;;  %p2207_p1 = scmp.ne.s32.totalorder %s2204_s13, 0  ;;  %p1358_p6 = scmp.lt.s32.totalorder %s1356_s3, %s1350_s27 }
 0x1c6   : > { %s2044_s15 = scalar_lea.hbm %s2205_s11, %s1009_s17 }
 0x1c7   : > { %v679_v30 = vadd.f32 %v678_v29, %v677_v27  ;;  %v734_v31 = vadd.f32 %v733_v26, %v732_v28  ;;  %s2053_s14 = scalar_lea.hbm %s2206_s19, %s1009_s17  ;;  %p1352_p2 = pnand %p1351_p11, %p2207_p1 }
 0x1c8   : > { %p1359_p7 = por %p1358_p6, %p1357_p10 }
 0x1c9   : > { %v680_v33 = vrot.slane %v679_v30, 4  ;;  %v736_v34 = vadd.f32 %v735_v32, %v734_v31  ;;  %p1353_p5 = pneg %p1352_p2 }
 0x1cb   : > { %v681_v35 = vadd.f32 %v680_v33, %v679_v30  ;;  %v737_v36 = vrot.slane %v736_v34, 4  ;;  %p1360_p4 = pnand %p1359_p7, %p1353_p5 }
 0x1cd   : > { %v682_v37 = vrot.slane %v681_v35, 2  ;;  %v738_v38 = vadd.f32 %v737_v36, %v736_v34 }
 0x1cf   : > { %v683_v39 = vadd.f32 %v682_v37, %v681_v35  ;;  %v739_v40 = vrot.slane %v738_v38, 2 }
 0x1d1   : > { %v740_v41 = vadd.f32 %v739_v40, %v738_v38  ;;  %v684_v42 = vrot.slane %v683_v39, 1 }
 0x1d3   : > { %v741_v44 = vrot.slane %v740_v41, 1  ;;  %v685_v45 = vadd.f32 %v684_v42, %v683_v39 }
 0x1d5   : > { %v686_v47 = vadd.f32 %v685_v45, %v648_v43  ;;  %v742_v48 = vadd.f32 %v741_v44, %v740_v41 }
 0x1d7   : > { %688 = vst.msk [vmem:[%s1841_s24] sm:$0x1] %vm687_vm2, %v686_v47  ;;  %v743_v49 = vadd.f32 %v742_v48, %v689_v46 }
 0x1d8   : > { %1363 = shalt.err (!%p1360_p4)
}
 0x1d9   : > { %s1364_s24 = scalar_lea.hbm %s2044_s15, 16  ;;  %s1368_s12 = scalar_lea.hbm %s2205_s11, 32 }
 0x1da   : > { %p1365_p0 = scmp.ne.s32.totalorder %s2044_s15, %s1364_s24  ;;  %p1369_p3 = scmp.lt.u32.totalorder %s2044_s15, %s2205_s11 }
 0x1db   : > { %p1370_p8 = scmp.lt.u32.totalorder %s1368_s12, %s1364_s24  ;;  %p1372_p11 = scmp.lt.u32.totalorder %s1364_s24, %s2044_s15 }
 0x1dc   : > { %p1366_p9 = pnand %p1365_p0, %p2207_p1 }
 0x1dd   : > { %p1371_p13 = por %p1370_p8, %p1369_p3 }
 0x1de   : > { %p1367_p12 = pneg %p1366_p9 }
 0x1df   : > { %p1373_p2 = por %p1372_p11, %p1371_p13 }
 0x1e1   : > { %p1374_p5 = pnand %p1373_p2, %p1367_p12 }
 0x1e3   : > { %1377 = shalt.err (!%p1374_p5)
}
 0x1e4   : > { %1075 = dma.vmem_to_hbm [thread:$0]  (%p2207_p1), %s2046_s5, 16, %s2044_s15, %s2057_s16   ;;  %744 = vst.msk [vmem:[%s1843_s10] sm:$0x1] %vm687_vm2, %v743_v49 }
 0x1e5   : > { %s1378_s8 = scalar_lea.vmem %s2055_s18, 16  ;;  %s1525_s27 = smov [#allocation13]  }
 0x1e6   : > { %p1379_p10 = scmp.ne.s32.totalorder %s2055_s18, %s1378_s8  ;;  %s1382_s21 = sshll.u32 %s1525_s27, 4  ;;  %s1383_s21 = int_to_ptr.vmem [resolvable:$false] %s1382_s21 }
 0x1e7   : > { %s1384_s20 = scalar_lea.vmem %s1383_s21, 32  ;;  %p1385_p4 = scmp.lt.s32.totalorder %s2055_s18, %s1383_s21 }
 0x1e8   : > { %p1380_p6 = pnand %p1379_p10, %p2207_p1  ;;  %p1386_p0 = scmp.lt.s32.totalorder %s1384_s20, %s1378_s8 }
 0x1ea   : > { %p1381_p7 = pneg %p1380_p6  ;;  %p1387_p9 = por %p1386_p0, %p1385_p4 }
 0x1ec   : > { %p1388_p12 = pnand %p1387_p9, %p1381_p7 }
 0x1ee   : > { %1391 = shalt.err (!%p1388_p12)
}
 0x1ef   : > { %s1392_s10 = scalar_lea.hbm %s2053_s14, 16  ;;  %s1396_s3 = scalar_lea.hbm %s2206_s19, 32 }
 0x1f0   : > { %p1393_p3 = scmp.ne.s32.totalorder %s2053_s14, %s1392_s10  ;;  %p1397_p11 = scmp.lt.u32.totalorder %s2053_s14, %s2206_s19 }
 0x1f1   : > { %p1398_p2 = scmp.lt.u32.totalorder %s1396_s3, %s1392_s10  ;;  %p1400_p10 = scmp.lt.u32.totalorder %s1392_s10, %s2053_s14 }
 0x1f2   : > { %p1394_p8 = pnand %p1393_p3, %p2207_p1 }
 0x1f3   : > { %p1399_p5 = por %p1398_p2, %p1397_p11 }
 0x1f4   : > { %p1395_p13 = pneg %p1394_p8 }
 0x1f5   : > { %p1401_p6 = por %p1400_p10, %p1399_p5 }
 0x1f7   : > { %p1402_p7 = pnand %p1401_p6, %p1395_p13 }
 0x1f9   : > { %1405 = shalt.err (!%p1402_p7)
}
 0x1fa   : > { %1076 = dma.vmem_to_hbm [thread:$0]  (%p2207_p1), %s2055_s18, 16, %s2053_s14, %s2057_s16  }
 0x1fb PF: > { %s2208_s17 = sld [smem:[#allocation19_spill]]  ;;  %s2209_s12 = sld [smem:[#allocation21_spill]] }
 0x1fc   : > { %p1111_p4 = scmp.ge.s32.totalorder %s1512_s7, 2 }
 0x201   : > { %s810_s9 = sand.u32 1, %s2208_s17   ;;  %p2210_p0 = scmp.ne.s32.totalorder %s2209_s12, 0 }
 0x202   : > { %s811_s28 = scalar_lea.sflag [#allocation4], %s810_s9 }
 0x203   : > { %p1095_p9 = pnand %p1111_p4, %p2210_p0 }
 0x205   : > { %1463 = dma.done.wait (!%p1095_p9), %s811_s28, 2048  }
 0x206   : > { %1465 = vsyncadd (!%p1095_p9), %s811_s28, 4294965248  ;;  %s2211_s8 = sadd.s32 4294967294, %s1512_s7   ;;  %s2212_s27 = sld [smem:[#allocation23_spill]] }
 0x207   : > { %s819_s21 = sand.u32 1, %s2211_s8  }
 0x208   : > { %s820_s13 = scalar_lea.sflag [#allocation12], %s819_s21 }
 0x20c   : > { %p2213_p12 = scmp.ne.s32.totalorder %s2212_s27, 0 }
 0x20e   : > { %p1098_p3 = pnand %p1111_p4, %p2213_p12 }
 0x210   : > { %1467 = dma.done.wait (!%p1098_p3), %s820_s13, 32  }
 0x211   : > { %1469 = vsyncadd (!%p1098_p3), %s820_s13, 4294967264  ;;  %s28_s7 = sadd.s32 1, %s1512_s7   ;;  %s2214_s27 = sld [smem:[#allocation20_spill]] }
 0x212   : > { %p25_p1 = scmp.ge.s32.totalorder %s28_s7, 6   ;;  %s2215_s18 = sld [smem:[#allocation25_spill]] }
 0x213   : > { %s2216_s21 = smov %s1476_s22  ;;  %s2217_s22 = smov %s1480_s23 }
 0x214   : > { %s2218_s23 = smov %s1769_s1  ;;  %s2219_s24 = smov %s1488_s25 }
 0x215   : > { %s2220_s25 = smov %s1492_s26  ;;  %s2221_s26 = smov %s1772_s2 }
 0x216   : > { %s2222_s28 = smov %s1508_s30  ;;  %s2223_s29 = smov %s2226_s6 }
 0x217   :  { %27 = sbr.rel (!%p25_p1) target bundleno = 19 (0x13), region = 129 }
 0x218   : > { %s2224_s30 = smov %s2215_s18 }
 0x21e   :  { %832 = vsyncpa [#allocation3], 1 }
 0x21f   :  { %834 = vsyncpa [#allocation3 + $0x1], 1 }
 0x220   :  { %835 = vsyncpa [#allocation6], 1 }
 0x221   :  { %836 = vsyncpa [#allocation9], 1 }
 0x222   :  { %837 = vsyncpa [#allocation4], 1 }
 0x223   :  { %839 = vsyncpa [#allocation4 + $0x1], 1 }
 0x224   :  { %840 = vsyncpa [#allocation12], 1 }
 0x225   :  { %842 = vsyncpa [#allocation12 + $0x1], 1 }

// kernel: _lambda_.5
= control target key start
LH: loop header
LB: loop body
LE: loop exit
PB: predicated region body
PF: predicated region fallthrough
CT: control target
= control target key end

     0   :  { %s4572_s0 = inlined_call_operand.hbm [shape: f32[2,256,8], index: 0, kind: input, shape index: {}, may-alias: {0,1,2}]   ;;  %s4573_s1 = inlined_call_operand.hbm [shape: f32[2,256,8], index: 1, kind: input, shape index: {}, may-alias: {0,1,2}]   ;;  %s4574_s2 = inlined_call_operand.hbm [shape: f32[2,256,8], index: 2, kind: input, shape index: {}, may-alias: {0,1,2}]   ;;  %s4575_s3 = inlined_call_operand.hbm [shape: f32[1,8], index: 3, kind: input, shape index: {}]   ;;  %s4576_s4 = inlined_call_operand.hbm [shape: f32[1,8], index: 4, kind: input, shape index: {}]   ;;  %s4577_s5 = inlined_call_operand.hbm [shape: f32[9,8,8], index: 5, kind: input, shape index: {}]   ;;  %s4578_s6 = inlined_call_operand.hbm [shape: f32[2,256,8], index: 6, kind: output, shape index: {0}]   ;;  %s4579_s7 = inlined_call_operand.hbm [shape: f32[2,1,8], index: 7, kind: output, shape index: {1}]   ;;  %s4580_s8 = inlined_call_operand.hbm [shape: f32[2,1,8], index: 8, kind: output, shape index: {2}]  }
   0x1   :  { %4628 = sst [smem:[#allocation47_spill]] %s4572_s0 }
   0x2   :  { %4629 = sst [smem:[#allocation48_spill]] %s4573_s1 }
   0x3   :  { %4630 = sst [smem:[#allocation49_spill]] %s4574_s2 }
   0x4   :  { %4631 = sst [smem:[#allocation50_spill]] %s4575_s3 }
   0x5   :  { %4632 = sst [smem:[#allocation51_spill]] %s4576_s4 }
   0x6   :  { %4633 = sst [smem:[#allocation52_spill]] %s4577_s5 }
   0x7   :  { %4634 = sst [smem:[#allocation53_spill]] %s4578_s6 }
   0x8   :  { %4635 = sst [smem:[#allocation54_spill]] %s4579_s7 }
   0x9   :  { %4636 = sst [smem:[#allocation55_spill]] %s4580_s8 }
   0xa   :  { %14 = vsyncpa [#allocation4], 0 }
   0xb   :  { %16 = vsyncpa [#allocation4 + $0x1], 0 }
   0xc   :  { %17 = vsyncpa [#allocation7], 0 }
   0xd   :  { %19 = vsyncpa [#allocation7 + $0x1], 0 }
   0xe   :  { %20 = vsyncpa [#allocation10], 0 }
   0xf   :  { %21 = vsyncpa [#allocation13], 0 }
  0x10   :  { %22 = vsyncpa [#allocation5], 0 }
  0x11   :  { %24 = vsyncpa [#allocation5 + $0x1], 0 }
  0x12   :  { %25 = vsyncpa [#allocation16], 0 }
  0x13   :  { %27 = vsyncpa [#allocation16 + $0x1], 0  ;;  %s3557_s27 = smov 0   ;;  %s3559_s28 = smov 0  }
  0x14   :  { %s3561_s29 = smov 0   ;;  %s3563_s30 = smov 0  }
  0x15   :  { %s3565_s9 = smov 0   ;;  %s3567_s10 = smov 0  }
  0x16   :  { %s3569_s11 = smov 0   ;;  %s3571_s12 = smov 0  }
  0x17   :  { %s3573_s13 = smov 0   ;;  %s3575_s14 = smov 0  }
  0x18   :  { %s3577_s15 = smov 0   ;;  %s3579_s16 = smov 0  }
  0x19   :  { %s3581_s17 = smov 0   ;;  %s3583_s18 = smov 0  }
  0x1a   :  { %s3585_s19 = smov 0   ;;  %s3587_s20 = smov 0  }
  0x1b   :  { %s3589_s21 = smov 0  }
  0x1c LB: > { %4637 = sst [smem:[#allocation25_spill]] %s3432_s27  ;;  %s3643_s22 = sadd.s32 4294967295, %s3496_s21   ;;  %s3496_s21 = sphi %s3589_s21, %s33_s21   ;;  %s3492_s20 = sphi %s3587_s20, %s4763_s20   ;;  %s3488_s19 = sphi %s3585_s19, %s4762_s19   ;;  %s3484_s18 = sphi %s3583_s18, %s4761_s18   ;;  %s3480_s17 = sphi %s3581_s17, %s4760_s17   ;;  %s3476_s16 = sphi %s3579_s16, %s4759_s16   ;;  %s3472_s15 = sphi %s3577_s15, %s4769_s15   ;;  %s3468_s14 = sphi %s3575_s14, %s4768_s14   ;;  %s3464_s13 = sphi %s3573_s13, %s4757_s13   ;;  %s3460_s12 = sphi %s3571_s12, %s4767_s12   ;;  %s3456_s11 = sphi %s3569_s11, %s4755_s11   ;;  %s3452_s10 = sphi %s3567_s10, %s4766_s10   ;;  %s3448_s9 = sphi %s3565_s9, %s4754_s9   ;;  %s3444_s30 = sphi %s3563_s30, %s4753_s30   ;;  %s3440_s29 = sphi %s3561_s29, %s4765_s29   ;;  %s3436_s28 = sphi %s3559_s28, %s4764_s28   ;;  %s3432_s27 = sphi %s3557_s27, %s4752_s27  }
  0x1d   : > { %4638 = sst [smem:[#allocation26_spill]] %s3436_s28  ;;  %p4591_p0 = scmp.eq.s32.totalorder %s3643_s22, 0 }
  0x1e   : > { %4639 = sst [smem:[#allocation27_spill]] %s3444_s30  ;;  %p4590_p1 = scmp.eq.s32.totalorder %s3643_s22, 7 }
  0x1f   : > { %4640 = sst [smem:[#allocation28_spill]] %s3448_s9  ;;  %p253_p2 = scmp.ne.s32.totalorder %s3440_s29, %s3436_s28 }
  0x20   : > { %4641 = sst [smem:[#allocation29_spill]] %s3452_s10  ;;  %p2478_p4 = scmp.ge.s32.totalorder %s3496_s21, 1 }
  0x21   : > { %4642 = sst [smem:[#allocation30_spill]] %s3460_s12  ;;  %p293_p5 = scmp.lt.s32.totalorder %s3496_s21, 9 }
  0x22   : > { %4643 = sst [smem:[#allocation31_spill]] %s3464_s13  ;;  %p3656_p6 = por %p253_p2, %p4590_p1 }
  0x23   : > { %4644 = sst [smem:[#allocation32_spill]] %s3476_s16  ;;  %p3660_p7 = pnand %p2478_p4, %p293_p5 }
  0x24   : > { %4645 = sst [smem:[#allocation33_spill]] %s3480_s17  ;;  %s3498_s26 = smov [#allocation9]  }
  0x25   : > { %4646 = sst [smem:[#allocation34_spill]] %s3484_s18  ;;  %s306_s8 = sshll.u32 %s3498_s26, 4  ;;  %s307_s8 = int_to_ptr.vmem [resolvable:$true] %s306_s8 }
  0x26   : > { %4647 = sst [smem:[#allocation35_spill]] %s3488_s19  ;;  %p2894_p8 = pneg %p3660_p7 }
  0x27   : > { %4648 = sst [smem:[#allocation36_spill]] %s3492_s20  ;;  %s4655_s3 = sld [smem:[#allocation50_spill]] }
  0x28   : > { %4649 = sst [smem:[#allocation37_spill]] %s3643_s22  ;;  %p3668_p9 = pnand %p2894_p8, %p4591_p0 }
  0x29   : > { %s4650_s24 = scalar_select %p3656_p6, 1, 0 }
  0x2a   : > { %s4652_s25 = scalar_select %p3660_p7, 1, 0 }
  0x2b   : > { %4651 = sst [smem:[#allocation38_spill]] %s4650_s24  ;;  %p3680_p11 = pneg %p3668_p9 }
  0x2c   : > { %4653 = sst [smem:[#allocation39_spill]] %s4652_s25 }
  0x2d   : > { %s4654_s23 = scalar_select %p3668_p9, 1, 0 }
  0x2e   : > { %s3076_s24 = scalar_lea.hbm %s4655_s3, 16 }
  0x2f   : > { %p3077_p10 = scmp.ne.s32.totalorder %s4655_s3, %s3076_s24  ;;  %p3083_p2 = scmp.lt.u32.totalorder %s3076_s24, %s4655_s3 }
  0x31   : > { %p3079_p12 = pnand %p3680_p11, %p3077_p10 }
  0x33   : > { %p3080_p13 = pneg %p3079_p12 }
  0x35   : > { %p3085_p4 = pnand %p3083_p2, %p3080_p13 }
  0x37   : > { %3088 = shalt.err (!%p3085_p4)
}
  0x38   : > { %s3089_s6 = scalar_lea.vmem %s307_s8, 16  ;;  %s3096_s7 = scalar_lea.vmem %s307_s8, 32 }
  0x39   : > { %p3090_p5 = scmp.ne.s32.totalorder %s307_s8, %s3089_s6  ;;  %p3097_p1 = scmp.lt.s32.totalorder %s307_s8, %s307_s8 }
  0x3a   : > { %p3098_p0 = scmp.lt.s32.totalorder %s3096_s7, %s3089_s6 }
  0x3b   : > { %p3092_p8 = pnand %p3090_p5, %p3680_p11 }
  0x3c   : > { %p3099_p6 = por %p3098_p0, %p3097_p1 }
  0x3d   : > { %p3093_p3 = pneg %p3092_p8 }
  0x3f   : > { %p3100_p7 = pnand %p3099_p6, %p3093_p3 }
  0x41   : > { %3103 = shalt.err (!%p3100_p7)
}
  0x42   : > { %2897 = dma.hbm_to_vmem [thread:$0]  (!%p3668_p9), %s4655_s3, 16, %s307_s8, [#allocation10]  }
  0x43   : > { %s42_s2 = sadd.s32 1, %s3488_s19  ;;  %s45_s24 = sadd.s32 1, %s3492_s20 }
  0x44   : > { %p43_p0 = scmp.ge.s32.totalorder %s42_s2, 4  ;;  %p4611_p1 = scmp.eq.s32.totalorder %s3496_s21, 0 }
  0x45   : > { %s2472_s25 = sshll.u32 %s3488_s19, 2  ;;  %s90_s6 = sadd.s32 1, %s3464_s13 }
  0x46   : > { %s4771_s2 = smov (%p43_p0, %s42_s2), 0  ;;  %s4773_s24 = smov (!%p43_p0, %s45_s24), %s3492_s20 }
  0x47   : > { %4657 = sst [smem:[#allocation40_spill]] %s4771_s2  ;;  %s2473_s17 = sadd.s32 4294967295, %s2472_s25 }
  0x48   : > { %p47_p3 = scmp.ge.s32.totalorder %s4773_s24, 2  ;;  %p79_p6 = scmp.gt.s32.totalorder %s2473_s17, 0 }
  0x49   : > { %s2474_s8 = sshll.u32 %s4771_s2, 2  ;;  %p97_p7 = scmp.ne.s32.totalorder %s3464_s13, %s3460_s12 }
  0x4a   : > { %s4775_s24 = smov (%p47_p3, %s4773_s24), 0  ;;  %s4777_s17 = smov (!%p79_p6, %s2473_s17), 0 }
  0x4b   : > { %4658 = sst [smem:[#allocation41_spill]] %s4775_s24  ;;  %s3713_s18 = ssub.s32 %s3492_s20, %s4775_s24 }
  0x4c   : > { %s2475_s3 = sadd.s32 4294967295, %s2474_s8  ;;  %p3717_p12 = por %p97_p7, %p4611_p1 }
  0x4d   : > { %p83_p10 = scmp.gt.s32.totalorder %s2475_s3, 0  ;;  %p103_p13 = scmp.ne.s32.totalorder %s3460_s12, %s3456_s11 }
  0x4e   : > { %s3723_s30 = sadd.s32 4, %s2472_s25  ;;  %p4661_p2 = scmp.eq.s32.totalorder %s3643_s22, 0 }
  0x4f   : > { %4660 = sst [smem:[#allocation42_spill]] %s3723_s30  ;;  %s4779_s3 = smov (!%p83_p10, %s2475_s3), 0 }
  0x50   : > { %p3727_p4 = por %p103_p13, %p4661_p2  ;;  %s86_s9 = ssub.s32 %s4777_s17, %s4779_s3 }
  0x51   : > { %s3732_s10 = sadd.s32 4, %s2474_s8  ;;  %s87_s0 = sor.u32 %s86_s9, %s3713_s18 }
  0x52   : > { %s4662_s24 = scalar_select %p3727_p4, 1, 0 }
  0x53   : > { %4664 = sst [smem:[#allocation44_spill]] %s3732_s10  ;;  %p88_p0 = scmp.eq.s32.totalorder %s87_s0, 0 }
  0x54   : > { %4663 = sst [smem:[#allocation43_spill]] %s4662_s24  ;;  %p241_p3 = scmp.eq.s32.totalorder %s3713_s18, 0 }
  0x55   : > { %s3738_s11 = scalar_select %p88_p0, %s3464_s13, %s90_s6  }
  0x56   : > { %s4666_s25 = sadd.s32 1, %s3440_s29  ;;  %p4610_p6 = scmp.lt.s32.totalorder %s3496_s21, 8 }
  0x57   : > { %4665 = sst [smem:[#allocation45_spill]] %s3738_s11  ;;  %s3747_s27 = sshll.u32 %s3492_s20, 5 }
  0x58   : > { %s3743_s12 = scalar_select %p241_p3, %s3440_s29, %s4666_s25  }
  0x59   : > { %s364_s24 = sand.u32 1, %s3496_s21   ;;  %s366_s3 = sand.u32 1, %s3464_s13  }
  0x5a   : > { %s2487_s8 = sshll.u32 %s366_s3, 4  ;;  %s2490_s30 = sshll.u32 %s4777_s17, 1 }
  0x5b   : > { %s378_s28 = sadd.s32 %s2490_s30, %s3747_s27  ;;  %s368_s9 = scalar_lea.vmem [#allocation6], %s2487_s8 }
  0x5c   : > { %s381_s10 = sshll.u32 %s368_s9, 4  ;;  %s2492_s0 = sshll.u32 %s378_s28, 7  ;;  %s3752_s10 = int_to_ptr.vmem [resolvable:$true] %s381_s10 }
  0x5d   : > { %s4667_s1 = sld [smem:[#allocation48_spill]]  ;;  %p3763_p7 = pnand %p4610_p6, %p3717_p12 }
  0x5e   : > { %s3499_s28 = smov [#allocation11]   ;;  %s3769_s17 = scalar_lea.sflag [#allocation7], %s364_s24 }
  0x5f   : > { %s3767_s30 = sshll.u32 %s3499_s28, 4  ;;  %p3106_p13 = pneg %p3763_p7  ;;  %s318_s30 = int_to_ptr.vmem [resolvable:$true] %s3767_s30 }
  0x63   : > { %s3757_s11 = scalar_lea.hbm %s4667_s1, %s2492_s0  ;;  %s3109_s8 = scalar_lea.hbm %s4667_s1, 8192 }
  0x64   : > { %s3104_s22 = scalar_lea.hbm %s3757_s11, 256  ;;  %p3110_p12 = scmp.lt.u32.totalorder %s3757_s11, %s4667_s1 }
  0x65   : > { %p3105_p10 = scmp.ne.s32.totalorder %s3757_s11, %s3104_s22  ;;  %p3111_p3 = scmp.lt.u32.totalorder %s3109_s8, %s3104_s22 }
  0x66   : > { %p3113_p5 = scmp.lt.u32.totalorder %s3104_s22, %s3757_s11 }
  0x67   : > { %p3107_p2 = pnand %p3106_p13, %p3105_p10  ;;  %p3112_p8 = por %p3111_p3, %p3110_p12 }
  0x69   : > { %p3108_p0 = pneg %p3107_p2  ;;  %p3114_p6 = por %p3113_p5, %p3112_p8 }
  0x6b   : > { %p3115_p1 = pnand %p3114_p6, %p3108_p0 }
  0x6d   : > { %3118 = shalt.err (!%p3115_p1)
}
  0x6e   : > { %s3119_s24 = scalar_lea.vmem %s3752_s10, 256  ;;  %s3500_s6 = smov [#allocation6]  }
  0x6f   : > { %p3120_p10 = scmp.ne.s32.totalorder %s3752_s10, %s3119_s24  ;;  %s3124_s28 = sshll.u32 %s3500_s6, 4  ;;  %s3125_s28 = int_to_ptr.vmem [resolvable:$false] %s3124_s28 }
  0x70   : > { %s3126_s7 = scalar_lea.vmem %s3125_s28, 512  ;;  %p3127_p9 = scmp.lt.s32.totalorder %s3752_s10, %s3125_s28 }
  0x71   : > { %p3122_p2 = pnand %p3120_p10, %p3106_p13  ;;  %p3128_p12 = scmp.lt.s32.totalorder %s3126_s7, %s3119_s24 }
  0x73   : > { %p3123_p4 = pneg %p3122_p2  ;;  %p3129_p3 = por %p3128_p12, %p3127_p9 }
  0x75   : > { %p3130_p5 = pnand %p3129_p3, %p3123_p4 }
  0x77   : > { %3133 = shalt.err (!%p3130_p5)
}
  0x78   : > { %s4616_s22 = smov 128   ;;  %s4618_s3 = smov 8  }
  0x79   : > { %2910 = dma.hbm_to_vmem [thread:$0]  (!%p3763_p7), %s3757_s11, 256, %s3752_s10, %s3769_s17, %s4616_s22, %s4616_s22, %s4618_s3  }
  0x7a   : > { %s3503_s8 = smov [#allocation12]   ;;  %s4669_s4 = sld [smem:[#allocation51_spill]] }
  0x7b   : > { %s327_s9 = sshll.u32 %s3503_s8, 4  ;;  %s328_s9 = int_to_ptr.vmem [resolvable:$true] %s327_s9 }
  0x80   : > { %s3134_s6 = scalar_lea.hbm %s4669_s4, 16 }
  0x81   : > { %p3135_p9 = scmp.ne.s32.totalorder %s4669_s4, %s3134_s6  ;;  %p3141_p8 = scmp.lt.u32.totalorder %s3134_s6, %s4669_s4 }
  0x83   : > { %p3137_p1 = pnand %p3135_p9, %p3680_p11 }
  0x85   : > { %p3138_p4 = pneg %p3137_p1 }
  0x87   : > { %p3143_p6 = pnand %p3141_p8, %p3138_p4 }
  0x89   : > { %3146 = shalt.err (!%p3143_p6)
}
  0x8a   : > { %s3147_s10 = scalar_lea.vmem %s318_s30, 16  ;;  %s3154_s11 = scalar_lea.vmem %s318_s30, 32 }
  0x8b   : > { %p3148_p7 = scmp.ne.s32.totalorder %s318_s30, %s3147_s10  ;;  %p3155_p10 = scmp.lt.s32.totalorder %s318_s30, %s318_s30 }
  0x8c   : > { %p3156_p2 = scmp.lt.s32.totalorder %s3154_s11, %s3147_s10 }
  0x8d   : > { %p3150_p13 = pnand %p3148_p7, %p3680_p11 }
  0x8e   : > { %p3157_p12 = por %p3156_p2, %p3155_p10 }
  0x8f   : > { %p3151_p0 = pneg %p3150_p13 }
  0x91   : > { %p3158_p3 = pnand %p3157_p12, %p3151_p0 }
  0x93   : > { %3161 = shalt.err (!%p3158_p3)
}
  0x94   : > { %p4670_p5 = scmp.ne.s32.totalorder %s4654_s23, 0  ;;  %s4671_s5 = sld [smem:[#allocation52_spill]] }
  0x96   : > { %2900 = dma.hbm_to_vmem [thread:$0]  (!%p4670_p5), %s4669_s4, 16, %s318_s30, [#allocation10]  }
  0x9a   : > { %s3162_s6 = scalar_lea.hbm %s4671_s5, 1152 }
  0x9b   : > { %p3163_p9 = scmp.ne.s32.totalorder %s4671_s5, %s3162_s6  ;;  %p3169_p8 = scmp.lt.u32.totalorder %s3162_s6, %s4671_s5 }
  0x9d   : > { %p3165_p1 = pnand %p3163_p9, %p3680_p11 }
  0x9f   : > { %p3166_p4 = pneg %p3165_p1 }
  0xa1   : > { %p3171_p6 = pnand %p3169_p8, %p3166_p4 }
  0xa3   : > { %3174 = shalt.err (!%p3171_p6)
}
  0xa4   : > { %s3175_s11 = scalar_lea.vmem %s328_s9, 1152  ;;  %p3183_p10 = scmp.lt.s32.totalorder %s328_s9, %s328_s9 }
  0xa5   : > { %p3176_p7 = scmp.ne.s32.totalorder %s328_s9, %s3175_s11  ;;  %p3184_p2 = scmp.lt.s32.totalorder %s3175_s11, %s3175_s11 }
  0xa7   : > { %p3178_p13 = pnand %p3176_p7, %p3680_p11  ;;  %p3185_p12 = por %p3184_p2, %p3183_p10 }
  0xa9   : > { %p3179_p0 = pneg %p3178_p13 }
  0xab   : > { %p3186_p3 = pnand %p3185_p12, %p3179_p0 }
  0xad   : > { %3189 = shalt.err (!%p3186_p3)
}
  0xae   : > { %s4672_s26 = sld [smem:[#allocation37_spill]]  ;;  %s4674_s0 = sld [smem:[#allocation25_spill]] }
  0xaf   : > { %s4673_s23 = sld [smem:[#allocation26_spill]]  ;;  %s4615_s1 = sadd.s32 4294967294, %s3496_s21  }
  0xb0   : > { %2903 = dma.hbm_to_vmem [thread:$0]  (!%p4670_p5), %s4671_s5, 1152, %s328_s9, [#allocation13], %s4616_s22, %s4616_s22, %s4618_s3  }
  0xb1   : > { %s4675_s24 = ssub.s32 %s3488_s19, %s4771_s2  ;;  %s54_s28 = sadd.s32 1, %s3476_s16 }
  0xb2   : > { %s51_s6 = sor.u32 %s4675_s24, %s3713_s18  ;;  %p61_p9 = scmp.ne.s32.totalorder %s3476_s16, %s3472_s15 }
  0xb3   : > { %p52_p11 = scmp.eq.s32.totalorder %s51_s6, 0  ;;  %p67_p1 = scmp.ne.s32.totalorder %s3472_s15, %s3468_s14 }
  0xb4   : > { %p234_p4 = scmp.eq.s32.totalorder %s4615_s1, 7  ;;  %p4677_p8 = scmp.eq.s32.totalorder %s3496_s21, 0 }
  0xb5   : > { %s3853_s7 = scalar_select %p52_p11, %s3476_s16, %s54_s28  }
  0xb6   : > { %p3857_p6 = por %p4677_p8, %p61_p9  ;;  %p4679_p5 = scmp.eq.s32.totalorder %s4672_s26, 0 }
  0xb7   : > { %4676 = sst [smem:[#allocation46_spill]] %s3853_s7  ;;  %p4681_p13 = scmp.eq.s32.totalorder %s4672_s26, 7 }
  0xb8   : > { %p3863_p7 = por %p4679_p5, %p67_p1  ;;  %p3873_p10 = por %p234_p4, %p67_p1 }
  0xb9   : > { %p3869_p0 = por %p4681_p13, %p61_p9  ;;  %p4684_p2 = scmp.ne.s32.totalorder %s4673_s23, %s4674_s0 }
  0xba   : > { %s4683_s11 = scalar_select %p3873_p10, 1, 0 }
  0xbb   : > { %s4682_s10 = scalar_select %p3869_p0, 1, 0 }
  0xbc   : > { %p3880_p12 = por %p4684_p2, %p234_p4  ;;  %s341_s8 = sand.u32 1, %s3476_s16  }
  0xbd   : > { %s2483_s24 = sshll.u32 %s341_s8, 6  ;;  %s2484_s6 = sshll.u32 %s3488_s19, 3 }
  0xbe   : > { %s4685_s30 = scalar_select %p3880_p12, 1, 0 }
  0xbf   : > { %s351_s28 = sadd.s32 %s3747_s27, %s2484_s6  ;;  %s345_s1 = scalar_lea.vmem [#allocation3], %s2483_s24 }
  0xc0   : > { %s354_s22 = sshll.u32 %s345_s1, 4  ;;  %s2486_s3 = sshll.u32 %s351_s28, 7  ;;  %s3887_s22 = int_to_ptr.vmem [resolvable:$true] %s354_s22 }
  0xc1   : > { %s4686_s2 = sld [smem:[#allocation47_spill]]  ;;  %p4687_p3 = scmp.lt.s32.totalorder %s3496_s21, 8 }
  0xc2   : > { %s3902_s0 = scalar_lea.sflag [#allocation4], %s341_s8 }
  0xc3   : > { %p3898_p11 = pnand %p4687_p3, %p3857_p6 }
  0xc5   : > { %p3192_p1 = pneg %p3898_p11 }
  0xc7   : > { %s3892_s20 = scalar_lea.hbm %s4686_s2, %s2486_s3  ;;  %s3195_s3 = scalar_lea.hbm %s4686_s2, 8192 }
  0xc8   : > { %s3190_s1 = scalar_lea.hbm %s3892_s20, 1024  ;;  %p3196_p6 = scmp.lt.u32.totalorder %s3892_s20, %s4686_s2 }
  0xc9   : > { %p3191_p9 = scmp.ne.s32.totalorder %s3892_s20, %s3190_s1  ;;  %p3197_p5 = scmp.lt.u32.totalorder %s3195_s3, %s3190_s1 }
  0xca   : > { %p3199_p2 = scmp.lt.u32.totalorder %s3190_s1, %s3892_s20 }
  0xcb   : > { %p3193_p4 = pnand %p3192_p1, %p3191_p9  ;;  %p3198_p13 = por %p3197_p5, %p3196_p6 }
  0xcd   : > { %p3194_p8 = pneg %p3193_p4  ;;  %p3200_p3 = por %p3199_p2, %p3198_p13 }
  0xcf   : > { %p3201_p12 = pnand %p3200_p3, %p3194_p8 }
  0xd1   : > { %3204 = shalt.err (!%p3201_p12)
}
  0xd2   : > { %s3205_s8 = scalar_lea.vmem %s3887_s22, 1024  ;;  %s3504_s6 = smov [#allocation3]  }
  0xd3   : > { %p3206_p9 = scmp.ne.s32.totalorder %s3887_s22, %s3205_s8  ;;  %s3210_s28 = sshll.u32 %s3504_s6, 4  ;;  %s3211_s28 = int_to_ptr.vmem [resolvable:$false] %s3210_s28 }
  0xd4   : > { %s3212_s4 = scalar_lea.vmem %s3211_s28, 2048  ;;  %p3213_p0 = scmp.lt.s32.totalorder %s3887_s22, %s3211_s28 }
  0xd5   : > { %p3208_p4 = pnand %p3206_p9, %p3192_p1  ;;  %p3214_p6 = scmp.lt.s32.totalorder %s3212_s4, %s3205_s8 }
  0xd7   : > { %p3209_p10 = pneg %p3208_p4  ;;  %p3215_p5 = por %p3214_p6, %p3213_p0 }
  0xd9   : > { %p3216_p13 = pnand %p3215_p5, %p3209_p10 }
  0xdb   : > { %3219 = shalt.err (!%p3216_p13)
}
  0xdc   : > { %s4689_s1 = smov 8   ;;  %s4690_s5 = smov 128  }
  0xdd   : > { %s4691_s3 = sld [smem:[#allocation29_spill]]  ;;  %s4692_s25 = sld [smem:[#allocation42_spill]] }
  0xde   : > { %s4693_s24 = sld [smem:[#allocation44_spill]]  ;;  %s4694_s6 = sld [smem:[#allocation28_spill]] }
  0xdf   : > { %s4695_s28 = sld [smem:[#allocation27_spill]]  ;;  %p4698_p8 = scmp.eq.s32.totalorder %s3496_s21, 0 }
  0xe0   : > { %2907 = dma.hbm_to_vmem [thread:$0]  (!%p3898_p11), %s3892_s20, 1024, %s3887_s22, %s3902_s0, %s4690_s5, %s4690_s5, %s4689_s1  }
  0xe1   : > { %p4699_p9 = scmp.eq.s32.totalorder %s4672_s26, 0  ;;  %s4701_s13 = sld [smem:[#allocation49_spill]] }
  0xe2   : > { %p4703_p11 = scmp.lt.s32.totalorder %s3496_s21, 8 }
  0xe3   : > { %s126_s23 = sadd.s32 1, %s4691_s3  ;;  %p4696_p0 = scmp.lt.s32.totalorder %s4692_s25, 15 }
  0xe4   : > { %p4697_p10 = scmp.lt.s32.totalorder %s4693_s24, 15  ;;  %p133_p12 = scmp.ne.s32.totalorder %s4691_s3, %s4694_s6 }
  0xe5   : > { %s4781_s25 = smov (!%p4696_p0, %s4692_s25), 15  ;;  %p139_p1 = scmp.ne.s32.totalorder %s4694_s6, %s4695_s28 }
  0xe6   : > { %s4783_s24 = smov (!%p4697_p10, %s4693_s24), 15  ;;  %s393_s4 = sand.u32 1, %s4691_s3  }
  0xe7   : > { %s122_s8 = ssub.s32 %s4781_s25, %s4783_s24  ;;  %p135_p2 = por %p133_p12, %p4698_p8 }
  0xe8   : > { %s123_s2 = sor.u32 %s122_s8, %s3713_s18  ;;  %p3950_p4 = por %p139_p1, %p4699_p9 }
  0xe9   : > { %p124_p3 = scmp.eq.s32.totalorder %s123_s2, 0  ;;  %s2493_s20 = sshll.u32 %s393_s4, 4 }
  0xea   : > { %s4700_s19 = scalar_select %p3950_p4, 1, 0 }
  0xeb   : > { %s2495_s22 = sshll.u32 %s4781_s25, 1  ;;  %s4785_s3 = smov (!%p124_p3, %s4691_s3), %s126_s23 }
  0xec   : > { %s405_s0 = sadd.s32 %s2495_s22, %s3747_s27  ;;  %s395_s16 = scalar_lea.vmem [#allocation8], %s2493_s20 }
  0xed   : > { %s2497_s7 = sshll.u32 %s405_s0, 7  ;;  %s408_s6 = sshll.u32 %s395_s16, 4  ;;  %s3963_s6 = int_to_ptr.vmem [resolvable:$true] %s408_s6 }
  0xee   : > { %s4702_s5 = smov %s4701_s13  ;;  %s3961_s18 = scalar_lea.hbm %s4701_s13, %s2497_s7 }
  0xef   : > { %p3967_p6 = pnand %p4703_p11, %p135_p2  ;;  %s3220_s27 = scalar_lea.hbm %s3961_s18, 256 }
  0xf0   : > { %p3221_p5 = scmp.ne.s32.totalorder %s3961_s18, %s3220_s27  ;;  %s3225_s26 = scalar_lea.hbm %s4702_s5, 8192 }
  0xf1   : > { %p3222_p13 = pneg %p3967_p6  ;;  %p3226_p12 = scmp.lt.u32.totalorder %s3961_s18, %s4702_s5 }
  0xf2   : > { %p3227_p1 = scmp.lt.u32.totalorder %s3225_s26, %s3220_s27  ;;  %p3229_p2 = scmp.lt.u32.totalorder %s3220_s27, %s3961_s18 }
  0xf3   : > { %p3223_p0 = pnand %p3222_p13, %p3221_p5 }
  0xf4   : > { %p3228_p8 = por %p3227_p1, %p3226_p12 }
  0xf5   : > { %p3224_p10 = pneg %p3223_p0 }
  0xf6   : > { %p3230_p3 = por %p3229_p2, %p3228_p8 }
  0xf8   : > { %p3231_p9 = pnand %p3230_p3, %p3224_p10 }
  0xfa   : > { %3234 = shalt.err (!%p3231_p9)
}
  0xfb   : > { %s3235_s23 = scalar_lea.vmem %s3963_s6, 256  ;;  %s3505_s8 = smov [#allocation8]  }
  0xfc   : > { %p3236_p11 = scmp.ne.s32.totalorder %s3963_s6, %s3235_s23  ;;  %s3240_s4 = sshll.u32 %s3505_s8, 4  ;;  %s3241_s4 = int_to_ptr.vmem [resolvable:$false] %s3240_s4 }
  0xfd   : > { %s3242_s20 = scalar_lea.vmem %s3241_s4, 512  ;;  %p3243_p4 = scmp.lt.s32.totalorder %s3963_s6, %s3241_s4 }
  0xfe   : > { %p3238_p5 = pnand %p3236_p11, %p3222_p13  ;;  %p3244_p12 = scmp.lt.s32.totalorder %s3242_s20, %s3235_s23 }
 0x100   : > { %p3239_p0 = pneg %p3238_p5  ;;  %p3245_p1 = por %p3244_p12, %p3243_p4 }
 0x102   : > { %p3246_p8 = pnand %p3245_p1, %p3239_p0 }
 0x104   : > { %3249 = shalt.err (!%p3246_p8)
}
 0x105   : > { %s4705_s22 = smov 128   ;;  %s4706_s0 = sld [smem:[#allocation39_spill]] }
 0x106   : > { %2913 = dma.hbm_to_vmem [thread:$0]  (!%p3967_p6), %s3961_s18, 256, %s3963_s6, %s3769_s17, %s4705_s22, %s4705_s22, %s4689_s1  }
 0x10b   : > { %p4707_p13 = scmp.ne.s32.totalorder %s4706_s0, 0 }
 0x10c   : > { %s4003_s28 = sand.u32 (!%p4707_p13), 1, %s3472_s15  }
 0x10d   : > { %420 = sbr.rel (%p4707_p13) target bundleno = 701 (0x2bd), region = 44  ;;  %s2499_s24 = sshll.u32 (!%p4707_p13), %s4003_s28, 6 }
 0x10e   : > { %s423_s27 = scalar_lea.sflag (!%p4707_p13), [#allocation4], %s4003_s28  ;;  %s4007_s13 = scalar_lea.vmem (!%p4707_p13), [#allocation3], %s2499_s24 }
 0x114   : > { %3403 = dma.done.wait (%p3863_p7), %s423_s27, 1024  }
 0x115   : > { %3405 = vsyncadd (%p3863_p7), %s423_s27, 4294966272  ;;  %s4708_s2 = sld [smem:[#allocation37_spill]]  ;;  %s4709_s17 = sld [smem:[#allocation30_spill]] }
 0x116   : > { %s4710_s1 = sld [smem:[#allocation43_spill]] }
 0x11b   : > { %s431_s6 = sand.u32 1, %s4708_s2   ;;  %s433_s18 = sand.u32 1, %s4709_s17  }
 0x11c   : > { %s4015_s16 = sshll.u32 %s433_s18, 4  ;;  %s432_s26 = scalar_lea.sflag [#allocation7], %s431_s6 }
 0x11d   : > { %s435_s7 = scalar_lea.vmem [#allocation6], %s4015_s16  ;;  %p4711_p4 = scmp.ne.s32.totalorder %s4710_s1, 0 }
 0x11f   : > { %3407 = dma.done.wait (%p4711_p4), %s432_s26, 256  }
 0x120   : > { %3409 = vsyncadd (%p4711_p4), %s432_s26, 4294967040  ;;  %s4712_s25 = sld [smem:[#allocation28_spill]]  ;;  %p4713_p7 = scmp.ne.s32.totalorder %s4700_s19, 0 }
 0x126   : > { %s442_s9 = sand.u32 1, %s4712_s25  }
 0x127   : > { %s4025_s23 = sshll.u32 %s442_s9, 4 }
 0x128   : > { %s444_s8 = scalar_lea.vmem [#allocation8], %s4025_s23 }
 0x129   : > { %3411 = dma.done.wait (%p4713_p7), %s432_s26, 256  }
 0x12a   : > { %3413 = vsyncadd (%p4713_p7), %s432_s26, 4294967040  ;;  %p4714_p6 = scmp.eq.s32.totalorder %s4708_s2, 0 }
 0x12c   : > { %3415 = dma.done.wait (%p4714_p6), [#allocation10], 32   ;;  %p4715_p10 = pmov %p4714_p6 }
 0x12d   : > { %p4716_p2 = pmov %p4714_p6 }
 0x12e   : > { %3417 = vsyncadd (%p4715_p10), [#allocation10], 4294967264 }
 0x12f   : > { %3419 = dma.done.wait (%p4716_p2), [#allocation13], 1152   ;;  %p4717_p3 = pmov %p4716_p2 }
 0x130   : > { %s4718_s4 = sld [smem:[#allocation26_spill]]  ;;  %s4041_s22 = scalar_lea.vmem [#allocation14], %s2499_s24 }
 0x131   : > { %3421 = vsyncadd (%p4717_p3), [#allocation13], 4294966144  ;;  %s4719_s27 = sld [smem:[#allocation33_spill]] }
 0x136   : > { %s499_s20 = sand.u32 1, %s4718_s4  }
 0x137   : > { %s4043_s0 = scalar_lea.vmem [#allocation15], %s499_s20  ;;  %s4045_s19 = scalar_lea.vmem [#allocation17], %s499_s20 }
 0x138   : > { %p2506_p9 = scmp.ne.s32.totalorder %s4719_s27, 0 }
 0x139   : > { %vm523_vm0 = vcmask (!%p2506_p9), 57344   ;;  %v3506_v0 = vmov (!%p2506_p9), 0.0  }
 0x13a   : > { %522 = sbr.rel (%p2506_p9) target bundleno = 321 (0x141), region = 72  ;;  %524 = vst.msk [vmem:[%s4043_s0] sm:$0x1] (!%p2506_p9), %vm523_vm0, %v3506_v0  ;;  %525 = vst.msk [vmem:[%s4045_s19] sm:$0x1] (!%p2506_p9), %vm523_vm0, %v3506_v0 }
 0x141 PF: > { %v4050_v1 = vld [vmem:[#allocation12 + $0x20] sm:$0xff]  ;;  %s4720_s2 = sld [smem:[#allocation33_spill]]  ;;  %v790_v2 = vld [vmem:[#allocation12 + $0x8] sm:$0xff]  ;;  %v4055_v4 = vld [vmem:[#allocation9] ss:$0 sm:$0xff]  ;;  %v627_v7 = vlaneseq  ;;  %vm568_vm1 = vcmask 64512  }
 0x142   : > { %v571_v3 = vld [vmem:[%s4007_s13] sm:$0xff]  ;;  %2734 = vmatprep.subr.mxu0 %v4050_v1  ;;  %2678 = vmatprep.subr.mxu1 %v790_v2  ;;  %v572_v6 = vld [vmem:[%s4007_s13 + $0x8] sm:$0xff]  ;;  %v573_v16 = vld [vmem:[%s4007_s13 + $0x10] sm:$0xff]  ;;  %s2223_s9 = sshll.u32 %s4041_s22, 4  ;;  %s4738_s4 = sld [smem:[#allocation53_spill]]  ;;  %s4399_s9 = int_to_ptr.vmem [resolvable:$true] %s2223_s9 }
 0x143   : > { %v4057_v5 = vld [vmem:[#allocation11] ss:$0 sm:$0xff]  ;;  %2735 = vmatpush3.msra.mxu0 %v4050_v1  ;;  %v586_v8 = vmul.f32 %v4055_v4, %v571_v3  ;;  %2679 = vmatpush3.msra.mxu1 %v790_v2  ;;  %v587_v9 = vmul.f32 %v4055_v4, %v572_v6  ;;  %v527_v11 = vld [vmem:[%s435_s7 + $0x8] sm:$0xff]  ;;  %v588_v20 = vmul.f32 %v4055_v4, %v573_v16  ;;  %v4087_v25 = vshrl.u32 %v627_v7, 7  ;;  %v577_v35 = vld [vmem:[%s4007_s13 + $0x30] sm:$0xff]  ;;  %s2200_s27 = scalar_lea.sflag [#allocation5], %s4003_s28 }
 0x144   : > { %v526_v10 = vld [vmem:[%s435_s7] sm:$0xff]  ;;  %v536_v14 = vmul.f32 %v4055_v4, %v527_v11  ;;  %v574_v17 = vld [vmem:[%s4007_s13 + $0x18] sm:$0xff]  ;;  %v576_v27 = vld [vmem:[%s4007_s13 + $0x28] sm:$0xff]  ;;  %v592_v47 = vmul.f32 %v4055_v4, %v577_v35  ;;  %p4739_p12 = scmp.ne.s32.totalorder %s4682_s10, 0 }
 0x145   : > { %v4070_v12 = vld [vmem:[#allocation12] sm:$0xff]  ;;  %v535_v13 = vmul.f32 %v4055_v4, %v526_v10  ;;  %v4075_v15 = vld [vmem:[#allocation12 + $0x28] sm:$0xff]  ;;  %v601_v18 = vadd.f32 %v4057_v5, %v586_v8  ;;  %v602_v19 = vadd.f32 %v4057_v5, %v587_v9  ;;  %v589_v21 = vmul.f32 %v4055_v4, %v574_v17  ;;  %v578_v39 = vld [vmem:[%s4007_s13 + $0x38] sm:$0xff] }
 0x146   : > { %2692 = vmatprep.subr.mxu1 %v4070_v12  ;;  %2748 = vmatprep.subr.mxu0 %v4075_v15  ;;  %v575_v22 = vld [vmem:[%s4007_s13 + $0x20] sm:$0xff]  ;;  %v545_v24 = vadd.f32 %v4057_v5, %v536_v14  ;;  %v603_v31 = vadd.f32 %v4057_v5, %v588_v20  ;;  %v591_v38 = vmul.f32 %v4055_v4, %v576_v27  ;;  %v629_v44 = vadd.s32 8, %v4087_v25  ;;  %v555_v52 = vld [vmem:[%s444_s8 + $0x8] sm:$0xff]  ;;  %s4737_s13 = sld [smem:[#allocation34_spill]] }
 0x147   : > { %p548_p11 = scmp.gt.s32.totalorder %s4720_s2, 0  ;;  %p562_p5 = scmp.lt.s32.totalorder %s4720_s2, 3  ;;  %v544_v23 = vadd.f32 %v4057_v5, %v535_v13  ;;  %v590_v26 = vmul.f32 %v4055_v4, %v575_v22  ;;  %v609_v28 = vmax.f32 %v601_v18, 0.0  ;;  %v610_v29 = vmax.f32 %v602_v19, 0.0  ;;  %v554_v40 = vld [vmem:[%s444_s8] sm:$0xff] }
 0x148   : > { %v547_v33 = vmax.f32 %v545_v24, 0.0  ;;  %v604_v34 = vadd.f32 %v4057_v5, %v589_v21  ;;  %v611_v36 = vmax.f32 %v603_v31, 0.0  ;;  %v606_v46 = vadd.f32 %v4057_v5, %v591_v38  ;;  %v1694_v0 = vld [vmem:[#allocation12 + $0x30] sm:$0xff]  ;;  %v1841_v24 = vld [vmem:[#allocation12 + $0x38] sm:$0xff]  ;;  %s2584_s16 = sshll.u32 %s4720_s2, 3  ;;  %s3250_s2 = scalar_lea.vmem %s4399_s9, 1024 }
 0x149   : > { %s549_s24 = scalar_select %p548_p11, 1, 0  ;;  %v546_v32 = vmax.f32 %v544_v23, 0.0  ;;  %617 = vst.msk [vmem:[#allocation2 + $0x18] sm:$0xff] %vm568_vm1, %v609_v28  ;;  %618 = vst.msk [vmem:[#allocation2 + $0x20] sm:$0xff] %vm568_vm1, %v610_v29  ;;  %v605_v37 = vadd.f32 %v4057_v5, %v590_v26  ;;  %v593_v48 = vmul.f32 %v4055_v4, %v578_v39  ;;  %v556_v49 = vmul.f32 %v4055_v4, %v554_v40  ;;  %v1082_v14 = vld [vmem:[#allocation12 + $0x10] sm:$0xff] }
 0x14a   : > { %s4094_s1 = scalar_select %p562_p5, 1, 0  ;;  %v612_v43 = vmax.f32 %v604_v34, 0.0  ;;  %619 = vst.msk [vmem:[#allocation2 + $0x28] sm:$0xff] %vm568_vm1, %v611_v36  ;;  %v614_v50 = vmax.f32 %v606_v46, 0.0  ;;  %v607_v51 = vadd.f32 %v4057_v5, %v592_v47  ;;  %v647_v55 = vand.u32 15, %v629_v44 }
 0x14b   : > { %s550_s17 = scvt.s32.f32 %s549_s24  ;;  %v613_v45 = vmax.f32 %v605_v37, 0.0  ;;  %v608_v53 = vadd.f32 %v4057_v5, %v593_v48  ;;  %v558_v54 = vadd.f32 %v4057_v5, %v556_v49  ;;  %v631_v60 = vadd.s32 24, %v4087_v25  ;;  %p3251_p0 = scmp.ne.s32.totalorder %s4399_s9, %s3250_s2 }
 0x14c   : > { %s564_s18 = scvt.s32.f32 %s4094_s1  ;;  %620 = vst.msk [vmem:[#allocation2 + $0x30] sm:$0xff] %vm568_vm1, %v612_v43  ;;  %622 = vst.msk [vmem:[#allocation2 + $0x40] sm:$0xff] %vm568_vm1, %v614_v50  ;;  %v615_v56 = vmax.f32 %v607_v51, 0.0  ;;  %v557_v63 = vmul.f32 %v4055_v4, %v555_v52  ;;  %vm4139_vm2 = vcmp.le.s32.totalorder %v647_v55, 14  ;;  %v633_v13 = vadd.s32 40, %v4087_v25  ;;  %s2585_s26 = sshll.u32 %s4737_s13, 5 }
 0x14d   : > { %v551_v30 = vstv %s550_s17  ;;  %621 = vst.msk [vmem:[#allocation2 + $0x38] sm:$0xff] %vm568_vm1, %v613_v45  ;;  %v616_v61 = vmax.f32 %v608_v53, 0.0  ;;  %v560_v62 = vmax.f32 %v558_v54, 0.0  ;;  %v640_v17 = vand.u32 15, %v4087_v25  ;;  %v1237_v53 = vld [vmem:[#allocation12 + $0x18] sm:$0xff]  ;;  %s2220_s7 = sadd.s32 %s2585_s26, %s2584_s16  ;;  %p3252_p1 = pnand %p3251_p0, %p4739_p12 }
 0x14e   : > { %v552_v41 = vmul.f32 %v551_v30, %v546_v32  ;;  %v553_v42 = vmul.f32 %v551_v30, %v547_v33  ;;  %v565_v57 = vstv %s564_s18  ;;  %623 = vst.msk [vmem:[#allocation2 + $0x48] sm:$0xff] %vm568_vm1, %v615_v56  ;;  %v559_v6 = vadd.f32 %v4057_v5, %v557_v63  ;;  %s2586_s25 = sshll.u32 %s2220_s7, 7  ;;  %s3507_s24 = smov [#allocation14]  }
 0x14f   : > { %624 = vst.msk [vmem:[#allocation2 + $0x50] sm:$0xff] %vm568_vm1, %v616_v61  ;;  %v566_v3 = vmul.f32 %v565_v57, %v560_v62  ;;  %v661_v5 = vand.u32 15, %v631_v60  ;;  %v675_v21 = vand.u32 15, %v633_v13  ;;  %v635_v22 = vadd.s32 56, %v4087_v25  ;;  %v1996_v60 = vld [vmem:[#allocation12 + $0x40] sm:$0xff]  ;;  %s4397_s20 = scalar_lea.hbm %s4738_s4, %s2586_s25  ;;  %p3253_p8 = pneg %p3252_p1 }
 0x150   : > { %569 = vst.msk [vmem:[#allocation2 + $0x8] sm:$0xff] %vm568_vm1, %v552_v41  ;;  %570 = vst.msk [vmem:[#allocation2 + $0x10] sm:$0xff] %vm568_vm1, %v553_v42  ;;  %v1375_v58 = vld [vmem:[#allocation2 + $0x18] sm:$0xff]  ;;  %v1376_v59 = vld [vmem:[#allocation2 + $0x20] sm:$0xff]  ;;  %v630_v23 = vadd.s32 16, %v4087_v25  ;;  %vm4180_vm4 = vcmp.ge.s32.totalorder %v640_v17, 1 }
 0x151   : > { %2736 = vmatprep.mubr.msk.f32.mxu0 %vm568_vm1, %v1375_v58  ;;  %v4127_v2 = vld [vmem:[#allocation2 + $0x28] sm:$0xff]  ;;  %v4137_v9 = vld [vmem:[#allocation2 + $0x19] sm:$0xff]  ;;  %625 = vst.msk [vmem:[#allocation2 + $0x58] sm:$0xff] %vm568_vm1, %v566_v3  ;;  %vm4160_vm3 = vcmp.le.s32.totalorder %v661_v5, 14  ;;  %vm4186_vm5 = vcmp.le.s32.totalorder %v675_v21, 14  ;;  %v689_v33 = vand.u32 15, %v635_v22 }
 0x152   : > { %2737 = vmatmul.mubr.msk.f32.vlgmr.msra.gmra.mrb[0].mxu0 %vm568_vm1, %v1376_v59  ;;  %v4143_v11 = vld [vmem:[#allocation2 + $0x21] sm:$0xff]  ;;  %v632_v34 = vadd.s32 32, %v4087_v25  ;;  %v654_v35 = vand.u32 15, %v630_v23  ;;  %v634_v43 = vadd.s32 48, %v4087_v25  ;;  %s3254_s17 = sshll.u32 %s3507_s24, 4  ;;  %s3255_s17 = int_to_ptr.vmem [resolvable:$false] %s3254_s17 }
 0x153   : > { %2749 = vmatpush3.msra.mxu0 %v4075_v15  ;;  %2739 = vmatprep.mubr.msk.f32.mxu0 %vm568_vm1, %v4127_v2  ;;  %v4134_v4 = vld [vmem:[#allocation2 + $0x30] sm:$0xff]  ;;  %v561_v15 = vmax.f32 %v559_v6, 0.0  ;;  %v1531_v16 = vsel %vm4139_vm2, %v4143_v11, 0.0  ;;  %v4198_v36 = vld [vmem:[#allocation2 + $0x40] sm:$0xff]  ;;  %vm4209_vm6 = vcmp.le.s32.totalorder %v689_v33, 14  ;;  %s3256_s1 = scalar_lea.vmem %s3255_s17, 2048  ;;  %p3257_p13 = scmp.lt.s32.totalorder %s4399_s9, %s3255_s17 }
 0x154   : > { %2762 = vmatprep.subr.mxu0 %v1694_v0  ;;  %v4158_v19 = vld [vmem:[#allocation2 + $0x29] sm:$0xff]  ;;  %v4178_v27 = vld [vmem:[#allocation2 + $0x38] sm:$0xff]  ;;  %v668_v42 = vand.u32 15, %v632_v34  ;;  %vm4218_vm7 = vcmp.ge.s32.totalorder %v654_v35, 1  ;;  %v682_v51 = vand.u32 15, %v634_v43  ;;  %p3258_p4 = scmp.lt.s32.totalorder %s3256_s1, %s3250_s2 }
 0x155   : > { %v567_v18 = vmul.f32 %v565_v57, %v561_v15  ;;  %v4184_v29 = vld [vmem:[#allocation2 + $0x39] sm:$0xff]  ;;  %v4190_v31 = vld [vmem:[#allocation2 + $0x41] sm:$0xff]  ;;  %v4249_v55 = vld [vmem:[#allocation2 + $0x2f] sm:$0xff] }
 0x156   : > { %2740 = vmatmul.mubr.msk.f32.gmra.mrb[2].mxu0 %vm568_vm1, %v4134_v4  ;;  %v1535_v37 = vsel %vm4186_vm5, %v4190_v31, 0.0  ;;  %v4207_v39 = vld [vmem:[#allocation2 + $0x49] sm:$0xff]  ;;  %vm4239_vm8 = vcmp.ge.s32.totalorder %v668_v42, 1  ;;  %v4244_v52 = vld [vmem:[#allocation2 + $0x37] sm:$0xff]  ;;  %v751_v54 = vld [vmem:[#allocation2 + $0x1f] sm:$0xff]  ;;  %vm4257_vm9 = vcmp.ge.s32.totalorder %v682_v51, 1  ;;  %p3259_p7 = por %p3258_p4, %p3257_p13 }
 0x157   : > { %v781_v7 = vld [vmem:[#allocation2 + $0x8] sm:$0xff]  ;;  %v782_v8 = vld [vmem:[#allocation2 + $0x10] sm:$0xff]  ;;  %2750 = vmatprep.mubr.msk.f32.mxu0 %vm568_vm1, %v4137_v9  ;;  %626 = vst.msk [vmem:[#allocation2 + $0x60] sm:$0xff] %vm568_vm1, %v567_v18  ;;  %v1687_v57 = vsel %vm4218_vm7, %v4244_v52, 0.0  ;;  %v1680_v61 = vld [vmem:[#allocation2 + $0x3f] sm:$0xff]  ;;  %v778_v62 = vsel %vm4257_vm9, %v4244_v52, 0.0 }
 0x158   : > { %2680 = vmatprep.mubr.msk.f32.mxu1 %vm568_vm1, %v781_v7  ;;  %v748_v32 = vld [vmem:[#allocation2 + $0x7] sm:$0xff]  ;;  %v4213_v41 = vld [vmem:[#allocation2 + $0x51] sm:$0xff]  ;;  %v1232_v22 = vsel %vm4239_vm8, %v4244_v52, 0.0  ;;  %p3260_p6 = pnand %p3259_p7, %p3253_p8 }
 0x159   : > { %2681 = vmatmul.mubr.msk.f32.vlgmr.msra.gmra.mrb[0].mxu1 %vm568_vm1, %v782_v8  ;;  %v772_v38 = vsel %vm4180_vm4, %v748_v32, 0.0  ;;  %v4222_v45 = vld [vmem:[#allocation2 + $0x17] sm:$0xff]  ;;  %v4224_v46 = vld [vmem:[#allocation2 + $0x27] sm:$0xff]  ;;  %v749_v47 = vld [vmem:[#allocation2 + $0xf] sm:$0xff]  ;;  %v1537_v25 = vsel %vm4209_vm6, %v4213_v41, 0.0 }
 0x15a   : > { %2693 = vmatpush3.msra.mxu1 %v4070_v12  ;;  %2683 = vmatprep.mubr.msk.f32.mxu1 %vm568_vm1, %v1375_v58  ;;  %v4164_v12 = vld [vmem:[#allocation2 + $0x31] sm:$0xff]  ;;  %v774_v48 = vsel %vm4218_vm7, %v4222_v45, 0.0  ;;  %v1685_v49 = vsel %vm4180_vm4, %v4224_v46, 0.0  ;;  %v776_v56 = vsel %vm4239_vm8, %v4224_v46, 0.0  ;;  %v1049_v6 = vld [vmem:[#allocation2 + $0x9] sm:$0xff]  ;;  %v1228_v15 = vsel %vm4180_vm4, %v4222_v45, 0.0 }
 0x15b   : > { %2706 = vmatprep.subr.mxu1 %v1082_v14  ;;  %2751 = vmatmul.mubr.msk.f32.vlgmr.msra.gmra.mrb[0].mxu0 %vm568_vm1, %v1531_v16  ;;  %v1533_v26 = vsel %vm4160_vm3, %v4164_v12, 0.0  ;;  %v1682_v3 = vld [vmem:[#allocation2 + $0x4f] sm:$0xff]  ;;  %v1838_v16 = vld [vmem:[#allocation2 + $0x58] sm:$0xff]  ;;  %v1230_v18 = vsel %vm4218_vm7, %v4224_v46, 0.0  ;;  %v1988_v21 = vsel %vm4139_vm2, %v4164_v12, 0.0 }
 0x15c   : > { %2763 = vmatpush3.msra.mxu0 %v1694_v0  ;;  %2753 = vmatprep.mubr.msk.f32.mxu0 %vm568_vm1, %v4158_v19  ;;  %v1683_v0 = vld [vmem:[#allocation2 + $0x57] sm:$0xff] }
 0x15d   : > { %2684 = vmatmul.mubr.msk.f32.gmra.mrb[2].mxu1 %vm568_vm1, %v1376_v59  ;;  %2776 = vmatprep.subr.mxu0 %v1841_v24  ;;  %v4262_v59 = vld [vmem:[#allocation2 + $0x47] sm:$0xff]  ;;  %v1050_v7 = vld [vmem:[#allocation2 + $0x11] sm:$0xff]  ;;  %v1691_v8 = vsel %vm4257_vm9, %v1683_v0, 0.0 }
 0x15e   : > { %2686 = vmatprep.mubr.msk.f32.mxu1 %vm568_vm1, %v4127_v2  ;;  %v1689_v63 = vsel %vm4239_vm8, %v4262_v59, 0.0  ;;  %v1074_v5 = vsel %vm4139_vm2, %v1050_v7, 0.0  ;;  %v1684_v13 = vld [vmem:[#allocation2 + $0x5f] sm:$0xff]  ;;  %v1234_v10 = vsel %vm4257_vm9, %v4262_v59, 0.0 }
 0x15f   : > { %2754 = vmatmul.mubr.msk.f32.gmra.mrb[2].mxu0 %vm568_vm1, %v1533_v26  ;;  %v1839_v17 = vld [vmem:[#allocation2 + $0x60] sm:$0xff] }
 0x160   : > { %2756 = vmatprep.mubr.msk.f32.mxu0 %vm568_vm1, %v4184_v29  ;;  %v1986_v20 = vld [vmem:[#allocation2 + $0x61] sm:$0xff] }
 0x161   : > { %2687 = vmatmul.mubr.msk.f32.gmra.mrb[4].mxu1 %vm568_vm1, %v4134_v4  ;;  %v1994_v23 = vsel %vm4209_vm6, %v1986_v20, 0.0 }
 0x162   : > { %2689 = vmatprep.mubr.msk.f32.mxu1 %vm568_vm1, %v4178_v27 }
 0x163   : > { %2757 = vmatmul.mubr.msk.f32.gmra.mrb[4].mxu0 %vm568_vm1, %v1535_v37 }
 0x164   : > { %2759 = vmatprep.mubr.msk.f32.mxu0 %vm568_vm1, %v4207_v39 }
 0x165   : > { %2690 = vmatmul.mubr.msk.f32.gmra.mrb[6].mxu1 %vm568_vm1, %v4198_v36 }
 0x166   : > { %2694 = vmatprep.mubr.msk.f32.mxu1 %vm568_vm1, %v772_v38 }
 0x167   : > { %2760 = vmatmul.mubr.msk.f32.gmra.mrb[6].mxu0 %vm568_vm1, %v1537_v25 }
 0x168   : > { %2764 = vmatprep.mubr.msk.f32.mxu0 %vm568_vm1, %v1685_v49 }
 0x169   : > { %2695 = vmatmul.mubr.msk.f32.vlgmr.msra.gmra.mrb[0].mxu1 %vm568_vm1, %v749_v47 }
 0x16a   : > { %2707 = vmatpush3.msra.mxu1 %v1082_v14  ;;  %2697 = vmatprep.mubr.msk.f32.mxu1 %vm568_vm1, %v774_v48  ;;  %v1076_v14 = vsel %vm4160_vm3, %v4143_v11, 0.0  ;;  %v1078_v11 = vsel %vm4186_vm5, %v4164_v12, 0.0  ;;  %v1985_v12 = vld [vmem:[#allocation2 + $0x59] sm:$0xff] }
 0x16b   : > { %2720 = vmatprep.subr.mxu1 %v1237_v53  ;;  %2765 = vmatmul.mubr.msk.f32.vlgmr.msra.gmra.mrb[0].mxu0 %vm568_vm1, %v4249_v55 }
 0x16c   : > { %2777 = vmatpush3.msra.mxu0 %v1841_v24  ;;  %2767 = vmatprep.mubr.msk.f32.mxu0 %vm568_vm1, %v1687_v57 }
 0x16d   : > { %2698 = vmatmul.mubr.msk.f32.gmra.mrb[2].mxu1 %vm568_vm1, %v751_v54  ;;  %2790 = vmatprep.subr.mxu0 %v1996_v60 }
 0x16e   : > { %2700 = vmatprep.mubr.msk.f32.mxu1 %vm568_vm1, %v776_v56 }
 0x16f   : > { %2768 = vmatmul.mubr.msk.f32.gmra.mrb[2].mxu0 %vm568_vm1, %v1680_v61 }
 0x170   : > { %2770 = vmatprep.mubr.msk.f32.mxu0 %vm568_vm1, %v1689_v63 }
 0x171   : > { %2701 = vmatmul.mubr.msk.f32.gmra.mrb[4].mxu1 %vm568_vm1, %v4249_v55 }
 0x172   : > { %2703 = vmatprep.mubr.msk.f32.mxu1 %vm568_vm1, %v778_v62 }
 0x173   : > { %2771 = vmatmul.mubr.msk.f32.gmra.mrb[4].mxu0 %vm568_vm1, %v1682_v3 }
 0x174   : > { %2773 = vmatprep.mubr.msk.f32.mxu0 %vm568_vm1, %v1691_v8 }
 0x175   : > { %2704 = vmatmul.mubr.msk.f32.gmra.mrb[6].mxu1 %vm568_vm1, %v1680_v61 }
 0x176   : > { %2708 = vmatprep.mubr.msk.f32.mxu1 %vm568_vm1, %v1049_v6 }
 0x177   : > { %2774 = vmatmul.mubr.msk.f32.gmra.mrb[6].mxu0 %vm568_vm1, %v1684_v13 }
 0x178   : > { %2778 = vmatprep.mubr.msk.f32.mxu0 %vm568_vm1, %v4127_v2  ;;  %v1080_v2 = vsel %vm4209_vm6, %v4190_v31, 0.0 }
 0x179   : > { %2709 = vmatmul.mubr.msk.f32.vlgmr.msra.gmra.mrb[0].mxu1 %vm568_vm1, %v1074_v5 }
 0x17a   : > { %2721 = vmatpush3.msra.mxu1 %v1237_v53  ;;  %2711 = vmatprep.mubr.msk.f32.mxu1 %vm568_vm1, %v4137_v9  ;;  %v1836_v9 = vld [vmem:[#allocation2 + $0x48] sm:$0xff] }
 0x17b   : > { %2804 = vmatprep.subr.mxu1 %v4050_v1  ;;  %2779 = vmatmul.mubr.msk.f32.vlgmr.msra.gmra.mrb[0].mxu0 %vm568_vm1, %v4134_v4  ;;  %v1837_v4 = vld [vmem:[#allocation2 + $0x50] sm:$0xff] }
 0x17c   : > { %2791 = vmatpush3.msra.mxu0 %v1996_v60  ;;  %2781 = vmatprep.mubr.msk.f32.mxu0 %vm568_vm1, %v4178_v27 }
 0x17d   : > { %2712 = vmatmul.mubr.msk.f32.gmra.mrb[2].mxu1 %vm568_vm1, %v1076_v14 }
 0x17e   : > { %2714 = vmatprep.mubr.msk.f32.mxu1 %vm568_vm1, %v4158_v19 }
 0x17f   : > { %2782 = vmatmul.mubr.msk.f32.gmra.mrb[2].mxu0 %vm568_vm1, %v4198_v36 }
 0x180   : > { %2784 = vmatprep.mubr.msk.f32.mxu0 %vm568_vm1, %v1836_v9 }
 0x181   : > { %2715 = vmatmul.mubr.msk.f32.gmra.mrb[4].mxu1 %vm568_vm1, %v1078_v11 }
 0x182   : > { %2717 = vmatprep.mubr.msk.f32.mxu1 %vm568_vm1, %v4184_v29 }
 0x183   : > { %2785 = vmatmul.mubr.msk.f32.gmra.mrb[4].mxu0 %vm568_vm1, %v1837_v4 }
 0x184   : > { %2787 = vmatprep.mubr.msk.f32.mxu0 %vm568_vm1, %v1838_v16 }
 0x185   : > { %2718 = vmatmul.mubr.msk.f32.gmra.mrb[6].mxu1 %vm568_vm1, %v1080_v2 }
 0x186   : > { %2722 = vmatprep.mubr.msk.f32.mxu1 %vm568_vm1, %v1228_v15 }
 0x187   : > { %2788 = vmatmul.mubr.msk.f32.gmra.mrb[6].mxu0 %vm568_vm1, %v1839_v17 }
 0x188   : > { %2792 = vmatprep.mubr.msk.f32.mxu0 %vm568_vm1, %v4158_v19  ;;  %v1992_v19 = vsel %vm4186_vm5, %v4213_v41, 0.0 }
 0x189   : > { %2723 = vmatmul.mubr.msk.f32.vlgmr.msra.gmra.mrb[0].mxu1 %vm568_vm1, %v751_v54 }
 0x18a   : > { %2805 = vmatpush3.msra.mxu1 %v4050_v1  ;;  %2725 = vmatprep.mubr.msk.f32.mxu1 %vm568_vm1, %v1230_v18  ;;  %v1990_v1 = vsel %vm4160_vm3, %v4190_v31, 0.0 }
 0x18b   : > { %2793 = vmatmul.mubr.msk.f32.vlgmr.msra.gmra.mrb[0].mxu0 %vm568_vm1, %v1988_v21 }
 0x18c   : > { %2795 = vmatprep.mubr.msk.f32.mxu0 %vm568_vm1, %v4184_v29 }
 0x18d   : > { %2726 = vmatmul.mubr.msk.f32.gmra.mrb[2].mxu1 %vm568_vm1, %v4249_v55 }
 0x18e   : > { %2728 = vmatprep.mubr.msk.f32.mxu1 %vm568_vm1, %v1232_v22 }
 0x18f   : > { %2796 = vmatmul.mubr.msk.f32.gmra.mrb[2].mxu0 %vm568_vm1, %v1990_v1 }
 0x190   : > { %2798 = vmatprep.mubr.msk.f32.mxu0 %vm568_vm1, %v4207_v39 }
 0x191   : > { %2729 = vmatmul.mubr.msk.f32.gmra.mrb[4].mxu1 %vm568_vm1, %v1680_v61 }
 0x192   : > { %2731 = vmatprep.mubr.msk.f32.mxu1 %vm568_vm1, %v1234_v10 }
 0x193   : > { %2799 = vmatmul.mubr.msk.f32.gmra.mrb[4].mxu0 %vm568_vm1, %v1992_v19 }
 0x194   : > { %2801 = vmatprep.mubr.msk.f32.mxu0 %vm568_vm1, %v1985_v12 }
 0x195   : > { %2732 = vmatmul.mubr.msk.f32.gmra.mrb[6].mxu1 %vm568_vm1, %v1682_v3 }
 0x196   : > { %2742 = vmatprep.mubr.msk.f32.mxu1 %vm568_vm1, %v4178_v27 }
 0x197   : > { %2802 = vmatmul.mubr.msk.f32.gmra.mrb[6].mxu0 %vm568_vm1, %v1994_v23 }
 0x199   : > { %2743 = vmatmul.mubr.msk.f32.vlgmr.msra.gmra.mrb[4].mxu1 %vm568_vm1, %v4198_v36 }
 0x19a   : > { %2745 = vmatprep.mubr.msk.f32.mxu1 %vm568_vm1, %v1836_v9 }
 0x19d   : > { %2746 = vmatmul.mubr.msk.f32.gmra.mrb[6].mxu1 %vm568_vm1, %v1837_v4 }
 0x25c   : > { %v2724_v24 = vpop.f32.mrb[0].mxu1 }
 0x25d   : > { %v1328_v26 = vpop.f32.mrb[1].mxu1 }
 0x25e   : > { %v2794_v27 = vpop.f32.mrb[0].mxu0 }
 0x25f   : > { %v2806_v30 = vadd.f32 %v2794_v27, %v2724_v24  ;;  %v2087_v31 = vpop.f32.mrb[1].mxu0 }
 0x260   : > { %v2727_v28 = vpop.f32.mrb[2].mxu1  ;;  %v2807_v32 = vadd.f32 %v2087_v31, %v1328_v26 }
 0x261   : > { %v1338_v29 = vpop.f32.mrb[3].mxu1  ;;  %2135 = vst.msk [vmem:[%s4041_s22 + $0x8] sm:$0xff] %vm568_vm1, %v2806_v30  ;;  %v2144_v33 = vsel %vm568_vm1, %v2806_v30, 0.0  ;;  %v2169_v34 = vmul.f32 %v2806_v30, %v2806_v30 }
 0x262   : > { %2134 = vst.msk [vmem:[%s4041_s22] sm:$0xff] %vm568_vm1, %v2807_v32  ;;  %v2143_v35 = vsel %vm568_vm1, %v2807_v32, 0.0  ;;  %v2168_v36 = vmul.f32 %v2807_v32, %v2807_v32  ;;  %v2797_v37 = vpop.f32.mrb[2].mxu0 }
 0x263   : > { %v2177_v38 = vsel %vm568_vm1, %v2169_v34, 0.0  ;;  %v2145_v39 = vadd.f32 %v2144_v33, %v2143_v35  ;;  %v2808_v40 = vadd.f32 %v2797_v37, %v2727_v28  ;;  %v2097_v41 = vpop.f32.mrb[3].mxu0 }
 0x264   : > { %v2176_v42 = vsel %vm568_vm1, %v2168_v36, 0.0  ;;  %v2809_v43 = vadd.f32 %v2097_v41, %v1338_v29 }
 0x265   : > { %v2178_v44 = vadd.f32 %v2177_v38, %v2176_v42  ;;  %2137 = vst.msk [vmem:[%s4041_s22 + $0x18] sm:$0xff] %vm568_vm1, %v2808_v40  ;;  %v2171_v45 = vmul.f32 %v2808_v40, %v2808_v40  ;;  %v2148_v50 = vsel %vm568_vm1, %v2808_v40, 0.0 }
 0x266   : > { %2136 = vst.msk [vmem:[%s4041_s22 + $0x10] sm:$0xff] %vm568_vm1, %v2809_v43  ;;  %v2146_v46 = vsel %vm568_vm1, %v2809_v43, 0.0  ;;  %v2170_v47 = vmul.f32 %v2809_v43, %v2809_v43  ;;  %v2800_v25 = vpop.f32.mrb[4].mxu0 }
 0x267   : > { %v2147_v48 = vadd.f32 %v2146_v46, %v2145_v39  ;;  %v2107_v49 = vpop.f32.mrb[5].mxu0  ;;  %v2181_v55 = vsel %vm568_vm1, %v2171_v45, 0.0 }
 0x268   : > { %v2179_v51 = vsel %vm568_vm1, %v2170_v47, 0.0 }
 0x269   : > { %v2180_v52 = vadd.f32 %v2179_v51, %v2178_v44  ;;  %v2149_v54 = vadd.f32 %v2148_v50, %v2147_v48 }
 0x26a   : > { %v2803_v58 = vpop.f32.mrb[6].mxu0 }
 0x26b   : > { %v2182_v60 = vadd.f32 %v2181_v55, %v2180_v52  ;;  %v2117_v61 = vpop.f32.mrb[7].mxu0 }
 0x26c   : > { %v2744_v53 = vpop.f32.mrb[4].mxu1 }
 0x26d   : > { %v2810_v56 = vadd.f32 %v2800_v25, %v2744_v53  ;;  %v1495_v57 = vpop.f32.mrb[5].mxu1 }
 0x26e   : > { %v2811_v59 = vadd.f32 %v2107_v49, %v1495_v57 }
 0x26f   : > { %2139 = vst.msk [vmem:[%s4041_s22 + $0x28] sm:$0xff] %vm568_vm1, %v2810_v56  ;;  %v2173_v62 = vmul.f32 %v2810_v56, %v2810_v56  ;;  %v2152_v5 = vsel %vm568_vm1, %v2810_v56, 0.0 }
 0x270   : > { %2138 = vst.msk [vmem:[%s4041_s22 + $0x20] sm:$0xff] %vm568_vm1, %v2811_v59  ;;  %v2150_v63 = vsel %vm568_vm1, %v2811_v59, 0.0  ;;  %v2172_v0 = vmul.f32 %v2811_v59, %v2811_v59  ;;  %v2747_v3 = vpop.f32.mrb[6].mxu1 }
 0x271   : > { %v2151_v6 = vadd.f32 %v2150_v63, %v2149_v54  ;;  %v2812_v7 = vadd.f32 %v2803_v58, %v2747_v3  ;;  %v1505_v8 = vpop.f32.mrb[7].mxu1  ;;  %v2185_v2 = vsel %vm568_vm1, %v2173_v62, 0.0 }
 0x272   : > { %v2183_v13 = vsel %vm568_vm1, %v2172_v0, 0.0  ;;  %v2813_v14 = vadd.f32 %v2117_v61, %v1505_v8 }
 0x273   : > { %v2184_v11 = vadd.f32 %v2183_v13, %v2182_v60  ;;  %2141 = vst.msk [vmem:[%s4041_s22 + $0x38] sm:$0xff] %vm568_vm1, %v2812_v7  ;;  %v2153_v9 = vadd.f32 %v2152_v5, %v2151_v6  ;;  %v2175_v4 = vmul.f32 %v2812_v7, %v2812_v7 }
 0x274   : > { %2140 = vst.msk [vmem:[%s4041_s22 + $0x30] sm:$0xff] %vm568_vm1, %v2813_v14  ;;  %v2154_v15 = vsel %vm568_vm1, %v2813_v14, 0.0  ;;  %v2174_v16 = vmul.f32 %v2813_v14, %v2813_v14 }
 0x275   : > { %v2155_v17 = vadd.f32 %v2154_v15, %v2153_v9  ;;  %v2186_v18 = vadd.f32 %v2185_v2, %v2184_v11 }
 0x276   : > { %3263 = shalt.err (!%p3260_p6)
}
 0x277   : > { %s3264_s22 = scalar_lea.hbm %s4397_s20, 1024  ;;  %s3268_s26 = scalar_lea.hbm %s4738_s4, 8192 }
 0x278   : > { %p3265_p10 = scmp.ne.s32.totalorder %s4397_s20, %s3264_s22  ;;  %p3269_p9 = scmp.lt.u32.totalorder %s4397_s20, %s4738_s4 }
 0x279   : > { %p3270_p11 = scmp.lt.u32.totalorder %s3268_s26, %s3264_s22  ;;  %p3272_p0 = scmp.lt.u32.totalorder %s3264_s22, %s4397_s20 }
 0x27a   : > { %p3266_p2 = pnand %p3265_p10, %p4739_p12 }
 0x27b   : > { %p3271_p5 = por %p3270_p11, %p3269_p9 }
 0x27c   : > { %p3267_p3 = pneg %p3266_p2 }
 0x27d   : > { %p3273_p1 = por %p3272_p0, %p3271_p5 }
 0x27f   : > { %p3274_p8 = pnand %p3273_p1, %p3267_p3 }
 0x281   : > { %3277 = shalt.err (!%p3274_p8)
}
 0x282   : > { %s3508_s23 = smov 128   ;;  %s3509_s8 = smov 8   ;;  %v2156_v21 = vsel %vm568_vm1, %v2812_v7, 0.0  ;;  %v2187_v22 = vsel %vm568_vm1, %v2174_v16, 0.0  ;;  %v2189_v19 = vsel %vm568_vm1, %v2175_v4, 0.0  ;;  %vm2165_vm10 = vcmask 57344  }
 0x283   : > { %2888 = dma.vmem_to_hbm [thread:$0]  (%p4739_p12), %s4399_s9, 1024, %s4397_s20, %s2200_s27, %s3508_s23, %s3508_s23, %s3509_s8   ;;  %v2157_v1 = vadd.f32 %v2156_v21, %v2155_v17  ;;  %v2188_v10 = vadd.f32 %v2187_v22, %v2186_v18 }
 0x284   : > { %v2142_v32 = vld [vmem:[%s4043_s0] sm:$0x1]  ;;  %s2587_s28 = sshll.u32 %s4737_s13, 4  ;;  %s2239_s9 = sshll.u32 %s4043_s0, 4  ;;  %s4446_s9 = int_to_ptr.vmem [resolvable:$true] %s2239_s9 }
 0x285   : > { %v2158_v12 = vrot.slane %v2157_v1, 4  ;;  %v2190_v20 = vadd.f32 %v2189_v19, %v2188_v10  ;;  %s4741_s20 = sld [smem:[#allocation38_spill]]  ;;  %v2167_v35 = vld [vmem:[%s4045_s19] sm:$0x1]  ;;  %s2252_s27 = sshll.u32 %s4045_s19, 4  ;;  %s4455_s27 = int_to_ptr.vmem [resolvable:$true] %s2252_s27 }
 0x286   : > { %s4742_s17 = sld [smem:[#allocation54_spill]]  ;;  %s4744_s16 = sld [smem:[#allocation55_spill]] }
 0x287   : > { %v2159_v23 = vadd.f32 %v2158_v12, %v2157_v1  ;;  %v2191_v24 = vrot.slane %v2190_v20, 4  ;;  %s4459_s25 = scalar_lea.sflag [#allocation16], %s431_s6  ;;  %s3278_s23 = scalar_lea.vmem %s4446_s9, 16 }
 0x288   : > { %p3279_p12 = scmp.ne.s32.totalorder %s4446_s9, %s3278_s23  ;;  %s3510_s8 = smov [#allocation15]  }
 0x289   : > { %v2160_v26 = vrot.slane %v2159_v23, 2  ;;  %v2192_v28 = vadd.f32 %v2191_v24, %v2190_v20  ;;  %s3282_s2 = sshll.u32 %s3510_s8, 4  ;;  %s3283_s2 = int_to_ptr.vmem [resolvable:$false] %s3282_s2 }
 0x28a   : > { %p3285_p6 = scmp.lt.s32.totalorder %s4446_s9, %s3283_s2 }
 0x28b   : > { %v2193_v29 = vrot.slane %v2192_v28, 2  ;;  %v2161_v27 = vadd.f32 %v2160_v26, %v2159_v23  ;;  %p4746_p13 = scmp.ne.s32.totalorder %s4741_s20, 0 }
 0x28c   : > { %s4743_s1 = smov %s4742_s17  ;;  %s4444_s22 = scalar_lea.hbm %s4742_s17, %s2587_s28 }
 0x28d   : > { %v2162_v30 = vrot.slane %v2161_v27, 1  ;;  %v2194_v31 = vadd.f32 %v2193_v29, %v2192_v28  ;;  %s4745_s26 = smov %s4744_s16  ;;  %s4453_s7 = scalar_lea.hbm %s4744_s16, %s2587_s28 }
 0x28e   : > { %p3280_p4 = pnand %p3279_p12, %p4746_p13 }
 0x28f   : > { %v2163_v33 = vadd.f32 %v2162_v30, %v2161_v27  ;;  %v2195_v34 = vrot.slane %v2194_v31, 1 }
 0x290   : > { %p3281_p7 = pneg %p3280_p4 }
 0x291   : > { %v2164_v36 = vadd.f32 %v2163_v33, %v2142_v32  ;;  %v2196_v37 = vadd.f32 %v2195_v34, %v2194_v31 }
 0x293   : > { %2166 = vst.msk [vmem:[%s4043_s0] sm:$0x1] %vm2165_vm10, %v2164_v36  ;;  %v2197_v38 = vadd.f32 %v2196_v37, %v2167_v35  ;;  %s3284_s0 = scalar_lea.vmem %s3283_s2, 32 }
 0x294   : > { %p3286_p10 = scmp.lt.s32.totalorder %s3284_s0, %s3278_s23 }
 0x296   : > { %p3287_p2 = por %p3286_p10, %p3285_p6 }
 0x298   : > { %p3288_p3 = pnand %p3287_p2, %p3281_p7 }
 0x29a   : > { %3291 = shalt.err (!%p3288_p3)
}
 0x29b   : > { %s3292_s6 = scalar_lea.hbm %s4444_s22, 16  ;;  %s3296_s24 = scalar_lea.hbm %s4743_s1, 32 }
 0x29c   : > { %p3293_p9 = scmp.ne.s32.totalorder %s4444_s22, %s3292_s6  ;;  %p3297_p0 = scmp.lt.u32.totalorder %s4444_s22, %s4743_s1 }
 0x29d   : > { %p3298_p1 = scmp.lt.u32.totalorder %s3296_s24, %s3292_s6  ;;  %p3300_p12 = scmp.lt.u32.totalorder %s3292_s6, %s4444_s22 }
 0x29e   : > { %p3294_p11 = pnand %p3293_p9, %p4746_p13 }
 0x29f   : > { %p3299_p8 = por %p3298_p1, %p3297_p0 }
 0x2a0   : > { %p3295_p5 = pneg %p3294_p11 }
 0x2a1   : > { %p3301_p4 = por %p3300_p12, %p3299_p8 }
 0x2a3   : > { %p3302_p7 = pnand %p3301_p4, %p3295_p5 }
 0x2a5   : > { %3305 = shalt.err (!%p3302_p7)
}
 0x2a6   : > { %2889 = dma.vmem_to_hbm [thread:$0]  (%p4746_p13), %s4446_s9, 16, %s4444_s22, %s4459_s25   ;;  %2198 = vst.msk [vmem:[%s4045_s19] sm:$0x1] %vm2165_vm10, %v2197_v38 }
 0x2a7   : > { %s3306_s18 = scalar_lea.vmem %s4455_s27, 16  ;;  %s3511_s16 = smov [#allocation17]  }
 0x2a8   : > { %p3307_p6 = scmp.ne.s32.totalorder %s4455_s27, %s3306_s18  ;;  %s3310_s23 = sshll.u32 %s3511_s16, 4  ;;  %s3311_s23 = int_to_ptr.vmem [resolvable:$false] %s3310_s23 }
 0x2a9   : > { %s3312_s8 = scalar_lea.vmem %s3311_s23, 32  ;;  %p3313_p3 = scmp.lt.s32.totalorder %s4455_s27, %s3311_s23 }
 0x2aa   : > { %p3308_p10 = pnand %p3307_p6, %p4746_p13  ;;  %p3314_p9 = scmp.lt.s32.totalorder %s3312_s8, %s3306_s18 }
 0x2ac   : > { %p3309_p2 = pneg %p3308_p10  ;;  %p3315_p11 = por %p3314_p9, %p3313_p3 }
 0x2ae   : > { %p3316_p5 = pnand %p3315_p11, %p3309_p2 }
 0x2b0   : > { %3319 = shalt.err (!%p3316_p5)
}
 0x2b1   : > { %s3320_s19 = scalar_lea.hbm %s4453_s7, 16  ;;  %s3324_s2 = scalar_lea.hbm %s4745_s26, 32 }
 0x2b2   : > { %p3321_p0 = scmp.ne.s32.totalorder %s4453_s7, %s3320_s19  ;;  %p3325_p12 = scmp.lt.u32.totalorder %s4453_s7, %s4745_s26 }
 0x2b3   : > { %p3326_p4 = scmp.lt.u32.totalorder %s3324_s2, %s3320_s19  ;;  %p3328_p6 = scmp.lt.u32.totalorder %s3320_s19, %s4453_s7 }
 0x2b4   : > { %p3322_p1 = pnand %p3321_p0, %p4746_p13 }
 0x2b5   : > { %p3327_p7 = por %p3326_p4, %p3325_p12 }
 0x2b6   : > { %p3323_p8 = pneg %p3322_p1 }
 0x2b7   : > { %p3329_p10 = por %p3328_p6, %p3327_p7 }
 0x2b9   : > { %p3330_p2 = pnand %p3329_p10, %p3323_p8 }
 0x2bb   : > { %3333 = shalt.err (!%p3330_p2)
}
 0x2bc   : > { %2890 = dma.vmem_to_hbm [thread:$0]  (%p4746_p13), %s4455_s27, 16, %s4453_s7, %s4459_s25  }
 0x2bd PF: > { %p2931_p3 = scmp.ge.s32.totalorder %s3496_s21, 2  ;;  %s2264_s10 = sand.u32 1, %s3468_s14  }
 0x2be   : > { %p4747_p9 = scmp.ne.s32.totalorder %s4683_s11, 0  ;;  %s2265_s28 = scalar_lea.sflag [#allocation5], %s2264_s10 }
 0x2c0   : > { %p2915_p11 = pnand %p2931_p3, %p4747_p9 }
 0x2c2   : > { %3423 = dma.done.wait (!%p2915_p11), %s2265_s28, 1024  }
 0x2c3   : > { %3425 = vsyncadd (!%p2915_p11), %s2265_s28, 4294966272  ;;  %s4748_s24 = sadd.s32 4294967294, %s3496_s21   ;;  %p4749_p5 = scmp.ne.s32.totalorder %s4685_s30, 0 }
 0x2c4   : > { %s2273_s17 = sand.u32 1, %s4748_s24  }
 0x2c5   : > { %p2918_p0 = pnand %p2931_p3, %p4749_p5  ;;  %s2274_s20 = scalar_lea.sflag [#allocation16], %s2273_s17 }
 0x2c7   : > { %3427 = dma.done.wait (!%p2918_p0), %s2274_s20, 32  }
 0x2c8   : > { %3429 = vsyncadd (!%p2918_p0), %s2274_s20, 4294967264  ;;  %s33_s21 = sadd.s32 1, %s3496_s21   ;;  %s4752_s27 = sld [smem:[#allocation26_spill]] }
 0x2c9   : > { %p4516_p13 = scmp.ge.s32.totalorder %s33_s21, 10   ;;  %s4753_s30 = sld [smem:[#allocation28_spill]] }
 0x2ca   : > { %s4754_s9 = sld [smem:[#allocation29_spill]]  ;;  %s4755_s11 = sld [smem:[#allocation30_spill]] }
 0x2cb   : > { %s4756_s14 = sld [smem:[#allocation31_spill]]  ;;  %s4757_s13 = sld [smem:[#allocation45_spill]] }
 0x2cc   : > { %s4758_s25 = sld [smem:[#allocation32_spill]]  ;;  %s4759_s16 = sld [smem:[#allocation46_spill]] }
 0x2cd   : > { %s4760_s17 = sld [smem:[#allocation35_spill]]  ;;  %s4761_s18 = sld [smem:[#allocation36_spill]] }
 0x2ce   : > { %s4762_s19 = sld [smem:[#allocation40_spill]]  ;;  %s4763_s20 = sld [smem:[#allocation41_spill]] }
 0x2cf   : > { %s4764_s28 = smov %s3440_s29  ;;  %s4765_s29 = smov %s3743_s12 }
 0x2d0   : > { %s4766_s10 = smov %s4785_s3  ;;  %32 = sbr.rel (!%p4516_p13) target bundleno = 28 (0x1c), region = 169 }
 0x2d1   : > { %s4767_s12 = smov %s4756_s14  ;;  %s4768_s14 = smov %s3472_s15 }
 0x2d2   : > { %s4769_s15 = smov %s4758_s25 }
 0x2d7   :  { %2286 = vsyncpa [#allocation4], 1 }
 0x2d8   :  { %2288 = vsyncpa [#allocation4 + $0x1], 1 }
 0x2d9   :  { %2289 = vsyncpa [#allocation7], 1 }
 0x2da   :  { %2291 = vsyncpa [#allocation7 + $0x1], 1 }
 0x2db   :  { %2292 = vsyncpa [#allocation10], 1 }
 0x2dc   :  { %2293 = vsyncpa [#allocation13], 1 }
 0x2dd   :  { %2294 = vsyncpa [#allocation5], 1 }
 0x2de   :  { %2296 = vsyncpa [#allocation5 + $0x1], 1 }
 0x2df   :  { %2297 = vsyncpa [#allocation16], 1 }
 0x2e0   :  { %2299 = vsyncpa [#allocation16 + $0x1], 1 }

</bundles_post_ra>
